<compile_context>
chip_gen: v7x
topology: tpu7x:2x2x1
jax: 0.10.0
libtpu: 0.0.40
codegen_flags: <defaults>
</compile_context>

<pallas_src>
import jax
import jax.numpy as jnp
import numpy as np
from jax.experimental import pallas as pl
from jax.experimental.pallas import tpu as pltpu


def _pick_batch_block(n_batch, hw):
    """Batch elements folded into the matmul M dimension per grid step.

    Prefers M = nb*hw >= 256 (fills the 256-wide MXU on v6e/v7x; >=2 full passes
    on v5e's 128-wide MXU), keeps >= 2 grid steps when n_batch >= 2 so both v7x
    TensorCores get work under "parallel" semantics, and keeps the lane-dense
    output block minor dim (nb*hw) a multiple of 128. Falls back to a single
    full-batch step (block == full array, always a legal BlockSpec) otherwise.
    """
    best = n_batch
    for nb in range(1, n_batch + 1):
        if n_batch % nb:
            continue
        if (nb * hw) % 128:
            continue
        if n_batch >= 2 and n_batch // nb < 2:
            continue
        best = nb
        if nb * hw >= 256:
            break
    return best


def _resblock_kernel(x_ref, w1_ref, b1_ref, w2_ref, b2_ref, out_ref,
                     xpad_s, midpad_s, patches_s):
    # x_ref    : (Nb, H, W, C)        f32  NHWC input tile (Nb batch elements)
    # w*_ref   : (9*C, C)             bf16 tap-major im2col weights [(ky,kx,ci), co]
    # b*_ref   : (1, C)               f32
    # out_ref  : (C, Nb*H*W)          f32  lane-dense (channels-major) output tile
    # xpad_s   : (Nb, H+2, W+2, C)    f32  padded input scratch
    # midpad_s : (Nb, H+2, W+2, C)    f32  padded conv1-activation scratch
    # patches_s: (Nb, H, W, 9*C)      bf16 im2col buffer (reused for both convs)
    Nb, H, W, C = x_ref.shape
    M = Nb * H * W

    # Zero only the 1-pixel border of the padded scratches; the interior is fully
    # overwritten every step.  Done every step (not once under pl.when) so the
    # kernel stays correct when the grid axis is split across TensorCores.
    zrow = jnp.zeros((Nb, 1, W + 2, C), jnp.float32)
    zcol = jnp.zeros((Nb, H + 2, 1, C), jnp.float32)
    for pad_s in (xpad_s, midpad_s):
        pad_s[:, 0:1, :, :] = zrow
        pad_s[:, H + 1:H + 2, :, :] = zrow
        pad_s[:, :, 0:1, :] = zcol
        pad_s[:, :, W + 1:W + 2, :] = zcol

    x_f32 = x_ref[...]                            # residual kept in f32
    xpad_s[:, 1:H + 1, 1:W + 1, :] = x_f32

    def conv3x3(pad_ref, w_ref):
        # im2col: scatter the 9 shifted taps into the (Nb, H, W, 9*C) bf16 buffer,
        # then ONE MXU dot (M, 9*C) @ (9*C, C) with f32 accumulation.
        for ky in range(3):
            for kx in range(3):
                k = ky * 3 + kx
                patches_s[:, :, :, k * C:(k + 1) * C] = (
                    pad_ref[:, ky:ky + H, kx:kx + W, :].astype(jnp.bfloat16))
        patches = patches_s[...].reshape(M, 9 * C)
        return jnp.dot(patches, w_ref[...], preferred_element_type=jnp.float32)

    # conv1 + bias + ReLU (f32 epilogue)
    mid = jnp.maximum(conv3x3(xpad_s, w1_ref) + b1_ref[...], 0.0)     # (M, C)
    midpad_s[:, 1:H + 1, 1:W + 1, :] = mid.reshape(Nb, H, W, C)

    # conv2 + bias + residual add (f32)
    out = x_f32.reshape(M, C) + conv3x3(midpad_s, w2_ref) + b2_ref[...]

    # Lane-dense store: (C, M) has a minor dim that is a multiple of 128 lanes,
    # so the write-back uses full-width (unmasked) vector stores.
    out_ref[...] = jnp.transpose(out).astype(out_ref.dtype)


@jax.jit
def residual_block_basic(content_nchw, cond, w1, b1, w2, b2):
    """Pallas equivalent of ResidualBlock_basic.forward((content, cond)).

    content_nchw: (N, C, H, W) f32 (PyTorch NCHW);  w1, w2: (C, C, 3, 3) OIHW;
    b1, b2: (C,).  Returns (content + conv2(relu(conv1(content))), cond) in NCHW.
    """
    N, C, H, W = content_nchw.shape
    HW = H * W
    Nb = _pick_batch_block(N, HW)
    grid = (N // Nb,)

    # Glue (one HBM pass): NCHW -> NHWC so channels sit on the 128-lane axis.
    # No jnp.pad here -- padding is done inside the kernel's VMEM scratch.
    x_nhwc = jnp.transpose(content_nchw, (0, 2, 3, 1))
    # Tap-major im2col weights [(ky, kx, ci), co], cast to bf16 for the MXU.
    w1m = jnp.transpose(w1, (2, 3, 1, 0)).reshape(9 * C, C).astype(jnp.bfloat16)
    w2m = jnp.transpose(w2, (2, 3, 1, 0)).reshape(9 * C, C).astype(jnp.bfloat16)
    b1m = b1.reshape(1, C).astype(jnp.float32)
    b2m = b2.reshape(1, C).astype(jnp.float32)

    out_cm = pl.pallas_call(
        _resblock_kernel,
        out_shape=jax.ShapeDtypeStruct((C, N * HW), content_nchw.dtype),
        grid_spec=pltpu.PrefetchScalarGridSpec(
            num_scalar_prefetch=0,
            grid=grid,
            in_specs=[
                pl.BlockSpec((Nb, H, W, C), lambda n: (n, 0, 0, 0)),
                pl.BlockSpec((9 * C, C), lambda n: (0, 0)),
                pl.BlockSpec((1, C), lambda n: (0, 0)),
                pl.BlockSpec((9 * C, C), lambda n: (0, 0)),
                pl.BlockSpec((1, C), lambda n: (0, 0)),
            ],
            out_specs=pl.BlockSpec((C, Nb * HW), lambda n: (0, n)),
            scratch_shapes=[
                pltpu.VMEM((Nb, H + 2, W + 2, C), jnp.float32),
                pltpu.VMEM((Nb, H + 2, W + 2, C), jnp.float32),
                pltpu.VMEM((Nb, H, W, 9 * C), jnp.bfloat16),
            ],
        ),
        compiler_params=pltpu.CompilerParams(
            dimension_semantics=("parallel",)),
    )(x_nhwc, w1m, b1m, w2m, b2m)

    # (C, N*H*W) -> (N, C, H, W)
    out_nchw = jnp.transpose(out_cm.reshape(C, N, H, W), (1, 0, 2, 3))
    return out_nchw, cond


def _reference(content_nchw, w1, b1, w2, b2):
    """Pure-JAX f32 reference (matches PyTorch Conv2d semantics)."""
    dn = ("NCHW", "OIHW", "NCHW")
    out = jax.lax.conv_general_dilated(content_nchw, w1, (1, 1), "SAME",
                                       dimension_numbers=dn)
    out = out + b1[None, :, None, None]
    out = jnp.maximum(out, 0.0)
    out = jax.lax.conv_general_dilated(out, w2, (1, 1), "SAME",
                                       dimension_numbers=dn)
    out = out + b2[None, :, None, None]
    return content_nchw + out


if __name__ == "__main__":
    # ResidualBlock_basic(nf=64) on a small NCHW batch (Nb=2 folded per step ->
    # M=128-row dots, 2 parallel grid steps).
    N, nf, H, W = 4, 64, 8, 8

    key = jax.random.PRNGKey(0)
    k_content, k_cond, k_w1, k_b1, k_w2, k_b2 = jax.random.split(key, 6)

    content = jax.random.normal(k_content, (N, nf, H, W), jnp.float32)
    cond = jax.random.normal(k_cond, (N, nf, H, W), jnp.float32)

    # Conv2d(nf, nf, 3, 1, 1, bias=True)-shaped parameters, deterministic init.
    fan_in = nf * 3 * 3
    bound = 1.0 / np.sqrt(fan_in)
    w1 = jax.random.uniform(k_w1, (nf, nf, 3, 3), jnp.float32, -bound, bound)
    b1 = jax.random.uniform(k_b1, (nf,), jnp.float32, -bound, bound)
    w2 = jax.random.uniform(k_w2, (nf, nf, 3, 3), jnp.float32, -bound, bound)
    b2 = jax.random.uniform(k_b2, (nf,), jnp.float32, -bound, bound)

    out, cond_out = residual_block_basic(content, cond, w1, b1, w2, b2)
    out = jax.block_until_ready(out)
    cond_out = jax.block_until_ready(cond_out)

    ref = _reference(content, w1, b1, w2, b2)
    # Matmul inputs are bf16 (f32 accumulation); bias/ReLU/residual are exact
    # f32, so compare at a bf16-level tolerance.
    np.testing.assert_allclose(np.asarray(out), np.asarray(ref),
                               atol=1e-2, rtol=1e-2)
    np.testing.assert_allclose(np.asarray(cond_out), np.asarray(cond))

    print("KERNEL_OK")
</pallas_src>

<mosaic_0001>
module attributes {stable_mosaic.version = 11 : i64} {
  func.func @_resblock_kernel(%arg0: i32, %arg1: memref<2x8x8x64xf32, #tpu.memory_space<vmem>>, %arg2: memref<576x64xbf16, #tpu.memory_space<vmem>>, %arg3: memref<1x64xf32, #tpu.memory_space<vmem>>, %arg4: memref<576x64xbf16, #tpu.memory_space<vmem>>, %arg5: memref<1x64xf32, #tpu.memory_space<vmem>>, %arg6: memref<64x128xf32, #tpu.memory_space<vmem>>, %arg7: memref<2x10x10x64xf32, #tpu.memory_space<vmem>>, %arg8: memref<2x10x10x64xf32, #tpu.memory_space<vmem>>, %arg9: memref<2x8x8x576xbf16, #tpu.memory_space<vmem>>) attributes {dimension_semantics = [#tpu.dimension_semantics<parallel>], iteration_bounds = array<i64: 2>, scalar_prefetch = 0 : i64, scratch_operands = 3 : i64, tpu.core_type = #tpu.core_type<tc>, window_params = [{transform_indices = @transform_0, window_bounds = array<i64: 2, 8, 8, 64>}, {pipeline_mode = #tpu.pipeline_mode<synchronous>, transform_indices = @transform_1, window_bounds = array<i64: 576, 64>}, {pipeline_mode = #tpu.pipeline_mode<synchronous>, transform_indices = @transform_2, window_bounds = array<i64: 1, 64>}, {pipeline_mode = #tpu.pipeline_mode<synchronous>, transform_indices = @transform_3, window_bounds = array<i64: 576, 64>}, {pipeline_mode = #tpu.pipeline_mode<synchronous>, transform_indices = @transform_4, window_bounds = array<i64: 1, 64>}, {transform_indices = @transform_5, window_bounds = array<i64: 64, 128>}]} {
    %cst = arith.constant 0.000000e+00 : f32
    %0 = vector.broadcast %cst : f32 to vector<2x1x10x64xf32>
    %cst_0 = arith.constant 0.000000e+00 : f32
    %1 = vector.broadcast %cst_0 : f32 to vector<2x10x1x64xf32>
    %c0 = arith.constant 0 : index
    %c0_1 = arith.constant 0 : index
    %c0_2 = arith.constant 0 : index
    %c0_3 = arith.constant 0 : index
    %2 = vector.load %arg7[%c0, %c0_1, %c0_2, %c0_3] : memref<2x10x10x64xf32, #tpu.memory_space<vmem>>, vector<2x1x10x64xf32>
    tpu.vector_store %arg7[%c0, %c0_1, %c0_2, %c0_3], %0 {strides = array<i32>} : memref<2x10x10x64xf32, #tpu.memory_space<vmem>>, vector<2x1x10x64xf32>,
    %c0_4 = arith.constant 0 : index
    %c9 = arith.constant 9 : index
    %c0_5 = arith.constant 0 : index
    %c0_6 = arith.constant 0 : index
    %3 = vector.load %arg7[%c0_4, %c9, %c0_5, %c0_6] : memref<2x10x10x64xf32, #tpu.memory_space<vmem>>, vector<2x1x10x64xf32>
    tpu.vector_store %arg7[%c0_4, %c9, %c0_5, %c0_6], %0 {strides = array<i32>} : memref<2x10x10x64xf32, #tpu.memory_space<vmem>>, vector<2x1x10x64xf32>,
    %c0_7 = arith.constant 0 : index
    %c0_8 = arith.constant 0 : index
    %c0_9 = arith.constant 0 : index
    %c0_10 = arith.constant 0 : index
    %4 = vector.load %arg7[%c0_7, %c0_8, %c0_9, %c0_10] : memref<2x10x10x64xf32, #tpu.memory_space<vmem>>, vector<2x10x1x64xf32>
    tpu.vector_store %arg7[%c0_7, %c0_8, %c0_9, %c0_10], %1 {strides = array<i32>} : memref<2x10x10x64xf32, #tpu.memory_space<vmem>>, vector<2x10x1x64xf32>,
    %c0_11 = arith.constant 0 : index
    %c0_12 = arith.constant 0 : index
    %c9_13 = arith.constant 9 : index
    %c0_14 = arith.constant 0 : index
    %5 = vector.load %arg7[%c0_11, %c0_12, %c9_13, %c0_14] : memref<2x10x10x64xf32, #tpu.memory_space<vmem>>, vector<2x10x1x64xf32>
    tpu.vector_store %arg7[%c0_11, %c0_12, %c9_13, %c0_14], %1 {strides = array<i32>} : memref<2x10x10x64xf32, #tpu.memory_space<vmem>>, vector<2x10x1x64xf32>,
    %c0_15 = arith.constant 0 : index
    %c0_16 = arith.constant 0 : index
    %c0_17 = arith.constant 0 : index
    %c0_18 = arith.constant 0 : index
    %6 = vector.load %arg8[%c0_15, %c0_16, %c0_17, %c0_18] : memref<2x10x10x64xf32, #tpu.memory_space<vmem>>, vector<2x1x10x64xf32>
    tpu.vector_store %arg8[%c0_15, %c0_16, %c0_17, %c0_18], %0 {strides = array<i32>} : memref<2x10x10x64xf32, #tpu.memory_space<vmem>>, vector<2x1x10x64xf32>,
    %c0_19 = arith.constant 0 : index
    %c9_20 = arith.constant 9 : index
    %c0_21 = arith.constant 0 : index
    %c0_22 = arith.constant 0 : index
    %7 = vector.load %arg8[%c0_19, %c9_20, %c0_21, %c0_22] : memref<2x10x10x64xf32, #tpu.memory_space<vmem>>, vector<2x1x10x64xf32>
    tpu.vector_store %arg8[%c0_19, %c9_20, %c0_21, %c0_22], %0 {strides = array<i32>} : memref<2x10x10x64xf32, #tpu.memory_space<vmem>>, vector<2x1x10x64xf32>,
    %c0_23 = arith.constant 0 : index
    %c0_24 = arith.constant 0 : index
    %c0_25 = arith.constant 0 : index
    %c0_26 = arith.constant 0 : index
    %8 = vector.load %arg8[%c0_23, %c0_24, %c0_25, %c0_26] : memref<2x10x10x64xf32, #tpu.memory_space<vmem>>, vector<2x10x1x64xf32>
    tpu.vector_store %arg8[%c0_23, %c0_24, %c0_25, %c0_26], %1 {strides = array<i32>} : memref<2x10x10x64xf32, #tpu.memory_space<vmem>>, vector<2x10x1x64xf32>,
    %c0_27 = arith.constant 0 : index
    %c0_28 = arith.constant 0 : index
    %c9_29 = arith.constant 9 : index
    %c0_30 = arith.constant 0 : index
    %9 = vector.load %arg8[%c0_27, %c0_28, %c9_29, %c0_30] : memref<2x10x10x64xf32, #tpu.memory_space<vmem>>, vector<2x10x1x64xf32>
    tpu.vector_store %arg8[%c0_27, %c0_28, %c9_29, %c0_30], %1 {strides = array<i32>} : memref<2x10x10x64xf32, #tpu.memory_space<vmem>>, vector<2x10x1x64xf32>,
    %c0_31 = arith.constant 0 : index
    %c0_32 = arith.constant 0 : index
    %c0_33 = arith.constant 0 : index
    %c0_34 = arith.constant 0 : index
    %10 = vector.load %arg1[%c0_31, %c0_32, %c0_33, %c0_34] : memref<2x8x8x64xf32, #tpu.memory_space<vmem>>, vector<2x8x8x64xf32>
    %c0_35 = arith.constant 0 : index
    %c1 = arith.constant 1 : index
    %c1_36 = arith.constant 1 : index
    %c0_37 = arith.constant 0 : index
    %11 = vector.load %arg7[%c0_35, %c1, %c1_36, %c0_37] : memref<2x10x10x64xf32, #tpu.memory_space<vmem>>, vector<2x8x8x64xf32>
    tpu.vector_store %arg7[%c0_35, %c1, %c1_36, %c0_37], %10 {strides = array<i32>} : memref<2x10x10x64xf32, #tpu.memory_space<vmem>>, vector<2x8x8x64xf32>,
    %c0_38 = arith.constant 0 : index
    %c0_39 = arith.constant 0 : index
    %c0_40 = arith.constant 0 : index
    %c0_41 = arith.constant 0 : index
    %12 = vector.load %arg7[%c0_38, %c0_39, %c0_40, %c0_41] : memref<2x10x10x64xf32, #tpu.memory_space<vmem>>, vector<2x8x8x64xf32>
    %13 = arith.truncf %12 : vector<2x8x8x64xf32> to vector<2x8x8x64xbf16>
    %c0_42 = arith.constant 0 : index
    %c0_43 = arith.constant 0 : index
    %c0_44 = arith.constant 0 : index
    %c0_45 = arith.constant 0 : index
    %14 = vector.load %arg9[%c0_42, %c0_43, %c0_44, %c0_45] : memref<2x8x8x576xbf16, #tpu.memory_space<vmem>>, vector<2x8x8x64xbf16>
    tpu.vector_store %arg9[%c0_42, %c0_43, %c0_44, %c0_45], %13 {strides = array<i32>} : memref<2x8x8x576xbf16, #tpu.memory_space<vmem>>, vector<2x8x8x64xbf16>,
    %c0_46 = arith.constant 0 : index
    %c0_47 = arith.constant 0 : index
    %c1_48 = arith.constant 1 : index
    %c0_49 = arith.constant 0 : index
    %15 = vector.load %arg7[%c0_46, %c0_47, %c1_48, %c0_49] : memref<2x10x10x64xf32, #tpu.memory_space<vmem>>, vector<2x8x8x64xf32>
    %16 = arith.truncf %15 : vector<2x8x8x64xf32> to vector<2x8x8x64xbf16>
    %c0_50 = arith.constant 0 : index
    %c0_51 = arith.constant 0 : index
    %c0_52 = arith.constant 0 : index
    %c64 = arith.constant 64 : index
    %17 = vector.load %arg9[%c0_50, %c0_51, %c0_52, %c64] : memref<2x8x8x576xbf16, #tpu.memory_space<vmem>>, vector<2x8x8x64xbf16>
    tpu.vector_store %arg9[%c0_50, %c0_51, %c0_52, %c64], %16 {strides = array<i32>} : memref<2x8x8x576xbf16, #tpu.memory_space<vmem>>, vector<2x8x8x64xbf16>,
    %c0_53 = arith.constant 0 : index
    %c0_54 = arith.constant 0 : index
    %c2 = arith.constant 2 : index
    %c0_55 = arith.constant 0 : index
    %18 = vector.load %arg7[%c0_53, %c0_54, %c2, %c0_55] : memref<2x10x10x64xf32, #tpu.memory_space<vmem>>, vector<2x8x8x64xf32>
    %19 = arith.truncf %18 : vector<2x8x8x64xf32> to vector<2x8x8x64xbf16>
    %c0_56 = arith.constant 0 : index
    %c0_57 = arith.constant 0 : index
    %c0_58 = arith.constant 0 : index
    %c128 = arith.constant 128 : index
    %20 = vector.load %arg9[%c0_56, %c0_57, %c0_58, %c128] : memref<2x8x8x576xbf16, #tpu.memory_space<vmem>>, vector<2x8x8x64xbf16>
    tpu.vector_store %arg9[%c0_56, %c0_57, %c0_58, %c128], %19 {strides = array<i32>} : memref<2x8x8x576xbf16, #tpu.memory_space<vmem>>, vector<2x8x8x64xbf16>,
    %c0_59 = arith.constant 0 : index
    %c1_60 = arith.constant 1 : index
    %c0_61 = arith.constant 0 : index
    %c0_62 = arith.constant 0 : index
    %21 = vector.load %arg7[%c0_59, %c1_60, %c0_61, %c0_62] : memref<2x10x10x64xf32, #tpu.memory_space<vmem>>, vector<2x8x8x64xf32>
    %22 = arith.truncf %21 : vector<2x8x8x64xf32> to vector<2x8x8x64xbf16>
    %c0_63 = arith.constant 0 : index
    %c0_64 = arith.constant 0 : index
    %c0_65 = arith.constant 0 : index
    %c192 = arith.constant 192 : index
    %23 = vector.load %arg9[%c0_63, %c0_64, %c0_65, %c192] : memref<2x8x8x576xbf16, #tpu.memory_space<vmem>>, vector<2x8x8x64xbf16>
    tpu.vector_store %arg9[%c0_63, %c0_64, %c0_65, %c192], %22 {strides = array<i32>} : memref<2x8x8x576xbf16, #tpu.memory_space<vmem>>, vector<2x8x8x64xbf16>,
    %c0_66 = arith.constant 0 : index
    %c1_67 = arith.constant 1 : index
    %c1_68 = arith.constant 1 : index
    %c0_69 = arith.constant 0 : index
    %24 = vector.load %arg7[%c0_66, %c1_67, %c1_68, %c0_69] : memref<2x10x10x64xf32, #tpu.memory_space<vmem>>, vector<2x8x8x64xf32>
    %25 = arith.truncf %24 : vector<2x8x8x64xf32> to vector<2x8x8x64xbf16>
    %c0_70 = arith.constant 0 : index
    %c0_71 = arith.constant 0 : index
    %c0_72 = arith.constant 0 : index
    %c256 = arith.constant 256 : index
    %26 = vector.load %arg9[%c0_70, %c0_71, %c0_72, %c256] : memref<2x8x8x576xbf16, #tpu.memory_space<vmem>>, vector<2x8x8x64xbf16>
    tpu.vector_store %arg9[%c0_70, %c0_71, %c0_72, %c256], %25 {strides = array<i32>} : memref<2x8x8x576xbf16, #tpu.memory_space<vmem>>, vector<2x8x8x64xbf16>,
    %c0_73 = arith.constant 0 : index
    %c1_74 = arith.constant 1 : index
    %c2_75 = arith.constant 2 : index
    %c0_76 = arith.constant 0 : index
    %27 = vector.load %arg7[%c0_73, %c1_74, %c2_75, %c0_76] : memref<2x10x10x64xf32, #tpu.memory_space<vmem>>, vector<2x8x8x64xf32>
    %28 = arith.truncf %27 : vector<2x8x8x64xf32> to vector<2x8x8x64xbf16>
    %c0_77 = arith.constant 0 : index
    %c0_78 = arith.constant 0 : index
    %c0_79 = arith.constant 0 : index
    %c320 = arith.constant 320 : index
    %29 = vector.load %arg9[%c0_77, %c0_78, %c0_79, %c320] : memref<2x8x8x576xbf16, #tpu.memory_space<vmem>>, vector<2x8x8x64xbf16>
    tpu.vector_store %arg9[%c0_77, %c0_78, %c0_79, %c320], %28 {strides = array<i32>} : memref<2x8x8x576xbf16, #tpu.memory_space<vmem>>, vector<2x8x8x64xbf16>,
    %c0_80 = arith.constant 0 : index
    %c2_81 = arith.constant 2 : index
    %c0_82 = arith.constant 0 : index
    %c0_83 = arith.constant 0 : index
    %30 = vector.load %arg7[%c0_80, %c2_81, %c0_82, %c0_83] : memref<2x10x10x64xf32, #tpu.memory_space<vmem>>, vector<2x8x8x64xf32>
    %31 = arith.truncf %30 : vector<2x8x8x64xf32> to vector<2x8x8x64xbf16>
    %c0_84 = arith.constant 0 : index
    %c0_85 = arith.constant 0 : index
    %c0_86 = arith.constant 0 : index
    %c384 = arith.constant 384 : index
    %32 = vector.load %arg9[%c0_84, %c0_85, %c0_86, %c384] : memref<2x8x8x576xbf16, #tpu.memory_space<vmem>>, vector<2x8x8x64xbf16>
    tpu.vector_store %arg9[%c0_84, %c0_85, %c0_86, %c384], %31 {strides = array<i32>} : memref<2x8x8x576xbf16, #tpu.memory_space<vmem>>, vector<2x8x8x64xbf16>,
    %c0_87 = arith.constant 0 : index
    %c2_88 = arith.constant 2 : index
    %c1_89 = arith.constant 1 : index
    %c0_90 = arith.constant 0 : index
    %33 = vector.load %arg7[%c0_87, %c2_88, %c1_89, %c0_90] : memref<2x10x10x64xf32, #tpu.memory_space<vmem>>, vector<2x8x8x64xf32>
    %34 = arith.truncf %33 : vector<2x8x8x64xf32> to vector<2x8x8x64xbf16>
    %c0_91 = arith.constant 0 : index
    %c0_92 = arith.constant 0 : index
    %c0_93 = arith.constant 0 : index
    %c448 = arith.constant 448 : index
    %35 = vector.load %arg9[%c0_91, %c0_92, %c0_93, %c448] : memref<2x8x8x576xbf16, #tpu.memory_space<vmem>>, vector<2x8x8x64xbf16>
    tpu.vector_store %arg9[%c0_91, %c0_92, %c0_93, %c448], %34 {strides = array<i32>} : memref<2x8x8x576xbf16, #tpu.memory_space<vmem>>, vector<2x8x8x64xbf16>,
    %c0_94 = arith.constant 0 : index
    %c2_95 = arith.constant 2 : index
    %c2_96 = arith.constant 2 : index
    %c0_97 = arith.constant 0 : index
    %36 = vector.load %arg7[%c0_94, %c2_95, %c2_96, %c0_97] : memref<2x10x10x64xf32, #tpu.memory_space<vmem>>, vector<2x8x8x64xf32>
    %37 = arith.truncf %36 : vector<2x8x8x64xf32> to vector<2x8x8x64xbf16>
    %c0_98 = arith.constant 0 : index
    %c0_99 = arith.constant 0 : index
    %c0_100 = arith.constant 0 : index
    %c512 = arith.constant 512 : index
    %38 = vector.load %arg9[%c0_98, %c0_99, %c0_100, %c512] : memref<2x8x8x576xbf16, #tpu.memory_space<vmem>>, vector<2x8x8x64xbf16>
    tpu.vector_store %arg9[%c0_98, %c0_99, %c0_100, %c512], %37 {strides = array<i32>} : memref<2x8x8x576xbf16, #tpu.memory_space<vmem>>, vector<2x8x8x64xbf16>,
    %c0_101 = arith.constant 0 : index
    %c0_102 = arith.constant 0 : index
    %c0_103 = arith.constant 0 : index
    %c0_104 = arith.constant 0 : index
    %39 = vector.load %arg9[%c0_101, %c0_102, %c0_103, %c0_104] : memref<2x8x8x576xbf16, #tpu.memory_space<vmem>>, vector<2x8x8x576xbf16>
    %40 = vector.shape_cast %39 : vector<2x8x8x576xbf16> to vector<128x576xbf16>
    %c0_105 = arith.constant 0 : index
    %c0_106 = arith.constant 0 : index
    %41 = vector.load %arg2[%c0_105, %c0_106] : memref<576x64xbf16, #tpu.memory_space<vmem>>, vector<576x64xbf16>
    %cst_107 = arith.constant dense<0.000000e+00> : vector<128x64xf32>
    %42 = tpu.matmul %40, %41, %cst_107 {dimension_numbers = #tpu.dot_dimension_numbers<[1], [0], [0], [1], [0, 0, 1, 1], [], []>} : vector<128x576xbf16>, vector<576x64xbf16>, vector<128x64xf32> -> vector<128x64xf32>
    %c0_108 = arith.constant 0 : index
    %c0_109 = arith.constant 0 : index
    %43 = vector.load %arg3[%c0_108, %c0_109] : memref<1x64xf32, #tpu.memory_space<vmem>>, vector<1x64xf32>
    %44 = vector.broadcast %43 : vector<1x64xf32> to vector<128x64xf32>
    %45 = arith.addf %42, %44 : vector<128x64xf32>
    %cst_110 = arith.constant 0.000000e+00 : f32
    %46 = vector.broadcast %cst_110 : f32 to vector<128x64xf32>
    %47 = arith.maximumf %45, %46 : vector<128x64xf32>
    %48 = vector.shape_cast %47 : vector<128x64xf32> to vector<2x8x8x64xf32>
    %c0_111 = arith.constant 0 : index
    %c1_112 = arith.constant 1 : index
    %c1_113 = arith.constant 1 : index
    %c0_114 = arith.constant 0 : index
    %49 = vector.load %arg8[%c0_111, %c1_112, %c1_113, %c0_114] : memref<2x10x10x64xf32, #tpu.memory_space<vmem>>, vector<2x8x8x64xf32>
    tpu.vector_store %arg8[%c0_111, %c1_112, %c1_113, %c0_114], %48 {strides = array<i32>} : memref<2x10x10x64xf32, #tpu.memory_space<vmem>>, vector<2x8x8x64xf32>,
    %50 = vector.shape_cast %10 : vector<2x8x8x64xf32> to vector<128x64xf32>
    %c0_115 = arith.constant 0 : index
    %c0_116 = arith.constant 0 : index
    %c0_117 = arith.constant 0 : index
    %c0_118 = arith.constant 0 : index
    %51 = vector.load %arg8[%c0_115, %c0_116, %c0_117, %c0_118] : memref<2x10x10x64xf32, #tpu.memory_space<vmem>>, vector<2x8x8x64xf32>
    %52 = arith.truncf %51 : vector<2x8x8x64xf32> to vector<2x8x8x64xbf16>
    %c0_119 = arith.constant 0 : index
    %c0_120 = arith.constant 0 : index
    %c0_121 = arith.constant 0 : index
    %c0_122 = arith.constant 0 : index
    %53 = vector.load %arg9[%c0_119, %c0_120, %c0_121, %c0_122] : memref<2x8x8x576xbf16, #tpu.memory_space<vmem>>, vector<2x8x8x64xbf16>
    tpu.vector_store %arg9[%c0_119, %c0_120, %c0_121, %c0_122], %52 {strides = array<i32>} : memref<2x8x8x576xbf16, #tpu.memory_space<vmem>>, vector<2x8x8x64xbf16>,
    %c0_123 = arith.constant 0 : index
    %c0_124 = arith.constant 0 : index
    %c1_125 = arith.constant 1 : index
    %c0_126 = arith.constant 0 : index
    %54 = vector.load %arg8[%c0_123, %c0_124, %c1_125, %c0_126] : memref<2x10x10x64xf32, #tpu.memory_space<vmem>>, vector<2x8x8x64xf32>
    %55 = arith.truncf %54 : vector<2x8x8x64xf32> to vector<2x8x8x64xbf16>
    %c0_127 = arith.constant 0 : index
    %c0_128 = arith.constant 0 : index
    %c0_129 = arith.constant 0 : index
    %c64_130 = arith.constant 64 : index
    %56 = vector.load %arg9[%c0_127, %c0_128, %c0_129, %c64_130] : memref<2x8x8x576xbf16, #tpu.memory_space<vmem>>, vector<2x8x8x64xbf16>
    tpu.vector_store %arg9[%c0_127, %c0_128, %c0_129, %c64_130], %55 {strides = array<i32>} : memref<2x8x8x576xbf16, #tpu.memory_space<vmem>>, vector<2x8x8x64xbf16>,
    %c0_131 = arith.constant 0 : index
    %c0_132 = arith.constant 0 : index
    %c2_133 = arith.constant 2 : index
    %c0_134 = arith.constant 0 : index
    %57 = vector.load %arg8[%c0_131, %c0_132, %c2_133, %c0_134] : memref<2x10x10x64xf32, #tpu.memory_space<vmem>>, vector<2x8x8x64xf32>
    %58 = arith.truncf %57 : vector<2x8x8x64xf32> to vector<2x8x8x64xbf16>
    %c0_135 = arith.constant 0 : index
    %c0_136 = arith.constant 0 : index
    %c0_137 = arith.constant 0 : index
    %c128_138 = arith.constant 128 : index
    %59 = vector.load %arg9[%c0_135, %c0_136, %c0_137, %c128_138] : memref<2x8x8x576xbf16, #tpu.memory_space<vmem>>, vector<2x8x8x64xbf16>
    tpu.vector_store %arg9[%c0_135, %c0_136, %c0_137, %c128_138], %58 {strides = array<i32>} : memref<2x8x8x576xbf16, #tpu.memory_space<vmem>>, vector<2x8x8x64xbf16>,
    %c0_139 = arith.constant 0 : index
    %c1_140 = arith.constant 1 : index
    %c0_141 = arith.constant 0 : index
    %c0_142 = arith.constant 0 : index
    %60 = vector.load %arg8[%c0_139, %c1_140, %c0_141, %c0_142] : memref<2x10x10x64xf32, #tpu.memory_space<vmem>>, vector<2x8x8x64xf32>
    %61 = arith.truncf %60 : vector<2x8x8x64xf32> to vector<2x8x8x64xbf16>
    %c0_143 = arith.constant 0 : index
    %c0_144 = arith.constant 0 : index
    %c0_145 = arith.constant 0 : index
    %c192_146 = arith.constant 192 : index
    %62 = vector.load %arg9[%c0_143, %c0_144, %c0_145, %c192_146] : memref<2x8x8x576xbf16, #tpu.memory_space<vmem>>, vector<2x8x8x64xbf16>
    tpu.vector_store %arg9[%c0_143, %c0_144, %c0_145, %c192_146], %61 {strides = array<i32>} : memref<2x8x8x576xbf16, #tpu.memory_space<vmem>>, vector<2x8x8x64xbf16>,
    %c0_147 = arith.constant 0 : index
    %c1_148 = arith.constant 1 : index
    %c1_149 = arith.constant 1 : index
    %c0_150 = arith.constant 0 : index
    %63 = vector.load %arg8[%c0_147, %c1_148, %c1_149, %c0_150] : memref<2x10x10x64xf32, #tpu.memory_space<vmem>>, vector<2x8x8x64xf32>
    %64 = arith.truncf %63 : vector<2x8x8x64xf32> to vector<2x8x8x64xbf16>
    %c0_151 = arith.constant 0 : index
    %c0_152 = arith.constant 0 : index
    %c0_153 = arith.constant 0 : index
    %c256_154 = arith.constant 256 : index
    %65 = vector.load %arg9[%c0_151, %c0_152, %c0_153, %c256_154] : memref<2x8x8x576xbf16, #tpu.memory_space<vmem>>, vector<2x8x8x64xbf16>
    tpu.vector_store %arg9[%c0_151, %c0_152, %c0_153, %c256_154], %64 {strides = array<i32>} : memref<2x8x8x576xbf16, #tpu.memory_space<vmem>>, vector<2x8x8x64xbf16>,
    %c0_155 = arith.constant 0 : index
    %c1_156 = arith.constant 1 : index
    %c2_157 = arith.constant 2 : index
    %c0_158 = arith.constant 0 : index
    %66 = vector.load %arg8[%c0_155, %c1_156, %c2_157, %c0_158] : memref<2x10x10x64xf32, #tpu.memory_space<vmem>>, vector<2x8x8x64xf32>
    %67 = arith.truncf %66 : vector<2x8x8x64xf32> to vector<2x8x8x64xbf16>
    %c0_159 = arith.constant 0 : index
    %c0_160 = arith.constant 0 : index
    %c0_161 = arith.constant 0 : index
    %c320_162 = arith.constant 320 : index
    %68 = vector.load %arg9[%c0_159, %c0_160, %c0_161, %c320_162] : memref<2x8x8x576xbf16, #tpu.memory_space<vmem>>, vector<2x8x8x64xbf16>
    tpu.vector_store %arg9[%c0_159, %c0_160, %c0_161, %c320_162], %67 {strides = array<i32>} : memref<2x8x8x576xbf16, #tpu.memory_space<vmem>>, vector<2x8x8x64xbf16>,
    %c0_163 = arith.constant 0 : index
    %c2_164 = arith.constant 2 : index
    %c0_165 = arith.constant 0 : index
    %c0_166 = arith.constant 0 : index
    %69 = vector.load %arg8[%c0_163, %c2_164, %c0_165, %c0_166] : memref<2x10x10x64xf32, #tpu.memory_space<vmem>>, vector<2x8x8x64xf32>
    %70 = arith.truncf %69 : vector<2x8x8x64xf32> to vector<2x8x8x64xbf16>
    %c0_167 = arith.constant 0 : index
    %c0_168 = arith.constant 0 : index
    %c0_169 = arith.constant 0 : index
    %c384_170 = arith.constant 384 : index
    %71 = vector.load %arg9[%c0_167, %c0_168, %c0_169, %c384_170] : memref<2x8x8x576xbf16, #tpu.memory_space<vmem>>, vector<2x8x8x64xbf16>
    tpu.vector_store %arg9[%c0_167, %c0_168, %c0_169, %c384_170], %70 {strides = array<i32>} : memref<2x8x8x576xbf16, #tpu.memory_space<vmem>>, vector<2x8x8x64xbf16>,
    %c0_171 = arith.constant 0 : index
    %c2_172 = arith.constant 2 : index
    %c1_173 = arith.constant 1 : index
    %c0_174 = arith.constant 0 : index
    %72 = vector.load %arg8[%c0_171, %c2_172, %c1_173, %c0_174] : memref<2x10x10x64xf32, #tpu.memory_space<vmem>>, vector<2x8x8x64xf32>
    %73 = arith.truncf %72 : vector<2x8x8x64xf32> to vector<2x8x8x64xbf16>
    %c0_175 = arith.constant 0 : index
    %c0_176 = arith.constant 0 : index
    %c0_177 = arith.constant 0 : index
    %c448_178 = arith.constant 448 : index
    %74 = vector.load %arg9[%c0_175, %c0_176, %c0_177, %c448_178] : memref<2x8x8x576xbf16, #tpu.memory_space<vmem>>, vector<2x8x8x64xbf16>
    tpu.vector_store %arg9[%c0_175, %c0_176, %c0_177, %c448_178], %73 {strides = array<i32>} : memref<2x8x8x576xbf16, #tpu.memory_space<vmem>>, vector<2x8x8x64xbf16>,
    %c0_179 = arith.constant 0 : index
    %c2_180 = arith.constant 2 : index
    %c2_181 = arith.constant 2 : index
    %c0_182 = arith.constant 0 : index
    %75 = vector.load %arg8[%c0_179, %c2_180, %c2_181, %c0_182] : memref<2x10x10x64xf32, #tpu.memory_space<vmem>>, vector<2x8x8x64xf32>
    %76 = arith.truncf %75 : vector<2x8x8x64xf32> to vector<2x8x8x64xbf16>
    %c0_183 = arith.constant 0 : index
    %c0_184 = arith.constant 0 : index
    %c0_185 = arith.constant 0 : index
    %c512_186 = arith.constant 512 : index
    %77 = vector.load %arg9[%c0_183, %c0_184, %c0_185, %c512_186] : memref<2x8x8x576xbf16, #tpu.memory_space<vmem>>, vector<2x8x8x64xbf16>
    tpu.vector_store %arg9[%c0_183, %c0_184, %c0_185, %c512_186], %76 {strides = array<i32>} : memref<2x8x8x576xbf16, #tpu.memory_space<vmem>>, vector<2x8x8x64xbf16>,
    %c0_187 = arith.constant 0 : index
    %c0_188 = arith.constant 0 : index
    %c0_189 = arith.constant 0 : index
    %c0_190 = arith.constant 0 : index
    %78 = vector.load %arg9[%c0_187, %c0_188, %c0_189, %c0_190] : memref<2x8x8x576xbf16, #tpu.memory_space<vmem>>, vector<2x8x8x576xbf16>
    %79 = vector.shape_cast %78 : vector<2x8x8x576xbf16> to vector<128x576xbf16>
    %c0_191 = arith.constant 0 : index
    %c0_192 = arith.constant 0 : index
    %80 = vector.load %arg4[%c0_191, %c0_192] : memref<576x64xbf16, #tpu.memory_space<vmem>>, vector<576x64xbf16>
    %cst_193 = arith.constant dense<0.000000e+00> : vector<128x64xf32>
    %81 = tpu.matmul %79, %80, %cst_193 {dimension_numbers = #tpu.dot_dimension_numbers<[1], [0], [0], [1], [0, 0, 1, 1], [], []>} : vector<128x576xbf16>, vector<576x64xbf16>, vector<128x64xf32> -> vector<128x64xf32>
    %82 = arith.addf %50, %81 : vector<128x64xf32>
    %c0_194 = arith.constant 0 : index
    %c0_195 = arith.constant 0 : index
    %83 = vector.load %arg5[%c0_194, %c0_195] : memref<1x64xf32, #tpu.memory_space<vmem>>, vector<1x64xf32>
    %84 = vector.broadcast %83 : vector<1x64xf32> to vector<128x64xf32>
    %85 = arith.addf %82, %84 : vector<128x64xf32>
    %86 = tpu.transpose %85, [1, 0] : vector<128x64xf32> -> vector<64x128xf32>
    %c0_196 = arith.constant 0 : index
    %c0_197 = arith.constant 0 : index
    %87 = vector.load %arg6[%c0_196, %c0_197] : memref<64x128xf32, #tpu.memory_space<vmem>>, vector<64x128xf32>
    tpu.vector_store %arg6[%c0_196, %c0_197], %86 {strides = array<i32>} : memref<64x128xf32, #tpu.memory_space<vmem>>, vector<64x128xf32>,
    return
  }
  func.func @transform_0(%arg0: i32) -> (i32, i32, i32, i32) {
    %c0_i32 = arith.constant 0 : i32
    %c0_i32_0 = arith.constant 0 : i32
    %c0_i32_1 = arith.constant 0 : i32
    %c0_i32_2 = arith.constant 0 : i32
    return %arg0, %c0_i32, %c0_i32_0, %c0_i32_1 : i32, i32, i32, i32
  }
  func.func @transform_1(%arg0: i32) -> (i32, i32) {
    %c0_i32 = arith.constant 0 : i32
    %c0_i32_0 = arith.constant 0 : i32
    %c0_i32_1 = arith.constant 0 : i32
    return %c0_i32, %c0_i32_0 : i32, i32
  }
  func.func @transform_2(%arg0: i32) -> (i32, i32) {
    %c0_i32 = arith.constant 0 : i32
    %c0_i32_0 = arith.constant 0 : i32
    %c0_i32_1 = arith.constant 0 : i32
    return %c0_i32, %c0_i32_0 : i32, i32
  }
  func.func @transform_3(%arg0: i32) -> (i32, i32) {
    %c0_i32 = arith.constant 0 : i32
    %c0_i32_0 = arith.constant 0 : i32
    %c0_i32_1 = arith.constant 0 : i32
    return %c0_i32, %c0_i32_0 : i32, i32
  }
  func.func @transform_4(%arg0: i32) -> (i32, i32) {
    %c0_i32 = arith.constant 0 : i32
    %c0_i32_0 = arith.constant 0 : i32
    %c0_i32_1 = arith.constant 0 : i32
    return %c0_i32, %c0_i32_0 : i32, i32
  }
  func.func @transform_5(%arg0: i32) -> (i32, i32) {
    %c0_i32 = arith.constant 0 : i32
    %c0_i32_0 = arith.constant 0 : i32
    return %c0_i32, %arg0 : i32, i32
  }
}

</mosaic_0001>

<bundles_post_ra>
// kernel: residual_block_basic.1
= control target key start
LH: loop header
LB: loop body
LE: loop exit
PB: predicated region body
PF: predicated region fallthrough
CT: control target
= control target key end

     0   :  { %s4935_s18 = smov 0   ;;  %s4937_s19 = smov 0   ;;  %s6434_s0 = inlined_call_operand.vmem [shape: f32[4,8,8,64], index: 0, kind: input, shape index: {}]   ;;  %s6435_s1 = inlined_call_operand.vmem [shape: bf16[576,64], index: 1, kind: input, shape index: {}]   ;;  %s6436_s2 = inlined_call_operand.vmem [shape: f32[1,64], index: 2, kind: input, shape index: {}]   ;;  %s6437_s3 = inlined_call_operand.vmem [shape: bf16[576,64], index: 3, kind: input, shape index: {}]   ;;  %s6438_s4 = inlined_call_operand.vmem [shape: f32[1,64], index: 4, kind: input, shape index: {}]   ;;  %s6439_s5 = inlined_call_operand.vmem [shape: f32[64,256], index: 5, kind: output, shape index: {}]  }
   0x1   :  { %s4939_s20 = smov 0  }
   0x2 LB: > { %s4948_s21 = sadd.s32 4294967295, %s4901_s20   ;;  %s4950_s22 = sadd.s32 1, %s4901_s20   ;;  %s4901_s20 = sphi %s4939_s20, %s6444_s20   ;;  %s4897_s19 = sphi %s4937_s19, %s6443_s19   ;;  %s4893_s18 = sphi %s4935_s18, %s6442_s18  }
   0x3   : > { %s129_s23 = ssub.s32 %s4901_s20, %s4950_s22  ;;  %s132_s24 = sadd.s32 1, %s4897_s19 }
   0x4   : > { %p130_p0 = scmp.eq.s32.totalorder %s129_s23, 0  ;;  %p142_p1 = scmp.ne.s32.totalorder %s4897_s19, %s4893_s18 }
   0x5   : > { %p143_p2 = scmp.eq.s32.totalorder %s4948_s21, 1  ;;  %p3939_p3 = scmp.ge.s32.totalorder %s4901_s20, 1 }
   0x6   : > { %s4958_s25 = scalar_select %p130_p0, %s4897_s19, %s132_s24  }
   0x7   : > { %p4960_p4 = por %p143_p2, %p142_p1  ;;  %p189_p5 = scmp.lt.s32.totalorder %s4901_s20, 3 }
   0x9   : > { %p190_p6 = pnand %p3939_p3, %p189_p5 }
   0xa   : > { %vm225_vm0 = vcmask (!%p190_p6), 523264   ;;  %vm227_vm1 = vcmask (!%p190_p6), 517120   ;;  %vm236_vm2 = vcmask (!%p190_p6), 516096   ;;  %s3941_s27 = sshll.u32 (!%p190_p6), %s4948_s21, 1  ;;  %v4903_v0 = vmov (!%p190_p6), 0.0   ;;  %v4729_v1 = vld [vmem:[%s6435_s1 + $0x40] sm:$0xff] (!%p190_p6)  }
   0xb   : > { %193 = sbr.rel (%p190_p6) target bundleno = 1112 (0x458), region = 40  ;;  %226 = vst.msk [vmem:[#allocation2] sm:$0xff] (!%p190_p6), %vm225_vm0, %v4903_v0  ;;  %229 = vst.msk [vmem:[#allocation2 + $0xa0] sm:$0xff] (!%p190_p6), %vm225_vm0, %v4903_v0  ;;  %p5127_p7 = scmp.lt.s32.totalorder (!%p190_p6), %s3941_s27, 3  ;;  %v4730_v2 = vld [vmem:[%s6435_s1] sm:$0xff] (!%p190_p6)   ;;  %4375 = vmatprep.subr.bf16.mxu0 (!%p190_p6), %v4729_v1  ;;  %v4731_v3 = vld [vmem:[%s6435_s1 + $0x48] sm:$0xff] (!%p190_p6)  }
   0xc   : > { %228 = vst.msk [vmem:[#allocation2 + $0x8] sm:$0x3] (!%p190_p6), %vm227_vm1, %v4903_v0  ;;  %230 = vst.msk [vmem:[#allocation2 + $0xa8] sm:$0x3] (!%p190_p6), %vm227_vm1, %v4903_v0  ;;  %4376 = vmatpush3.bf16.msra.mxu0 (!%p190_p6), %v4730_v2  ;;  %v4732_v4 = vld [vmem:[%s6435_s1 + $0x8] sm:$0xff] (!%p190_p6)   ;;  %v4733_v5 = vld [vmem:[%s6435_s1 + $0x50] sm:$0xff] (!%p190_p6)  }
   0xd   : > { %232 = vst.msk [vmem:[#allocation2 + $0x90] sm:$0xff] (!%p190_p6), %vm225_vm0, %v4903_v0  ;;  %234 = vst.msk [vmem:[#allocation2 + $0x130] sm:$0xff] (!%p190_p6), %vm225_vm0, %v4903_v0  ;;  %4377 = vmatprep.subr.bf16.mxu0 (!%p190_p6), %v4731_v3  ;;  %v4734_v6 = vld [vmem:[%s6435_s1 + $0x10] sm:$0xff] (!%p190_p6)   ;;  %s4904_s24 = smov (!%p190_p6), 64   ;;  %v4735_v25 = vld [vmem:[%s6435_s1 + $0x58] sm:$0xff] (!%p190_p6)   ;;  %vm391_vm3 = vcmask (!%p190_p6), 519168  }
   0xe   : > { %233 = vst.msk [vmem:[#allocation2 + $0x98] sm:$0x3] (!%p190_p6), %vm227_vm1, %v4903_v0  ;;  %235 = vst.msk [vmem:[#allocation2 + $0x138] sm:$0x3] (!%p190_p6), %vm227_vm1, %v4903_v0  ;;  %vm536_vm4 = vcmask (!%p190_p6), 1043968   ;;  %s214_s11 = sand.u32 (!%p190_p6), 1, %s4893_s18  }
   0xf   : > { %238 = vst.msk [vmem:[#allocation2 + $0x10] sm:$0x1] (!%p190_p6), %vm236_vm2, %v4903_v0  ;;  %239 = vst.msk [vmem:[#allocation2 + $0x20] sm:$0x1] (!%p190_p6), %vm236_vm2, %v4903_v0 }
  0x10   : > { %240 = vst.msk [vmem:[#allocation2 + $0x30] sm:$0x1] (!%p190_p6), %vm236_vm2, %v4903_v0  ;;  %241 = vst.msk [vmem:[#allocation2 + $0x40] sm:$0x1] (!%p190_p6), %vm236_vm2, %v4903_v0  ;;  %4378 = vmatpush3.bf16.msra.mxu0 (!%p190_p6), %v4732_v4 }
  0x11   : > { %242 = vst.msk [vmem:[#allocation2 + $0x50] sm:$0x1] (!%p190_p6), %vm236_vm2, %v4903_v0  ;;  %243 = vst.msk [vmem:[#allocation2 + $0x60] sm:$0x1] (!%p190_p6), %vm236_vm2, %v4903_v0  ;;  %4379 = vmatprep.subr.bf16.mxu0 (!%p190_p6), %v4733_v5 }
  0x12   : > { %244 = vst.msk [vmem:[#allocation2 + $0x70] sm:$0x1] %vm236_vm2, %v4903_v0  ;;  %245 = vst.msk [vmem:[#allocation2 + $0x80] sm:$0x1] %vm236_vm2, %v4903_v0  ;;  %s6446_s27 = smov (!%p5127_p7, %s3941_s27), 3  ;;  %s4243_s18 = sshll.u32 (%p4960_p4), %s4948_s21, 3 }
  0x13   : > { %248 = vst.msk [vmem:[#allocation2 + $0xb0] sm:$0x1] %vm236_vm2, %v4903_v0  ;;  %249 = vst.msk [vmem:[#allocation2 + $0xc0] sm:$0x1] %vm236_vm2, %v4903_v0  ;;  %s4246_s12 = sshll.u32 %s6446_s27, 6  ;;  %v408_v10 = vld [vmem:[#allocation2 + $0x1] sm:$0xff]  ;;  %s3824_s16 = scalar_lea.vmem (%p4960_p4), %s6439_s5, %s4243_s18 }
  0x14   : > { %250 = vst.msk [vmem:[#allocation2 + $0xd0] sm:$0x1] %vm236_vm2, %v4903_v0  ;;  %251 = vst.msk [vmem:[#allocation2 + $0xe0] sm:$0x1] %vm236_vm2, %v4903_v0  ;;  %s5185_s17 = scalar_lea.vmem %s6434_s0, %s4246_s12  ;;  %v4247_v13 = vpack.c.bf16 %v408_v10, %v408_v10  ;;  %4380 = vmatpush3.bf16.msra.mxu0 %v4734_v6  ;;  %s3940_s12 = sshll.u32 %s214_s11, 6 }
  0x15   : > { %252 = vst.msk [vmem:[#allocation2 + $0xf0] sm:$0x1] %vm236_vm2, %v4903_v0  ;;  %253 = vst.msk [vmem:[#allocation2 + $0x100] sm:$0x1] %vm236_vm2, %v4903_v0  ;;  %v5191_v7 = vld [vmem:[%s5185_s17] sm:$0xff]  ;;  %v5194_v8 = vld [vmem:[%s5185_s17 + $0x8] sm:$0xff]  ;;  %4381 = vmatprep.subr.bf16.mxu0 %v4735_v25 }
  0x16   : > { %254 = vst.msk [vmem:[#allocation2 + $0x110] sm:$0x1] %vm236_vm2, %v4903_v0  ;;  %255 = vst.msk [vmem:[#allocation2 + $0x120] sm:$0x1] %vm236_vm2, %v4903_v0  ;;  %v5197_v9 = vld [vmem:[%s5185_s17 + $0x10] sm:$0xff]  ;;  %v5206_v11 = vld [vmem:[%s5185_s17 + $0x18] sm:$0xff]  ;;  %488 = vrot.lane.b32.xlu0 %v4247_v13, %s4904_s24 }
  0x17   : > { %258 = vst.msk [vmem:[#allocation2 + $0x19] sm:$0x1] %vm236_vm2, %v4903_v0  ;;  %259 = vst.msk [vmem:[#allocation2 + $0x29] sm:$0x1] %vm236_vm2, %v4903_v0  ;;  %v5209_v12 = vld [vmem:[%s5185_s17 + $0x20] sm:$0xff]  ;;  %v5216_v14 = vld [vmem:[%s5185_s17 + $0x28] sm:$0xff] }
  0x18   : > { %260 = vst.msk [vmem:[#allocation2 + $0x39] sm:$0x1] %vm236_vm2, %v4903_v0  ;;  %261 = vst.msk [vmem:[#allocation2 + $0x49] sm:$0x1] %vm236_vm2, %v4903_v0  ;;  %v5219_v15 = vld [vmem:[%s5185_s17 + $0x30] sm:$0xff]  ;;  %v5222_v16 = vld [vmem:[%s5185_s17 + $0x38] sm:$0xff] }
  0x19   : > { %262 = vst.msk [vmem:[#allocation2 + $0x59] sm:$0x1] %vm236_vm2, %v4903_v0  ;;  %263 = vst.msk [vmem:[#allocation2 + $0x69] sm:$0x1] %vm236_vm2, %v4903_v0  ;;  %v5231_v17 = vld [vmem:[%s5185_s17 + $0x40] sm:$0xff]  ;;  %v5234_v18 = vld [vmem:[%s5185_s17 + $0x48] sm:$0xff] }
  0x1a   : > { %264 = vst.msk [vmem:[#allocation2 + $0x79] sm:$0x1] %vm236_vm2, %v4903_v0  ;;  %265 = vst.msk [vmem:[#allocation2 + $0x89] sm:$0x1] %vm236_vm2, %v4903_v0  ;;  %v5242_v19 = vld [vmem:[%s5185_s17 + $0x50] sm:$0xff]  ;;  %v5245_v20 = vld [vmem:[%s5185_s17 + $0x58] sm:$0xff] }
  0x1b   : > { %268 = vst.msk [vmem:[#allocation2 + $0xb9] sm:$0x1] %vm236_vm2, %v4903_v0  ;;  %269 = vst.msk [vmem:[#allocation2 + $0xc9] sm:$0x1] %vm236_vm2, %v4903_v0  ;;  %v5248_v21 = vld [vmem:[%s5185_s17 + $0x60] sm:$0xff]  ;;  %v5257_v22 = vld [vmem:[%s5185_s17 + $0x68] sm:$0xff] }
  0x1c   : > { %270 = vst.msk [vmem:[#allocation2 + $0xd9] sm:$0x1] %vm236_vm2, %v4903_v0  ;;  %271 = vst.msk [vmem:[#allocation2 + $0xe9] sm:$0x1] %vm236_vm2, %v4903_v0  ;;  %v5260_v23 = vld [vmem:[%s5185_s17 + $0x70] sm:$0xff]  ;;  %v5263_v24 = vld [vmem:[%s5185_s17 + $0x78] sm:$0xff] }
  0x1d   : > { %272 = vst.msk [vmem:[#allocation2 + $0xf9] sm:$0x1] %vm236_vm2, %v4903_v0  ;;  %273 = vst.msk [vmem:[#allocation2 + $0x109] sm:$0x1] %vm236_vm2, %v4903_v0  ;;  %s6400_s13 = scalar_lea.vmem [#allocation5], %s3940_s12 }
  0x1e   : > { %274 = vst.msk [vmem:[#allocation2 + $0x119] sm:$0x1] %vm236_vm2, %v4903_v0  ;;  %275 = vst.msk [vmem:[#allocation2 + $0x129] sm:$0x1] %vm236_vm2, %v4903_v0 }
  0x1f   : > { %277 = vst.msk [vmem:[#allocation3] sm:$0xff] %vm225_vm0, %v4903_v0  ;;  %279 = vst.msk [vmem:[#allocation3 + $0xa0] sm:$0xff] %vm225_vm0, %v4903_v0 }
  0x20   : > { %278 = vst.msk [vmem:[#allocation3 + $0x8] sm:$0x3] %vm227_vm1, %v4903_v0  ;;  %280 = vst.msk [vmem:[#allocation3 + $0xa8] sm:$0x3] %vm227_vm1, %v4903_v0 }
  0x21   : > { %282 = vst.msk [vmem:[#allocation3 + $0x90] sm:$0xff] %vm225_vm0, %v4903_v0  ;;  %284 = vst.msk [vmem:[#allocation3 + $0x130] sm:$0xff] %vm225_vm0, %v4903_v0 }
  0x22   : > { %283 = vst.msk [vmem:[#allocation3 + $0x98] sm:$0x3] %vm227_vm1, %v4903_v0  ;;  %285 = vst.msk [vmem:[#allocation3 + $0x138] sm:$0x3] %vm227_vm1, %v4903_v0 }
  0x23   : > { %287 = vst.msk [vmem:[#allocation3 + $0x10] sm:$0x1] %vm236_vm2, %v4903_v0  ;;  %288 = vst.msk [vmem:[#allocation3 + $0x20] sm:$0x1] %vm236_vm2, %v4903_v0 }
  0x24   : > { %289 = vst.msk [vmem:[#allocation3 + $0x30] sm:$0x1] %vm236_vm2, %v4903_v0  ;;  %290 = vst.msk [vmem:[#allocation3 + $0x40] sm:$0x1] %vm236_vm2, %v4903_v0 }
  0x25   : > { %291 = vst.msk [vmem:[#allocation3 + $0x50] sm:$0x1] %vm236_vm2, %v4903_v0  ;;  %292 = vst.msk [vmem:[#allocation3 + $0x60] sm:$0x1] %vm236_vm2, %v4903_v0 }
  0x26   : > { %293 = vst.msk [vmem:[#allocation3 + $0x70] sm:$0x1] %vm236_vm2, %v4903_v0  ;;  %294 = vst.msk [vmem:[#allocation3 + $0x80] sm:$0x1] %vm236_vm2, %v4903_v0 }
  0x27   : > { %297 = vst.msk [vmem:[#allocation3 + $0xb0] sm:$0x1] %vm236_vm2, %v4903_v0  ;;  %298 = vst.msk [vmem:[#allocation3 + $0xc0] sm:$0x1] %vm236_vm2, %v4903_v0 }
  0x28   : > { %299 = vst.msk [vmem:[#allocation3 + $0xd0] sm:$0x1] %vm236_vm2, %v4903_v0  ;;  %300 = vst.msk [vmem:[#allocation3 + $0xe0] sm:$0x1] %vm236_vm2, %v4903_v0 }
  0x29   : > { %301 = vst.msk [vmem:[#allocation3 + $0xf0] sm:$0x1] %vm236_vm2, %v4903_v0  ;;  %302 = vst.msk [vmem:[#allocation3 + $0x100] sm:$0x1] %vm236_vm2, %v4903_v0 }
  0x2a   : > { %303 = vst.msk [vmem:[#allocation3 + $0x110] sm:$0x1] %vm236_vm2, %v4903_v0  ;;  %304 = vst.msk [vmem:[#allocation3 + $0x120] sm:$0x1] %vm236_vm2, %v4903_v0 }
  0x2b   : > { %307 = vst.msk [vmem:[#allocation3 + $0x19] sm:$0x1] %vm236_vm2, %v4903_v0  ;;  %308 = vst.msk [vmem:[#allocation3 + $0x29] sm:$0x1] %vm236_vm2, %v4903_v0 }
  0x2c   : > { %309 = vst.msk [vmem:[#allocation3 + $0x39] sm:$0x1] %vm236_vm2, %v4903_v0  ;;  %310 = vst.msk [vmem:[#allocation3 + $0x49] sm:$0x1] %vm236_vm2, %v4903_v0 }
  0x2d   : > { %311 = vst.msk [vmem:[#allocation3 + $0x59] sm:$0x1] %vm236_vm2, %v4903_v0  ;;  %312 = vst.msk [vmem:[#allocation3 + $0x69] sm:$0x1] %vm236_vm2, %v4903_v0 }
  0x2e   : > { %313 = vst.msk [vmem:[#allocation3 + $0x79] sm:$0x1] %vm236_vm2, %v4903_v0  ;;  %314 = vst.msk [vmem:[#allocation3 + $0x89] sm:$0x1] %vm236_vm2, %v4903_v0 }
  0x2f   : > { %317 = vst.msk [vmem:[#allocation3 + $0xb9] sm:$0x1] %vm236_vm2, %v4903_v0  ;;  %318 = vst.msk [vmem:[#allocation3 + $0xc9] sm:$0x1] %vm236_vm2, %v4903_v0 }
  0x30   : > { %319 = vst.msk [vmem:[#allocation3 + $0xd9] sm:$0x1] %vm236_vm2, %v4903_v0  ;;  %320 = vst.msk [vmem:[#allocation3 + $0xe9] sm:$0x1] %vm236_vm2, %v4903_v0 }
  0x31   : > { %321 = vst.msk [vmem:[#allocation3 + $0xf9] sm:$0x1] %vm236_vm2, %v4903_v0  ;;  %322 = vst.msk [vmem:[#allocation3 + $0x109] sm:$0x1] %vm236_vm2, %v4903_v0 }
  0x32   : > { %323 = vst.msk [vmem:[#allocation3 + $0x119] sm:$0x1] %vm236_vm2, %v4903_v0  ;;  %324 = vst.msk [vmem:[#allocation3 + $0x129] sm:$0x1] %vm236_vm2, %v4903_v0 }
  0x33   : > { %257 = vst.msk [vmem:[#allocation2 + $0x9] sm:$0x1] %vm236_vm2, %v4903_v0  ;;  %237 = vst.msk [vmem:[#allocation2] sm:$0x1] %vm236_vm2, %v4903_v0 }
  0x34   : > { %246 = vst.msk [vmem:[#allocation2 + $0x90] sm:$0x1] %vm236_vm2, %v4903_v0  ;;  %247 = vst.msk [vmem:[#allocation2 + $0xa0] sm:$0x1] %vm236_vm2, %v4903_v0 }
  0x35   : > { %256 = vst.msk [vmem:[#allocation2 + $0x130] sm:$0x1] %vm236_vm2, %v4903_v0  ;;  %266 = vst.msk [vmem:[#allocation2 + $0x99] sm:$0x1] %vm236_vm2, %v4903_v0 }
  0x36   : > { %267 = vst.msk [vmem:[#allocation2 + $0xa9] sm:$0x1] %vm236_vm2, %v4903_v0  ;;  %276 = vst.msk [vmem:[#allocation2 + $0x139] sm:$0x1] %vm236_vm2, %v4903_v0 }
  0x37   : > { %286 = vst.msk [vmem:[#allocation3] sm:$0x1] %vm236_vm2, %v4903_v0  ;;  %295 = vst.msk [vmem:[#allocation3 + $0x90] sm:$0x1] %vm236_vm2, %v4903_v0 }
  0x38   : > { %296 = vst.msk [vmem:[#allocation3 + $0xa0] sm:$0x1] %vm236_vm2, %v4903_v0  ;;  %305 = vst.msk [vmem:[#allocation3 + $0x130] sm:$0x1] %vm236_vm2, %v4903_v0 }
  0x39   : > { %306 = vst.msk [vmem:[#allocation3 + $0x9] sm:$0x1] %vm236_vm2, %v4903_v0  ;;  %315 = vst.msk [vmem:[#allocation3 + $0x99] sm:$0x1] %vm236_vm2, %v4903_v0 }
  0x3a   : > { %316 = vst.msk [vmem:[#allocation3 + $0xa9] sm:$0x1] %vm236_vm2, %v4903_v0  ;;  %325 = vst.msk [vmem:[#allocation3 + $0x139] sm:$0x1] %vm236_vm2, %v4903_v0  ;;  %v359_v26 = vld [vmem:[#allocation2] sm:$0xff] }
  0x3b   : > { %343 = vst.msk [vmem:[#allocation2 + $0x11] sm:$0xff] %vm225_vm0, %v5191_v7  ;;  %344 = vst.msk [vmem:[#allocation2 + $0x21] sm:$0xff] %vm225_vm0, %v5194_v8  ;;  %v375_v30 = vpack.c.bf16 %v359_v26, %v359_v26 }
  0x3c   : > { %345 = vst.msk [vmem:[#allocation2 + $0x31] sm:$0xff] %vm225_vm0, %v5197_v9  ;;  %346 = vst.msk [vmem:[#allocation2 + $0x41] sm:$0xff] %vm225_vm0, %v5206_v11 }
  0x3d   : > { %347 = vst.msk [vmem:[#allocation2 + $0x51] sm:$0xff] %vm225_vm0, %v5209_v12  ;;  %348 = vst.msk [vmem:[#allocation2 + $0x61] sm:$0xff] %vm225_vm0, %v5216_v14 }
  0x3e   : > { %349 = vst.msk [vmem:[#allocation2 + $0x71] sm:$0xff] %vm225_vm0, %v5219_v15  ;;  %350 = vst.msk [vmem:[#allocation2 + $0x81] sm:$0xff] %vm225_vm0, %v5222_v16 }
  0x3f   : > { %351 = vst.msk [vmem:[#allocation2 + $0xb1] sm:$0xff] %vm225_vm0, %v5231_v17  ;;  %352 = vst.msk [vmem:[#allocation2 + $0xc1] sm:$0xff] %vm225_vm0, %v5234_v18 }
  0x40   : > { %353 = vst.msk [vmem:[#allocation2 + $0xd1] sm:$0xff] %vm225_vm0, %v5242_v19  ;;  %354 = vst.msk [vmem:[#allocation2 + $0xe1] sm:$0xff] %vm225_vm0, %v5245_v20 }
  0x41   : > { %355 = vst.msk [vmem:[#allocation2 + $0xf1] sm:$0xff] %vm225_vm0, %v5248_v21  ;;  %356 = vst.msk [vmem:[#allocation2 + $0x101] sm:$0xff] %vm225_vm0, %v5257_v22 }
  0x42   : > { %357 = vst.msk [vmem:[#allocation2 + $0x111] sm:$0xff] %vm225_vm0, %v5260_v23  ;;  %358 = vst.msk [vmem:[#allocation2 + $0x121] sm:$0xff] %vm225_vm0, %v5263_v24  ;;  %v601_v27 = vld [vmem:[#allocation2 + $0x10] sm:$0xff]  ;;  %v602_v29 = vld [vmem:[#allocation2 + $0x20] sm:$0xff] }
  0x43   : > { %v409_v28 = vld [vmem:[#allocation2 + $0x11] sm:$0xff]  ;;  %v4263_v31 = vpack.c.bf16 %v601_v27, %v601_v27  ;;  %v4264_v33 = vpack.c.bf16 %v602_v29, %v602_v29  ;;  %v410_v34 = vld [vmem:[#allocation2 + $0x21] sm:$0xff]  ;;  %392 = vst.msk [vmem:[#allocation4] sm:$0xf] %vm391_vm3, %v375_v30 }
  0x44   : > { %v4248_v32 = vpack.c.bf16 %v409_v28, %v409_v28  ;;  %v603_v35 = vld [vmem:[#allocation2 + $0x30] sm:$0xff]  ;;  %v604_v37 = vld [vmem:[#allocation2 + $0x40] sm:$0xff]  ;;  %v5277_v38 = vpack.c.bf16 %v410_v34, %v410_v34 }
  0x45   : > { %v4265_v36 = vpack.c.bf16 %v603_v35, %v603_v35  ;;  %681 = vrot.lane.b32.xlu1 %v4263_v31, %s4904_s24  ;;  %v5279_v39 = vpack.c.bf16 %v604_v37, %v604_v37  ;;  %v605_v40 = vld [vmem:[#allocation2 + $0x50] sm:$0xff]  ;;  %v606_v41 = vld [vmem:[#allocation2 + $0x60] sm:$0xff]  ;;  %393 = vst.msk [vmem:[#allocation4 + $0x14] sm:$0xf] %vm391_vm3, %v4263_v31  ;;  %394 = vst.msk [vmem:[#allocation4 + $0x28] sm:$0xf] %vm391_vm3, %v4264_v33 }
  0x46   : > { %490 = vrot.lane.b32.xlu0 %v4248_v32, %s4904_s24  ;;  %v411_v42 = vld [vmem:[#allocation2 + $0x31] sm:$0xff]  ;;  %v5283_v43 = vpack.c.bf16 %v605_v40, %v605_v40  ;;  %v5285_v44 = vpack.c.bf16 %v606_v41, %v606_v41  ;;  %v610_v48 = vld [vmem:[#allocation2 + $0xc0] sm:$0xff] }
  0x47   : > { %v607_v45 = vld [vmem:[#allocation2 + $0x70] sm:$0xff]  ;;  %395 = vst.msk [vmem:[#allocation4 + $0x3c] sm:$0xf] %vm391_vm3, %v4265_v36  ;;  %396 = vst.msk [vmem:[#allocation4 + $0x50] sm:$0xf] %vm391_vm3, %v5279_v39  ;;  %v5294_v50 = vpack.c.bf16 %v610_v48, %v610_v48  ;;  %v5303_v52 = vpack.c.bf16 %v411_v42, %v411_v42  ;;  %v412_v53 = vld [vmem:[#allocation2 + $0x41] sm:$0xff] }
  0x48   : > { %v5288_v46 = vpack.c.bf16 %v607_v45, %v607_v45  ;;  %v609_v47 = vld [vmem:[#allocation2 + $0xb0] sm:$0xff]  ;;  %397 = vst.msk [vmem:[#allocation4 + $0x64] sm:$0xf] %vm391_vm3, %v5283_v43  ;;  %398 = vst.msk [vmem:[#allocation4 + $0x78] sm:$0xf] %vm391_vm3, %v5285_v44  ;;  %v612_v55 = vld [vmem:[#allocation2 + $0xe0] sm:$0xff]  ;;  %v5321_v62 = vpack.c.bf16 %v412_v53, %v412_v53 }
  0x49   : > { %v5292_v49 = vpack.c.bf16 %v609_v47, %v609_v47  ;;  %v611_v51 = vld [vmem:[#allocation2 + $0xd0] sm:$0xff]  ;;  %683 = vrot.lane.b32.xlu1 %v4264_v33, %s4904_s24  ;;  %v5309_v56 = vpack.c.bf16 %v612_v55, %v612_v55  ;;  %v614_v58 = vld [vmem:[#allocation2 + $0x100] sm:$0xff]  ;;  %402 = vst.msk [vmem:[#allocation4 + $0xc8] sm:$0xf] %vm391_vm3, %v5294_v50  ;;  %v4736_v45 = vld [vmem:[%s6435_s1 + $0x18] sm:$0xff]  }
  0x4a   : > { %492 = vrot.lane.b32.xlu0 %v5277_v38, %s4904_s24  ;;  %v5305_v54 = vpack.c.bf16 %v611_v51, %v611_v51  ;;  %399 = vst.msk [vmem:[#allocation4 + $0x8c] sm:$0xf] %vm391_vm3, %v5288_v46  ;;  %v613_v57 = vld [vmem:[#allocation2 + $0xf0] sm:$0xff]  ;;  %v5317_v60 = vpack.c.bf16 %v614_v58, %v614_v58  ;;  %v794_v1 = vld [vmem:[#allocation2 + $0x22] sm:$0xff]  ;;  %4382 = vmatpush3.bf16.msra.mxu0 %v4736_v45  ;;  %v4744_v45 = vld [vmem:[%s6435_s1 + $0x38] sm:$0xff]  }
  0x4b   : > { %401 = vst.msk [vmem:[#allocation4 + $0xb4] sm:$0xf] %vm391_vm3, %v5292_v49  ;;  %v5315_v59 = vpack.c.bf16 %v613_v57, %v613_v57  ;;  %v615_v61 = vld [vmem:[#allocation2 + $0x110] sm:$0xff]  ;;  %404 = vst.msk [vmem:[#allocation4 + $0xf0] sm:$0xf] %vm391_vm3, %v5309_v56  ;;  %v5332_v4 = vpack.c.bf16 %v794_v1, %v794_v1  ;;  %v796_v6 = vld [vmem:[#allocation2 + $0x42] sm:$0xff] }
  0x4c   : > { %403 = vst.msk [vmem:[#allocation4 + $0xdc] sm:$0xf] %vm391_vm3, %v5305_v54  ;;  %v5323_v63 = vpack.c.bf16 %v615_v61, %v615_v61  ;;  %v793_v0 = vld [vmem:[#allocation2 + $0x12] sm:$0xff]  ;;  %v798_v10 = vld [vmem:[#allocation2 + $0x62] sm:$0xff]  ;;  %406 = vst.msk [vmem:[#allocation4 + $0x118] sm:$0xf] %vm391_vm3, %v5317_v60  ;;  %v5340_v26 = vpack.c.bf16 %v796_v6, %v796_v6 }
  0x4d   : > { %v795_v2 = vld [vmem:[#allocation2 + $0x32] sm:$0xff]  ;;  %494 = vrot.lane.b32.xlu1 %v5303_v52, %s4904_s24  ;;  %v5330_v3 = vpack.c.bf16 %v793_v0, %v793_v0  ;;  %405 = vst.msk [vmem:[#allocation4 + $0x104] sm:$0xf] %vm391_vm3, %v5315_v59  ;;  %v5342_v27 = vpack.c.bf16 %v798_v10, %v798_v10  ;;  %v992_v30 = vld [vmem:[#allocation2 + $0x81] sm:$0xff]  ;;  %587 = vst.msk [vmem:[#allocation4 + $0x2c] sm:$0xf] %vm391_vm3, %v5332_v4 }
  0x4e   : > { %685 = vrot.lane.b32.xlu0 %v4265_v36, %s4904_s24  ;;  %v5334_v5 = vpack.c.bf16 %v795_v2, %v795_v2  ;;  %v797_v13 = vld [vmem:[#allocation2 + $0x52] sm:$0xff]  ;;  %407 = vst.msk [vmem:[#allocation4 + $0x12c] sm:$0xf] %vm391_vm3, %v5323_v63  ;;  %v5350_v32 = vpack.c.bf16 %v992_v30, %v992_v30  ;;  %v802_v33 = vld [vmem:[#allocation2 + $0xc2] sm:$0xff]  ;;  %589 = vst.msk [vmem:[#allocation4 + $0x54] sm:$0xf] %vm391_vm3, %v5340_v26 }
  0x4f   : > { %v413_v25 = vld [vmem:[#allocation2 + $0x51] sm:$0xff]  ;;  %v5344_v28 = vpack.c.bf16 %v797_v13, %v797_v13  ;;  %v804_v35 = vld [vmem:[#allocation2 + $0xe2] sm:$0xff]  ;;  %586 = vst.msk [vmem:[#allocation4 + $0x18] sm:$0xf] %vm391_vm3, %v5330_v3  ;;  %v5360_v37 = vpack.c.bf16 %v802_v33, %v802_v33  ;;  %591 = vst.msk [vmem:[#allocation4 + $0x7c] sm:$0xf] %vm391_vm3, %v5342_v27 }
  0x50   : > { %v799_v29 = vld [vmem:[#allocation2 + $0x72] sm:$0xff]  ;;  %588 = vst.msk [vmem:[#allocation4 + $0x40] sm:$0xf] %vm391_vm3, %v5334_v5  ;;  %1163 = vst.msk [vmem:[#allocation4 + $0x24] sm:$0xf] %vm391_vm3, %v5334_v5  ;;  %v414_v36 = vld [vmem:[#allocation2 + $0x61] sm:$0xff]  ;;  %v5364_v41 = vpack.c.bf16 %v804_v35, %v804_v35  ;;  %v5381_v47 = vpack.c.bf16 %v413_v25, %v413_v25 }
  0x51   : > { %v5348_v31 = vpack.c.bf16 %v799_v29, %v799_v29  ;;  %v801_v34 = vld [vmem:[#allocation2 + $0xb2] sm:$0xff]  ;;  %590 = vst.msk [vmem:[#allocation4 + $0x68] sm:$0xf] %vm391_vm3, %v5344_v28  ;;  %1165 = vst.msk [vmem:[#allocation4 + $0x4c] sm:$0xf] %vm391_vm3, %v5344_v28  ;;  %687 = vrot.lane.b32.xlu1 %v5279_v39, %s4904_s24  ;;  %v806_v51 = vld [vmem:[#allocation2 + $0x102] sm:$0xff]  ;;  %v5415_v1 = vpack.c.bf16 %v414_v36, %v414_v36 }
  0x52   : > { %v5362_v40 = vpack.c.bf16 %v801_v34, %v801_v34  ;;  %v803_v42 = vld [vmem:[#allocation2 + $0xd2] sm:$0xff]  ;;  %496 = vrot.lane.b32.xlu0 %v5321_v62, %s4904_s24  ;;  %784 = vst.msk [vmem:[#allocation4 + $0x94] sm:$0xf] %vm391_vm3, %v5350_v32  ;;  %v5389_v55 = vpack.c.bf16 %v806_v51, %v806_v51  ;;  %v4737_v39 = vld [vmem:[%s6435_s1 + $0x60] sm:$0xff]   ;;  %595 = vst.msk [vmem:[#allocation4 + $0xcc] sm:$0xf] %vm391_vm3, %v5360_v37 }
  0x53   : > { %v5383_v48 = vpack.c.bf16 %v803_v42, %v803_v42  ;;  %v805_v53 = vld [vmem:[#allocation2 + $0xf2] sm:$0xff]  ;;  %592 = vst.msk [vmem:[#allocation4 + $0x90] sm:$0xf] %vm391_vm3, %v5348_v31  ;;  %v553_v58 = vld [vmem:[#allocation2 + $0x2] sm:$0xff]  ;;  %597 = vst.msk [vmem:[#allocation4 + $0xf4] sm:$0xf] %vm391_vm3, %v5364_v41  ;;  %4383 = vmatprep.subr.bf16.mxu0 %v4737_v39 }
  0x54   : > { %v5391_v57 = vpack.c.bf16 %v805_v53, %v805_v53  ;;  %594 = vst.msk [vmem:[#allocation4 + $0xb8] sm:$0xf] %vm391_vm3, %v5362_v40  ;;  %v569_v61 = vpack.c.bf16 %v553_v58, %v553_v58  ;;  %v4738_v0 = vld [vmem:[%s6435_s1 + $0x20] sm:$0xff]   ;;  %599 = vst.msk [vmem:[#allocation4 + $0x11c] sm:$0xf] %vm391_vm3, %v5389_v55  ;;  %v415_v2 = vld [vmem:[#allocation2 + $0x71] sm:$0xff] }
  0x55   : > { %596 = vst.msk [vmem:[#allocation4 + $0xe0] sm:$0xf] %vm391_vm3, %v5383_v48  ;;  %498 = vrot.lane.b32.xlu1 %v5381_v47, %s4904_s24  ;;  %v4739_v6 = vld [vmem:[%s6435_s1 + $0x68] sm:$0xff]   ;;  %4384 = vmatpush3.bf16.msra.mxu0 %v4738_v0  ;;  %v807_v13 = vld [vmem:[#allocation2 + $0x112] sm:$0xff]  ;;  %v5433_v30 = vpack.c.bf16 %v415_v2, %v415_v2  ;;  %v608_v33 = vld [vmem:[#allocation2 + $0x80] sm:$0xff] }
  0x56   : > { %598 = vst.msk [vmem:[#allocation4 + $0x108] sm:$0xf] %vm391_vm3, %v5391_v57  ;;  %689 = vrot.lane.b32.xlu0 %v5283_v43, %s4904_s24  ;;  %585 = vst.msk [vmem:[#allocation4 + $0x4] sm:$0xf] %vm391_vm3, %v569_v61  ;;  %v4740_v10 = vld [vmem:[%s6435_s1 + $0x28] sm:$0xff]   ;;  %4385 = vmatprep.subr.bf16.mxu0 %v4739_v6  ;;  %v5424_v25 = vpack.c.bf16 %v807_v13, %v807_v13  ;;  %v4741_v43 = vld [vmem:[%s6435_s1 + $0x70] sm:$0xff]   ;;  %v4270_v53 = vpack.c.bf16 %v608_v33, %v608_v33 }
  0x57   : > { %v416_v29 = vld [vmem:[#allocation2 + $0xa1] sm:$0xff]  ;;  %v4742_v35 = vld [vmem:[%s6435_s1 + $0x30] sm:$0xff]  }
  0x58   : > { %v1000_v34 = vld [vmem:[#allocation2 + $0x121] sm:$0xff]  ;;  %600 = vst.msk [vmem:[#allocation4 + $0x130] sm:$0xf] %vm391_vm3, %v5424_v25  ;;  %v417_v42 = vld [vmem:[#allocation2 + $0xb1] sm:$0xff]  ;;  %v4255_v39 = vpack.c.bf16 %v416_v29, %v416_v29 }
  0x59   : > { %691 = vrot.lane.b32.xlu1 %v5285_v44, %s4904_s24  ;;  %4386 = vmatpush3.bf16.msra.mxu0 %v4740_v10  ;;  %v5440_v36 = vpack.c.bf16 %v1000_v34, %v1000_v34  ;;  %v4743_v44 = vld [vmem:[%s6435_s1 + $0x78] sm:$0xff]   ;;  %v367_v51 = vld [vmem:[#allocation2 + $0xa0] sm:$0xff]  ;;  %v4755_v33 = vld [vmem:[%s6435_s1 + $0xc8] sm:$0xff]  }
  0x5a   : > { %500 = vrot.lane.b32.xlu0 %v5415_v1, %s4904_s24  ;;  %4387 = vmatprep.subr.bf16.mxu0 %v4741_v43  ;;  %v5457_v58 = vld [vmem:[%s6435_s1 + $0x100] sm:$0xff]   ;;  %v383_v61 = vpack.c.bf16 %v367_v51, %v367_v51  ;;  %v419_v10 = vld [vmem:[#allocation2 + $0xd1] sm:$0xff] }
  0x5b   : > { %792 = vst.msk [vmem:[#allocation4 + $0x134] sm:$0xf] %vm391_vm3, %v5440_v36  ;;  %v561_v0 = vld [vmem:[#allocation2 + $0xa2] sm:$0xff]  ;;  %v5482_v34 = vpack.c.bf16 %v419_v10, %v419_v10  ;;  %v4761_v51 = vld [vmem:[%s6435_s1 + $0xd8] sm:$0xff]  }
  0x5c   : > { %v577_v2 = vpack.c.bf16 %v561_v0, %v561_v0  ;;  %400 = vst.msk [vmem:[#allocation4 + $0xa0] sm:$0xf] %vm391_vm3, %v383_v61  ;;  %v418_v6 = vld [vmem:[#allocation2 + $0xc1] sm:$0xff]  ;;  %v423_v61 = vld [vmem:[#allocation2 + $0x111] sm:$0xff] }
  0x5d   : > { %502 = vrot.lane.b32.xlu1 %v5433_v30, %s4904_s24  ;;  %4388 = vmatpush3.bf16.msra.mxu0 %v4742_v35  ;;  %v4753_v13 = vld [vmem:[%s6435_s1 + $0xc0] sm:$0xff]   ;;  %v5470_v43 = vpack.c.bf16 %v418_v6, %v418_v6  ;;  %v4756_v35 = vld [vmem:[%s6435_s1 + $0x88] sm:$0xff]   ;;  %v745_v0 = vld [vmem:[#allocation2 + $0x11] sm:$0xff] }
  0x5e   : > { %693 = vrot.lane.b32.xlu0 %v5288_v46, %s4904_s24  ;;  %4389 = vmatprep.subr.bf16.mxu0 %v4743_v44  ;;  %593 = vst.msk [vmem:[#allocation4 + $0xa4] sm:$0xf] %vm391_vm3, %v577_v2  ;;  %v4256_v46 = vpack.c.bf16 %v417_v42, %v417_v42  ;;  %v4754_v29 = vld [vmem:[%s6435_s1 + $0x80] sm:$0xff]   ;;  %v4759_v44 = vld [vmem:[%s6435_s1 + $0xd0] sm:$0xff]   ;;  %v761_v6 = vpack.c.bf16 %v745_v0, %v745_v0 }
  0x5f   : > { %4439 = vmatprep.subr.bf16.mxu1 %v4753_v13  ;;  %v421_v42 = vld [vmem:[#allocation2 + $0xf1] sm:$0xff]  ;;  %v4766_v2 = vld [vmem:[%s6435_s1 + $0xe0] sm:$0xff]  }
  0x60   : > { %4440 = vmatpush3.bf16.msra.mxu1 %v4754_v29  ;;  %v938_v10 = vld [vmem:[#allocation2 + $0x20] sm:$0xff]  ;;  %777 = vst.msk [vmem:[#allocation4 + $0x8] sm:$0xf] %vm391_vm3, %v761_v6  ;;  %v4773_v6 = vld [vmem:[%s6435_s1 + $0xb0] sm:$0xff]  }
  0x61   : > { %695 = vrot.lane.b32.xlu1 %v4270_v53, %s4904_s24  ;;  %4390 = vmatpush3.bf16.msra.mxu0 %v4744_v45  ;;  %v4760_v45 = vld [vmem:[%s6435_s1 + $0x90] sm:$0xff]   ;;  %v422_v53 = vld [vmem:[#allocation2 + $0x101] sm:$0xff] }
  0x62   : > { %504 = vrot.lane.b32.xlu0 %v4255_v39, %s4904_s24  ;;  %4655 = vmatprep.subr.bf16.mxu0 %v5457_v58  ;;  %v4763_v39 = vld [vmem:[%s6435_s1 + $0x98] sm:$0xff]   ;;  %v4767_v13 = vld [vmem:[%s6435_s1 + $0xa0] sm:$0xff]  }
  0x63   : > { %4441 = vmatprep.subr.bf16.mxu1 %v4755_v33  ;;  %v954_v33 = vpack.c.bf16 %v938_v10, %v938_v10 }
  0x64   : > { %4442 = vmatpush3.bf16.msra.mxu1 %v4756_v35  ;;  %v5533_v35 = vpack.c.bf16 %v423_v61, %v423_v61 }
  0x65   : > { %506 = vrot.lane.b32.xlu1 %v4256_v46, %s4904_s24  ;;  %4443 = vmatprep.subr.bf16.mxu1 %v4759_v44  ;;  %v746_v46 = vld [vmem:[#allocation2 + $0x21] sm:$0xff]  ;;  %970 = vst.msk [vmem:[#allocation4 + $0xc] sm:$0xf] %vm391_vm3, %v954_v33 }
  0x66   : > { %697 = vrot.lane.b32.xlu0 %v5292_v49, %s4904_s24  ;;  %v420_v49 = vld [vmem:[#allocation2 + $0xe1] sm:$0xff]  ;;  %v762_v29 = vpack.c.bf16 %v746_v46, %v746_v46 }
  0x67   : > { %v616_v44 = vld [vmem:[#allocation2 + $0x120] sm:$0xff] }
  0x68   : > { %4444 = vmatpush3.bf16.msra.mxu1 %v4760_v45  ;;  %778 = vst.msk [vmem:[#allocation4 + $0x1c] sm:$0xf] %vm391_vm3, %v762_v29  ;;  %v4769_v45 = vld [vmem:[%s6435_s1 + $0xa8] sm:$0xff]  }
  0x69   : > { %699 = vrot.lane.b32.xlu1 %v5294_v50, %s4904_s24  ;;  %v5494_v50 = vpack.c.bf16 %v420_v49, %v420_v49  ;;  %4445 = vmatprep.subr.bf16.mxu1 %v4761_v51  ;;  %v939_v49 = vld [vmem:[#allocation2 + $0x30] sm:$0xff]  ;;  %v1130_v46 = vld [vmem:[#allocation2 + $0x22] sm:$0xff] }
  0x6a   : > { %508 = vrot.lane.b32.xlu0 %v5470_v43, %s4904_s24  ;;  %v747_v51 = vld [vmem:[#allocation2 + $0x31] sm:$0xff]  ;;  %v1132_v29 = vld [vmem:[#allocation2 + $0x42] sm:$0xff] }
  0x6b   : > { %v763_v61 = vpack.c.bf16 %v747_v51, %v747_v51  ;;  %v1148_v33 = vpack.c.bf16 %v1132_v29, %v1132_v29  ;;  %v943_v51 = vld [vmem:[#allocation2 + $0x70] sm:$0xff]  ;;  %v944_v29 = vld [vmem:[#allocation2 + $0x80] sm:$0xff] }
  0x6c   : > { %4446 = vmatpush3.bf16.msra.mxu1 %v4763_v39  ;;  %v4278_v39 = vpack.c.bf16 %v616_v44, %v616_v44  ;;  %v4776_v44 = vld [vmem:[%s6435_s1 + $0xb8] sm:$0xff]  }
  0x6d   : > { %510 = vrot.lane.b32.xlu1 %v5482_v34, %s4904_s24  ;;  %4447 = vmatprep.subr.bf16.mxu1 %v4766_v2  ;;  %v940_v2 = vld [vmem:[#allocation2 + $0x40] sm:$0xff]  ;;  %779 = vst.msk [vmem:[#allocation4 + $0x30] sm:$0xf] %vm391_vm3, %v763_v61  ;;  %1164 = vst.msk [vmem:[#allocation4 + $0x38] sm:$0xf] %vm391_vm3, %v1148_v33  ;;  %v960_v33 = vpack.c.bf16 %v944_v29, %v944_v29 }
  0x6e   : > { %701 = vrot.lane.b32.xlu0 %v5305_v54, %s4904_s24  ;;  %v5506_v54 = vpack.c.bf16 %v421_v42, %v421_v42  ;;  %v955_v42 = vpack.c.bf16 %v939_v49, %v939_v49  ;;  %v956_v10 = vpack.c.bf16 %v940_v2, %v940_v2  ;;  %v1137_v2 = vld [vmem:[#allocation2 + $0x92] sm:$0xff] }
  0x6f   : > { %976 = vst.msk [vmem:[#allocation4 + $0x84] sm:$0xf] %vm391_vm3, %v960_v33  ;;  %v757_v33 = vld [vmem:[#allocation2 + $0xf1] sm:$0xff] }
  0x70   : > { %4448 = vmatpush3.bf16.msra.mxu1 %v4767_v13  ;;  %971 = vst.msk [vmem:[#allocation4 + $0x20] sm:$0xf] %vm391_vm3, %v955_v42  ;;  %v1146_v13 = vpack.c.bf16 %v1130_v46, %v1130_v46  ;;  %972 = vst.msk [vmem:[#allocation4 + $0x34] sm:$0xf] %vm391_vm3, %v956_v10  ;;  %v750_v42 = vld [vmem:[#allocation2 + $0x61] sm:$0xff]  ;;  %v1153_v46 = vpack.c.bf16 %v1137_v2, %v1137_v2  ;;  %v751_v10 = vld [vmem:[#allocation2 + $0x71] sm:$0xff] }
  0x71   : > { %703 = vrot.lane.b32.xlu1 %v5309_v56, %s4904_s24  ;;  %v5518_v56 = vpack.c.bf16 %v422_v53, %v422_v53  ;;  %v748_v53 = vld [vmem:[#allocation2 + $0x41] sm:$0xff]  ;;  %v755_v2 = vld [vmem:[#allocation2 + $0xd1] sm:$0xff] }
  0x72   : > { %512 = vrot.lane.b32.xlu0 %v5494_v50, %s4904_s24  ;;  %v764_v0 = vpack.c.bf16 %v748_v53, %v748_v53  ;;  %1162 = vst.msk [vmem:[#allocation4 + $0x10] sm:$0xf] %vm391_vm3, %v1146_v13  ;;  %v945_v13 = vld [vmem:[#allocation2 + $0x90] sm:$0xff]  ;;  %1169 = vst.msk [vmem:[#allocation4 + $0x9c] sm:$0xf] %vm391_vm3, %v1153_v46 }
  0x74   : > { %780 = vst.msk [vmem:[#allocation4 + $0x44] sm:$0xf] %vm391_vm3, %v764_v0 }
  0x75   : > { %514 = vrot.lane.b32.xlu1 %v5506_v54, %s4904_s24 }
  0x76   : > { %705 = vrot.lane.b32.xlu0 %v5315_v59, %s4904_s24  ;;  %v4768_v59 = vld [vmem:[%s6435_s1 + $0xe8] sm:$0xff]  }
  0x77   : > { %4449 = vmatprep.subr.bf16.mxu1 %v4768_v59  ;;  %v941_v59 = vld [vmem:[#allocation2 + $0x50] sm:$0xff] }
  0x78   : > { %4450 = vmatpush3.bf16.msra.mxu1 %v4769_v45  ;;  %v957_v49 = vpack.c.bf16 %v941_v59, %v941_v59  ;;  %v766_v45 = vpack.c.bf16 %v750_v42, %v750_v42  ;;  %v753_v59 = vld [vmem:[#allocation2 + $0xb1] sm:$0xff] }
  0x79   : > { %707 = vrot.lane.b32.xlu1 %v5317_v60, %s4904_s24  ;;  %v4772_v60 = vld [vmem:[%s6435_s1 + $0xf0] sm:$0xff]  }
  0x7a   : > { %516 = vrot.lane.b32.xlu0 %v5518_v56, %s4904_s24  ;;  %4451 = vmatprep.subr.bf16.mxu1 %v4772_v60  ;;  %973 = vst.msk [vmem:[#allocation4 + $0x48] sm:$0xf] %vm391_vm3, %v957_v49  ;;  %782 = vst.msk [vmem:[#allocation4 + $0x6c] sm:$0xf] %vm391_vm3, %v766_v45  ;;  %v942_v60 = vld [vmem:[#allocation2 + $0x60] sm:$0xff]  ;;  %v947_v49 = vld [vmem:[#allocation2 + $0xd0] sm:$0xff]  ;;  %v769_v45 = vpack.c.bf16 %v753_v59, %v753_v59 }
  0x7b   : > { %v958_v61 = vpack.c.bf16 %v942_v60, %v942_v60 }
  0x7c   : > { %4452 = vmatpush3.bf16.msra.mxu1 %v4773_v6  ;;  %785 = vst.msk [vmem:[#allocation4 + $0xa8] sm:$0xf] %vm391_vm3, %v769_v45 }
  0x7d   : > { %518 = vrot.lane.b32.xlu1 %v5533_v35, %s4904_s24  ;;  %974 = vst.msk [vmem:[#allocation4 + $0x5c] sm:$0xf] %vm391_vm3, %v958_v61  ;;  %v1139_v61 = vld [vmem:[#allocation2 + $0xd2] sm:$0xff] }
  0x7e   : > { %709 = vrot.lane.b32.xlu0 %v5323_v63, %s4904_s24  ;;  %v4774_v63 = vld [vmem:[%s6435_s1 + $0xf8] sm:$0xff]  }
  0x7f   : > { %4453 = vmatprep.subr.bf16.mxu1 %v4774_v63  ;;  %v754_v63 = vld [vmem:[#allocation2 + $0xc1] sm:$0xff] }
  0x80   : > { %4454 = vmatpush3.bf16.msra.mxu1 %v4776_v44  ;;  %v993_v44 = vld [vmem:[#allocation2 + $0x91] sm:$0xff]  ;;  %v770_v42 = vpack.c.bf16 %v754_v63, %v754_v63  ;;  %v950_v63 = vld [vmem:[#allocation2 + $0x100] sm:$0xff] }
  0x81   : > { %711 = vrot.lane.b32.xlu1 %v4278_v39, %s4904_s24  ;;  %v959_v39 = vpack.c.bf16 %v943_v51, %v943_v51  ;;  %v946_v51 = vld [vmem:[#allocation2 + $0xc0] sm:$0xff] }
  0x82   : > { %873 = vrot.lane.b32.xlu0 %v5330_v3, %s4904_s24  ;;  %v749_v3 = vld [vmem:[#allocation2 + $0x51] sm:$0xff]  ;;  %786 = vst.msk [vmem:[#allocation4 + $0xbc] sm:$0xf] %vm391_vm3, %v770_v42 }
  0x83   : > { %v765_v53 = vpack.c.bf16 %v749_v3, %v749_v3  ;;  %975 = vst.msk [vmem:[#allocation4 + $0x70] sm:$0xf] %vm391_vm3, %v959_v39  ;;  %v963_v3 = vpack.c.bf16 %v947_v49, %v947_v49  ;;  %v1138_v39 = vld [vmem:[#allocation2 + $0xc2] sm:$0xff]  ;;  %v966_v49 = vpack.c.bf16 %v950_v63, %v950_v63  ;;  %v1145_v42 = vld [vmem:[#allocation2 + $0x132] sm:$0xff] }
  0x85   : > { %875 = vrot.lane.b32.xlu1 %v5332_v4, %s4904_s24  ;;  %781 = vst.msk [vmem:[#allocation4 + $0x58] sm:$0xf] %vm391_vm3, %v765_v53  ;;  %979 = vst.msk [vmem:[#allocation4 + $0xc0] sm:$0xf] %vm391_vm3, %v963_v3  ;;  %v756_v53 = vld [vmem:[#allocation2 + $0xe1] sm:$0xff]  ;;  %v759_v3 = vld [vmem:[#allocation2 + $0x111] sm:$0xff] }
  0x86   : > { %1066 = vrot.lane.b32.xlu0 %v5277_v38, %s4904_s24  ;;  %v1134_v38 = vld [vmem:[#allocation2 + $0x62] sm:$0xff]  ;;  %982 = vst.msk [vmem:[#allocation4 + $0xfc] sm:$0xf] %vm391_vm3, %v966_v49 }
  0x87   : > { %v1150_v4 = vpack.c.bf16 %v1134_v38, %v1134_v38  ;;  %v772_v38 = vpack.c.bf16 %v756_v53, %v756_v53 }
  0x88   : > { %v489_v45 = vpop.permute.xlu0 %488 }
  0x89   : > { %1068 = vrot.lane.b32.xlu1 %v5303_v52, %s4904_s24  ;;  %v1135_v52 = vld [vmem:[#allocation2 + $0x72] sm:$0xff]  ;;  %1166 = vst.msk [vmem:[#allocation4 + $0x60] sm:$0xf] %vm391_vm3, %v1150_v4  ;;  %v1155_v4 = vpack.c.bf16 %v1139_v61, %v1139_v61  ;;  %788 = vst.msk [vmem:[#allocation4 + $0xe4] sm:$0xf] %vm391_vm3, %v772_v38 }
  0x8a   : > { %877 = vrot.lane.b32.xlu0 %v5334_v5, %s4904_s24  ;;  %v1151_v0 = vpack.c.bf16 %v1135_v52, %v1135_v52  ;;  %v1136_v5 = vld [vmem:[#allocation2 + $0x82] sm:$0xff]  ;;  %v1154_v52 = vpack.c.bf16 %v1138_v39, %v1138_v39  ;;  %537 = vst.msk [vmem:[#allocation4] sm:$0xf] %vm536_vm4, %v489_v45  ;;  %v1001_v38 = vld [vmem:[#allocation2 + $0x131] sm:$0xff] }
  0x8b   : > { %v1152_v6 = vpack.c.bf16 %v1136_v5, %v1136_v5  ;;  %v1141_v5 = vld [vmem:[#allocation2 + $0xf2] sm:$0xff]  ;;  %1171 = vst.msk [vmem:[#allocation4 + $0xc4] sm:$0xf] %vm391_vm3, %v1155_v4  ;;  %v2261_v39 = vld [vmem:[#allocation3 + $0x2] sm:$0xff] }
  0x8c   : > { %1167 = vst.msk [vmem:[#allocation4 + $0x74] sm:$0xf] %vm391_vm3, %v1151_v0  ;;  %v1140_v0 = vld [vmem:[#allocation2 + $0xe2] sm:$0xff]  ;;  %1170 = vst.msk [vmem:[#allocation4 + $0xb0] sm:$0xf] %vm391_vm3, %v1154_v52  ;;  %v2277_v4 = vpack.c.bf16 %v2261_v39, %v2261_v39 }
  0x8d   : > { %879 = vrot.lane.b32.xlu1 %v5340_v26, %s4904_s24  ;;  %v961_v26 = vpack.c.bf16 %v945_v13, %v945_v13  ;;  %1168 = vst.msk [vmem:[#allocation4 + $0x88] sm:$0xf] %vm391_vm3, %v1152_v6  ;;  %v949_v6 = vld [vmem:[#allocation2 + $0xf0] sm:$0xff]  ;;  %v1156_v46 = vpack.c.bf16 %v1140_v0, %v1140_v0  ;;  %v4310_v0 = vpack.c.bf16 %v1001_v38, %v1001_v38 }
  0x8e   : > { %1070 = vrot.lane.b32.xlu0 %v5321_v62, %s4904_s24  ;;  %v767_v62 = vpack.c.bf16 %v751_v10, %v751_v10  ;;  %v1157_v10 = vpack.c.bf16 %v1141_v5, %v1141_v5  ;;  %v965_v13 = vpack.c.bf16 %v949_v6, %v949_v6 }
  0x8f   : > { %977 = vst.msk [vmem:[#allocation4 + $0x98] sm:$0xf] %vm391_vm3, %v961_v26  ;;  %1172 = vst.msk [vmem:[#allocation4 + $0xd8] sm:$0xf] %vm391_vm3, %v1156_v46 }
  0x90   : > { %783 = vst.msk [vmem:[#allocation4 + $0x80] sm:$0xf] %vm391_vm3, %v767_v62  ;;  %v948_v62 = vld [vmem:[#allocation2 + $0xe0] sm:$0xff]  ;;  %1173 = vst.msk [vmem:[#allocation4 + $0xec] sm:$0xf] %vm391_vm3, %v1157_v10 }
  0x91   : > { %1072 = vrot.lane.b32.xlu1 %v5381_v47, %s4904_s24  ;;  %v964_v26 = vpack.c.bf16 %v948_v62, %v948_v62  ;;  %981 = vst.msk [vmem:[#allocation4 + $0xe8] sm:$0xf] %vm391_vm3, %v965_v13  ;;  %v4752_v62 = vld [vmem:[%s6435_s1 + $0x108] sm:$0xff]  }
  0x92   : > { %881 = vrot.lane.b32.xlu0 %v5344_v28, %s4904_s24  ;;  %v800_v28 = vld [vmem:[#allocation2 + $0x82] sm:$0xff] }
  0x93   : > { %v4286_v47 = vpack.c.bf16 %v800_v28, %v800_v28  ;;  %980 = vst.msk [vmem:[#allocation4 + $0xd4] sm:$0xf] %vm391_vm3, %v964_v26  ;;  %v773_v28 = vpack.c.bf16 %v757_v33, %v757_v33 }
  0x95   : > { %883 = vrot.lane.b32.xlu1 %v5342_v27, %s4904_s24  ;;  %v962_v27 = vpack.c.bf16 %v946_v51, %v946_v51  ;;  %789 = vst.msk [vmem:[#allocation4 + $0xf8] sm:$0xf] %vm391_vm3, %v773_v28  ;;  %v953_v51 = vld [vmem:[#allocation2 + $0x130] sm:$0xff] }
  0x96   : > { %1074 = vrot.lane.b32.xlu0 %v5415_v1, %s4904_s24  ;;  %v2845_v1 = vld [vmem:[#allocation3 + $0x92] sm:$0xff] }
  0x97   : > { %978 = vst.msk [vmem:[#allocation4 + $0xac] sm:$0xf] %vm391_vm3, %v962_v27  ;;  %v2861_v60 = vpack.c.bf16 %v2845_v1, %v2845_v1  ;;  %v1161_v1 = vpack.c.bf16 %v1145_v42, %v1145_v42 }
  0x99   : > { %1076 = vrot.lane.b32.xlu1 %v5433_v30, %s4904_s24  ;;  %v4302_v30 = vpack.c.bf16 %v993_v44, %v993_v44  ;;  %v1144_v44 = vld [vmem:[#allocation2 + $0x122] sm:$0xff]  ;;  %1177 = vst.msk [vmem:[#allocation4 + $0x13c] sm:$0xf] %vm391_vm3, %v1161_v1 }
  0x9a   : > { %885 = vrot.lane.b32.xlu0 %v5348_v31, %s4904_s24  ;;  %v5606_v31 = vld [vmem:[#allocation4 + $0x88] ss:$20 sps:$4 sm:$0xff]   ;;  %v1160_v27 = vpack.c.bf16 %v1144_v44, %v1144_v44 }
  0x9b   : > { %2877 = vst.msk [vmem:[#allocation4 + $0x9c] sm:$0xf] %vm391_vm3, %v2861_v60  ;;  %v2269_v1 = vld [vmem:[#allocation3 + $0xa2] sm:$0xff] }
  0x9c   : > { %1176 = vst.msk [vmem:[#allocation4 + $0x128] sm:$0xf] %vm391_vm3, %v1160_v27 }
  0x9d   : > { %887 = vrot.lane.b32.xlu1 %v4286_v47, %s4904_s24  ;;  %v951_v47 = vld [vmem:[#allocation2 + $0x110] sm:$0xff] }
  0x9e   : > { %1078 = vrot.lane.b32.xlu0 %v5350_v32, %s4904_s24  ;;  %v771_v32 = vpack.c.bf16 %v755_v2, %v755_v2  ;;  %v967_v59 = vpack.c.bf16 %v951_v47, %v951_v47 }
  0xa0   : > { %787 = vst.msk [vmem:[#allocation4 + $0xd0] sm:$0xf] %vm391_vm3, %v771_v32  ;;  %983 = vst.msk [vmem:[#allocation4 + $0x110] sm:$0xf] %vm391_vm3, %v967_v59 }
  0xa1   : > { %1080 = vrot.lane.b32.xlu1 %v4302_v30, %s4904_s24  ;;  %v952_v30 = vld [vmem:[#allocation2 + $0x120] sm:$0xff] }
  0xa2   : > { %889 = vrot.lane.b32.xlu0 %v5362_v40, %s4904_s24  ;;  %v758_v40 = vld [vmem:[#allocation2 + $0x101] sm:$0xff]  ;;  %v968_v60 = vpack.c.bf16 %v952_v30, %v952_v30 }
  0xa3   : > { %v774_v29 = vpack.c.bf16 %v758_v40, %v758_v40  ;;  %v5663_v5 = vld [vmem:[#allocation4 + $0x128] ss:$20 sps:$4 sm:$0xff]  }
  0xa4   : > { %984 = vst.msk [vmem:[#allocation4 + $0x124] sm:$0xf] %vm391_vm3, %v968_v60 }
  0xa5   : > { %891 = vrot.lane.b32.xlu1 %v5360_v37, %s4904_s24  ;;  %790 = vst.msk [vmem:[#allocation4 + $0x10c] sm:$0xf] %vm391_vm3, %v774_v29  ;;  %v1142_v37 = vld [vmem:[#allocation2 + $0x102] sm:$0xff]  ;;  %v4762_v29 = vld [vmem:[%s6435_s1 + $0x110] sm:$0xff]  }
  0xa6   : > { %1082 = vrot.lane.b32.xlu0 %v5470_v43, %s4904_s24  ;;  %v1158_v43 = vpack.c.bf16 %v1142_v37, %v1142_v37 }
  0xa8   : > { %1174 = vst.msk [vmem:[#allocation4 + $0x100] sm:$0xf] %vm391_vm3, %v1158_v43 }
  0xa9   : > { %1084 = vrot.lane.b32.xlu1 %v5482_v34, %s4904_s24 }
  0xaa   : > { %893 = vrot.lane.b32.xlu0 %v5383_v48, %s4904_s24  ;;  %v1143_v48 = vld [vmem:[#allocation2 + $0x112] sm:$0xff] }
  0xab   : > { %v1159_v34 = vpack.c.bf16 %v1143_v48, %v1143_v48 }
  0xad   : > { %895 = vrot.lane.b32.xlu1 %v5364_v41, %s4904_s24  ;;  %v775_v41 = vpack.c.bf16 %v759_v3, %v759_v3  ;;  %1175 = vst.msk [vmem:[#allocation4 + $0x114] sm:$0xf] %vm391_vm3, %v1159_v34 }
  0xae   : > { %1086 = vrot.lane.b32.xlu0 %v5494_v50, %s4904_s24  ;;  %v969_v50 = vpack.c.bf16 %v953_v51, %v953_v51 }
  0xaf   : > { %791 = vst.msk [vmem:[#allocation4 + $0x120] sm:$0xf] %vm391_vm3, %v775_v41 }
  0xb0   : > { %985 = vst.msk [vmem:[#allocation4 + $0x138] sm:$0xf] %vm391_vm3, %v969_v50 }
  0xb1   : > { %1088 = vrot.lane.b32.xlu1 %v5506_v54, %s4904_s24 }
  0xb2   : > { %897 = vrot.lane.b32.xlu0 %v5391_v57, %s4904_s24  ;;  %v808_v57 = vld [vmem:[#allocation2 + $0x122] sm:$0xff] }
  0xb3   : > { %v4294_v61 = vpack.c.bf16 %v808_v57, %v808_v57 }
  0xb5   : > { %899 = vrot.lane.b32.xlu1 %v5389_v55, %s4904_s24 }
  0xb6   : > { %1090 = vrot.lane.b32.xlu0 %v5518_v56, %s4904_s24  ;;  %v2853_v56 = vld [vmem:[#allocation3 + $0x132] sm:$0xff] }
  0xb7   : > { %v682_v54 = vpop.permute.xlu1 %681 }
  0xb8   : > { %v491_v53 = vpop.permute.xlu0 %490  ;;  %729 = vst.msk [vmem:[#allocation4 + $0x4] sm:$0xf] %vm536_vm4, %v682_v54  ;;  %v2285_v54 = vpack.c.bf16 %v2269_v1, %v2269_v1 }
  0xb9   : > { %538 = vst.msk [vmem:[#allocation4 + $0x14] sm:$0xf] %vm536_vm4, %v491_v53  ;;  %1092 = vrot.lane.b32.xlu1 %v5533_v35, %s4904_s24  ;;  %v2869_v35 = vpack.c.bf16 %v2853_v56, %v2853_v56 }
  0xba   : > { %901 = vrot.lane.b32.xlu0 %v5424_v25, %s4904_s24 }
  0xbb   : > { %v684_v55 = vpop.permute.xlu1 %683  ;;  %2885 = vst.msk [vmem:[#allocation4 + $0x13c] sm:$0xf] %vm391_vm3, %v2869_v35 }
  0xbc   : > { %v493_v52 = vpop.permute.xlu0 %492  ;;  %730 = vst.msk [vmem:[#allocation4 + $0x18] sm:$0xf] %vm536_vm4, %v684_v55 }
  0xbd   : > { %539 = vst.msk [vmem:[#allocation4 + $0x28] sm:$0xf] %vm536_vm4, %v493_v52  ;;  %903 = vrot.lane.b32.xlu1 %v4294_v61, %s4904_s24 }
  0xbe   : > { %1094 = vrot.lane.b32.xlu0 %v5440_v36, %s4904_s24 }
  0xbf   : > { %v1178_v2 = vld [vmem:[#allocation4] sm:$0xff]  ;;  %v495_v25 = vpop.permute.xlu1 %494 }
  0xc0   : > { %v686_v6 = vpop.permute.xlu0 %685  ;;  %2293 = vst.msk [vmem:[#allocation4 + $0x4] sm:$0xf] %vm391_vm3, %v2277_v4 }
  0xc1   : > { %540 = vst.msk [vmem:[#allocation4 + $0x3c] sm:$0xf] %vm536_vm4, %v495_v25  ;;  %731 = vst.msk [vmem:[#allocation4 + $0x2c] sm:$0xf] %vm536_vm4, %v686_v6  ;;  %1096 = vrot.lane.b32.xlu1 %v4310_v0, %s4904_s24 }
  0xc3   : > { %v688_v46 = vpop.permute.xlu1 %687  ;;  %v1181_v32 = vld [vmem:[#allocation4 + $0x14] sm:$0xff] }
  0xc4   : > { %v497_v10 = vpop.permute.xlu0 %496  ;;  %732 = vst.msk [vmem:[#allocation4 + $0x40] sm:$0xf] %vm536_vm4, %v688_v46  ;;  %v4010_v36 = vcombine.high %v1178_v2, %v1181_v32  ;;  %v4009_v13 = vcombine.low %v1178_v2, %v1181_v32 }
  0xc5   : > { %541 = vst.msk [vmem:[#allocation4 + $0x50] sm:$0xf] %vm536_vm4, %v497_v10 }
  0xc6   : > { %1777 = vmatprep.mubr.bf16.mxu0 %v4010_v36 }
  0xc7   : > { %v499_v26 = vpop.permute.xlu1 %498  ;;  %1778 = vmatmul.mubr.bf16.vlgmr.msra.gmra.mrb[0].mxu0 %v4009_v13 }
  0xc8   : > { %v690_v40 = vpop.permute.xlu0 %689  ;;  %542 = vst.msk [vmem:[#allocation4 + $0x64] sm:$0xf] %vm536_vm4, %v499_v26  ;;  %4656 = vmatpush3.bf16.msra.mxu0 %v5457_v58  ;;  %v1184_v47 = vld [vmem:[#allocation4 + $0x28] sm:$0xff]  ;;  %v4775_v58 = vld [vmem:[%s6435_s1 + $0x118] sm:$0xff]  }
  0xc9   : > { %733 = vst.msk [vmem:[#allocation4 + $0x54] sm:$0xf] %vm536_vm4, %v690_v40  ;;  %4657 = vmatprep.subr.bf16.mxu0 %v4752_v62 }
  0xcb   : > { %v692_v33 = vpop.permute.xlu1 %691  ;;  %v1187_v63 = vld [vmem:[#allocation4 + $0x3c] sm:$0xff] }
  0xcc   : > { %v501_v28 = vpop.permute.xlu0 %500  ;;  %v4745_v59 = vld [vmem:[#allocation4 + $0x2c] ss:$20 sps:$4 sm:$0xff]   ;;  %734 = vst.msk [vmem:[#allocation4 + $0x68] sm:$0xf] %vm536_vm4, %v692_v33  ;;  %v4014_v49 = vcombine.low %v1184_v47, %v1187_v63  ;;  %4658 = vmatpush3.bf16.msra.mxu0 %v4752_v62 }
  0xcd   : > { %543 = vst.msk [vmem:[#allocation4 + $0x78] sm:$0xf] %vm536_vm4, %v501_v28  ;;  %1785 = vmatprep.mubr.bf16.mxu0 %v4745_v59  ;;  %4659 = vmatprep.subr.bf16.mxu0 %v4762_v29 }
  0xcf   : > { %v503_v37 = vpop.permute.xlu1 %502  ;;  %1786 = vmatmul.mubr.bf16.gmra.mrb[4].mxu0 %v4014_v49 }
  0xd0   : > { %v694_v48 = vpop.permute.xlu0 %693  ;;  %544 = vst.msk [vmem:[#allocation4 + $0x8c] sm:$0xf] %vm536_vm4, %v503_v37  ;;  %4660 = vmatpush3.bf16.msra.mxu0 %v4762_v29  ;;  %v1190_v44 = vld [vmem:[#allocation4 + $0x50] sm:$0xff] }
  0xd1   : > { %735 = vst.msk [vmem:[#allocation4 + $0x7c] sm:$0xf] %vm536_vm4, %v694_v48  ;;  %4661 = vmatprep.subr.bf16.mxu0 %v4775_v58 }
  0xd3   : > { %v696_v43 = vpop.permute.xlu1 %695  ;;  %v1193_v42 = vld [vmem:[#allocation4 + $0x64] sm:$0xff] }
  0xd4   : > { %v505_v34 = vpop.permute.xlu0 %504  ;;  %v4748_v45 = vld [vmem:[#allocation4 + $0x54] ss:$20 sps:$4 sm:$0xff]   ;;  %736 = vst.msk [vmem:[#allocation4 + $0x90] sm:$0xf] %vm536_vm4, %v696_v43  ;;  %v4019_v3 = vcombine.low %v1190_v44, %v1193_v42  ;;  %4662 = vmatpush3.bf16.msra.mxu0 %v4775_v58  ;;  %v4779_v44 = vld [vmem:[#allocation4 + $0x10] ss:$20 sps:$4 sm:$0xff]  }
  0xd5   : > { %545 = vst.msk [vmem:[#allocation4 + $0xa0] sm:$0xf] %vm536_vm4, %v505_v34  ;;  %1793 = vmatprep.mubr.bf16.mxu0 %v4748_v45 }
  0xd7   : > { %v507_v51 = vpop.permute.xlu1 %506  ;;  %1794 = vmatmul.mubr.bf16.gmra.mrb[8].mxu0 %v4019_v3  ;;  %v4780_v3 = vld [vmem:[#allocation4 + $0x38] ss:$20 sps:$4 sm:$0xff]  }
  0xd8   : > { %v698_v27 = vpop.permute.xlu0 %697  ;;  %546 = vst.msk [vmem:[#allocation4 + $0xb4] sm:$0xf] %vm536_vm4, %v507_v51  ;;  %v1196_v30 = vld [vmem:[#allocation4 + $0x78] sm:$0xff] }
  0xd9   : > { %737 = vst.msk [vmem:[#allocation4 + $0xa4] sm:$0xf] %vm536_vm4, %v698_v27 }
  0xdb   : > { %v700_v41 = vpop.permute.xlu1 %699  ;;  %v1199_v60 = vld [vmem:[#allocation4 + $0x8c] sm:$0xff] }
  0xdc   : > { %v509_v50 = vpop.permute.xlu0 %508  ;;  %v4750_v57 = vld [vmem:[#allocation4 + $0x7c] ss:$20 sps:$4 sm:$0xff]   ;;  %738 = vst.msk [vmem:[#allocation4 + $0xb8] sm:$0xf] %vm536_vm4, %v700_v41  ;;  %v4024_v53 = vcombine.low %v1196_v30, %v1199_v60  ;;  %v4785_v60 = vld [vmem:[#allocation4 + $0x60] ss:$20 sps:$4 sm:$0xff]  }
  0xdd   : > { %547 = vst.msk [vmem:[#allocation4 + $0xc8] sm:$0xf] %vm536_vm4, %v509_v50  ;;  %1801 = vmatprep.mubr.bf16.mxu0 %v4750_v57 }
  0xdf   : > { %v511_v61 = vpop.permute.xlu1 %510  ;;  %1802 = vmatmul.mubr.bf16.gmra.mrb[12].mxu0 %v4024_v53 }
  0xe0   : > { %v1202_v39 = vld [vmem:[#allocation4 + $0xa0] sm:$0xff]  ;;  %v702_v38 = vpop.permute.xlu0 %701  ;;  %548 = vst.msk [vmem:[#allocation4 + $0xdc] sm:$0xf] %vm536_vm4, %v511_v61 }
  0xe1   : > { %2301 = vst.msk [vmem:[#allocation4 + $0xa4] sm:$0xf] %vm391_vm3, %v2285_v54 }
  0xe2   : > { %739 = vst.msk [vmem:[#allocation4 + $0xcc] sm:$0xf] %vm536_vm4, %v702_v38 }
  0xe3   : > { %v704_v55 = vpop.permute.xlu1 %703  ;;  %v1205_v4 = vld [vmem:[#allocation4 + $0xb4] sm:$0xff] }
  0xe4   : > { %v513_v52 = vpop.permute.xlu0 %512  ;;  %740 = vst.msk [vmem:[#allocation4 + $0xe0] sm:$0xf] %vm536_vm4, %v704_v55  ;;  %v4030_v56 = vcombine.high %v1202_v39, %v1205_v4  ;;  %v4029_v0 = vcombine.low %v1202_v39, %v1205_v4  ;;  %v4789_v4 = vld [vmem:[#allocation4 + $0xb0] ss:$20 sps:$4 sm:$0xff]  }
  0xe5   : > { %549 = vst.msk [vmem:[#allocation4 + $0xf0] sm:$0xf] %vm536_vm4, %v513_v52 }
  0xe6   : > { %1809 = vmatprep.mubr.bf16.mxu0 %v4030_v56 }
  0xe7   : > { %v515_v35 = vpop.permute.xlu1 %514  ;;  %1810 = vmatmul.mubr.bf16.gmra.mrb[16].mxu0 %v4029_v0 }
  0xe8   : > { %v706_v2 = vpop.permute.xlu0 %705  ;;  %550 = vst.msk [vmem:[#allocation4 + $0x104] sm:$0xf] %vm536_vm4, %v515_v35 }
  0xe9   : > { %741 = vst.msk [vmem:[#allocation4 + $0xf4] sm:$0xf] %vm536_vm4, %v706_v2  ;;  %v1208_v46 = vld [vmem:[#allocation4 + $0xc8] sm:$0xff] }
  0xeb   : > { %v708_v25 = vpop.permute.xlu1 %707  ;;  %v1211_v10 = vld [vmem:[#allocation4 + $0xdc] sm:$0xff] }
  0xec   : > { %v517_v6 = vpop.permute.xlu0 %516  ;;  %v4757_v32 = vld [vmem:[#allocation4 + $0xcc] ss:$20 sps:$4 sm:$0xff]   ;;  %742 = vst.msk [vmem:[#allocation4 + $0x108] sm:$0xf] %vm536_vm4, %v708_v25  ;;  %v4034_v36 = vcombine.low %v1208_v46, %v1211_v10 }
  0xed   : > { %551 = vst.msk [vmem:[#allocation4 + $0x118] sm:$0xf] %vm536_vm4, %v517_v6  ;;  %1817 = vmatprep.mubr.bf16.mxu0 %v4757_v32  ;;  %v4790_v10 = vld [vmem:[#allocation4 + $0xd8] ss:$20 sps:$4 sm:$0xff]  }
  0xef   : > { %v519_v13 = vpop.permute.xlu1 %518  ;;  %1818 = vmatmul.mubr.bf16.gmra.mrb[20].mxu0 %v4034_v36  ;;  %v4796_v36 = vld [vmem:[#allocation4 + $0x100] ss:$20 sps:$4 sm:$0xff]  }
  0xf0   : > { %v710_v62 = vpop.permute.xlu0 %709  ;;  %552 = vst.msk [vmem:[#allocation4 + $0x12c] sm:$0xf] %vm536_vm4, %v519_v13  ;;  %v1214_v29 = vld [vmem:[#allocation4 + $0xf0] sm:$0xff] }
  0xf1   : > { %743 = vst.msk [vmem:[#allocation4 + $0x11c] sm:$0xf] %vm536_vm4, %v710_v62  ;;  %v2653_v13 = vld [vmem:[#allocation3 + $0x90] sm:$0xff] }
  0xf3   : > { %v712_v26 = vpop.permute.xlu1 %711  ;;  %v1217_v33 = vld [vmem:[#allocation4 + $0x104] sm:$0xff] }
  0xf4   : > { %v874_v40 = vpop.permute.xlu0 %873  ;;  %v4764_v28 = vld [vmem:[#allocation4 + $0xf4] ss:$20 sps:$4 sm:$0xff]   ;;  %744 = vst.msk [vmem:[#allocation4 + $0x130] sm:$0xf] %vm536_vm4, %v712_v26  ;;  %v4039_v47 = vcombine.low %v1214_v29, %v1217_v33  ;;  %v2669_v26 = vpack.c.bf16 %v2653_v13, %v2653_v13 }
  0xf5   : > { %921 = vst.msk [vmem:[#allocation4 + $0x8] sm:$0xf] %vm536_vm4, %v874_v40  ;;  %1825 = vmatprep.mubr.bf16.mxu0 %v4764_v28 }
  0xf7   : > { %v876_v63 = vpop.permute.xlu1 %875  ;;  %1826 = vmatmul.mubr.bf16.gmra.mrb[24].mxu0 %v4039_v47 }
  0xf8   : > { %v1067_v59 = vpop.permute.xlu0 %1066  ;;  %922 = vst.msk [vmem:[#allocation4 + $0x1c] sm:$0xf] %vm536_vm4, %v876_v63  ;;  %v1220_v37 = vld [vmem:[#allocation4 + $0x118] sm:$0xff] }
  0xf9   : > { %1114 = vst.msk [vmem:[#allocation4 + $0xc] sm:$0xf] %vm536_vm4, %v1067_v59 }
  0xfb   : > { %v1069_v49 = vpop.permute.xlu1 %1068  ;;  %v1223_v48 = vld [vmem:[#allocation4 + $0x12c] sm:$0xff] }
  0xfc   : > { %v878_v58 = vpop.permute.xlu0 %877  ;;  %v4770_v43 = vld [vmem:[#allocation4 + $0x11c] ss:$20 sps:$4 sm:$0xff]   ;;  %1115 = vst.msk [vmem:[#allocation4 + $0x20] sm:$0xf] %vm536_vm4, %v1069_v49  ;;  %v4044_v34 = vcombine.low %v1220_v37, %v1223_v48 }
  0xfd   : > { %923 = vst.msk [vmem:[#allocation4 + $0x30] sm:$0xf] %vm536_vm4, %v878_v58  ;;  %1833 = vmatprep.mubr.bf16.mxu0 %v4770_v43 }
  0xff   : > { %v880_v42 = vpop.permute.xlu1 %879  ;;  %1834 = vmatmul.mubr.bf16.gmra.mrb[28].mxu0 %v4044_v34 }
 0x100   : > { %v1071_v45 = vpop.permute.xlu0 %1070  ;;  %924 = vst.msk [vmem:[#allocation4 + $0x44] sm:$0xf] %vm536_vm4, %v880_v42  ;;  %4663 = vmatprep.mubr.msk.bf16.mxu0 %vm225_vm0, %v4779_v44  ;;  %v1179_v27 = vld [vmem:[#allocation4 + $0x8] sm:$0xff] }
 0x101   : > { %1116 = vst.msk [vmem:[#allocation4 + $0x34] sm:$0xf] %vm536_vm4, %v1071_v45 }
 0x103   : > { %v1073_v51 = vpop.permute.xlu1 %1072  ;;  %v1182_v1 = vld [vmem:[#allocation4 + $0x1c] sm:$0xff] }
 0x104   : > { %v4777_v41 = vld [vmem:[#allocation4 + $0xc] ss:$20 sps:$4 sm:$0xff]   ;;  %v882_v50 = vpop.permute.xlu0 %881  ;;  %1117 = vst.msk [vmem:[#allocation4 + $0x48] sm:$0xf] %vm536_vm4, %v1073_v51  ;;  %v4011_v30 = vcombine.low %v1179_v27, %v1182_v1 }
 0x105   : > { %925 = vst.msk [vmem:[#allocation4 + $0x58] sm:$0xf] %vm536_vm4, %v882_v50  ;;  %1874 = vmatprep.mubr.bf16.mxu1 %v4777_v41 }
 0x106   : > { %1875 = vmatmul.mubr.bf16.vlgmr.msra.gmra.mrb[0].mxu1 %v4011_v30 }
 0x107   : > { %v884_v57 = vpop.permute.xlu1 %883  ;;  %4664 = vmatmul.mubr.msk.bf16.vlgmr.msra.gmra.mrb[32].mxu0 %vm225_vm0, %v4780_v3 }
 0x108   : > { %v1075_v54 = vpop.permute.xlu0 %1074  ;;  %926 = vst.msk [vmem:[#allocation4 + $0x6c] sm:$0xf] %vm536_vm4, %v884_v57  ;;  %4667 = vmatprep.mubr.msk.bf16.mxu0 %vm225_vm0, %v4785_v60  ;;  %v1185_v39 = vld [vmem:[#allocation4 + $0x30] sm:$0xff] }
 0x109   : > { %1118 = vst.msk [vmem:[#allocation4 + $0x5c] sm:$0xf] %vm536_vm4, %v1075_v54 }
 0x10b   : > { %v1077_v53 = vpop.permute.xlu1 %1076  ;;  %v1188_v61 = vld [vmem:[#allocation4 + $0x44] sm:$0xff] }
 0x10c   : > { %v4781_v38 = vld [vmem:[#allocation4 + $0x34] ss:$20 sps:$4 sm:$0xff]   ;;  %v886_v55 = vpop.permute.xlu0 %885  ;;  %1119 = vst.msk [vmem:[#allocation4 + $0x70] sm:$0xf] %vm536_vm4, %v1077_v53  ;;  %v4016_v52 = vcombine.low %v1185_v39, %v1188_v61 }
 0x10d   : > { %927 = vst.msk [vmem:[#allocation4 + $0x80] sm:$0xf] %vm536_vm4, %v886_v55  ;;  %1882 = vmatprep.mubr.bf16.mxu1 %v4781_v38  ;;  %v2661_v53 = vld [vmem:[#allocation3 + $0x130] sm:$0xff] }
 0x10e   : > { %1883 = vmatmul.mubr.bf16.gmra.mrb[4].mxu1 %v4016_v52  ;;  %v2677_v39 = vpack.c.bf16 %v2661_v53, %v2661_v53 }
 0x10f   : > { %v888_v56 = vpop.permute.xlu1 %887  ;;  %4668 = vmatmul.mubr.msk.bf16.gmra.mrb[36].mxu0 %vm225_vm0, %v5606_v31 }
 0x110   : > { %v1079_v0 = vpop.permute.xlu0 %1078  ;;  %928 = vst.msk [vmem:[#allocation4 + $0x94] sm:$0xf] %vm536_vm4, %v888_v56  ;;  %4671 = vmatprep.mubr.msk.bf16.mxu0 %vm225_vm0, %v4789_v4  ;;  %v1191_v35 = vld [vmem:[#allocation4 + $0x58] sm:$0xff]  ;;  %v2117_v4 = vld [vmem:[#allocation3 + $0x1] sm:$0xff] }
 0x111   : > { %1120 = vst.msk [vmem:[#allocation4 + $0x84] sm:$0xf] %vm536_vm4, %v1079_v0  ;;  %v4311_v56 = vpack.c.bf16 %v2117_v4, %v2117_v4  ;;  %v2125_v0 = vld [vmem:[#allocation3 + $0xa1] sm:$0xff] }
 0x113   : > { %v1081_v2 = vpop.permute.xlu1 %1080  ;;  %v1194_v25 = vld [vmem:[#allocation4 + $0x6c] sm:$0xff]  ;;  %2197 = vrot.lane.b32.xlu0 %v4311_v56, %s4904_s24 }
 0x114   : > { %v4783_v6 = vld [vmem:[#allocation4 + $0x5c] ss:$20 sps:$4 sm:$0xff]   ;;  %v890_v46 = vpop.permute.xlu0 %889  ;;  %1121 = vst.msk [vmem:[#allocation4 + $0x98] sm:$0xf] %vm536_vm4, %v1081_v2  ;;  %v4021_v32 = vcombine.low %v1191_v35, %v1194_v25  ;;  %v4319_v35 = vpack.c.bf16 %v2125_v0, %v2125_v0 }
 0x115   : > { %929 = vst.msk [vmem:[#allocation4 + $0xa8] sm:$0xf] %vm536_vm4, %v890_v46  ;;  %1890 = vmatprep.mubr.bf16.mxu1 %v4783_v6 }
 0x116   : > { %1891 = vmatmul.mubr.bf16.gmra.mrb[8].mxu1 %v4021_v32 }
 0x117   : > { %v892_v31 = vpop.permute.xlu1 %891  ;;  %4672 = vmatmul.mubr.msk.bf16.gmra.mrb[40].mxu0 %vm225_vm0, %v4790_v10  ;;  %2213 = vrot.lane.b32.xlu0 %v4319_v35, %s4904_s24  ;;  %v4798_v35 = vld [vmem:[%s6437_s3 + $0x40] sm:$0xff]  }
 0x118   : > { %v1083_v62 = vpop.permute.xlu0 %1082  ;;  %930 = vst.msk [vmem:[#allocation4 + $0xbc] sm:$0xf] %vm536_vm4, %v892_v31  ;;  %4675 = vmatprep.mubr.msk.bf16.mxu0 %vm225_vm0, %v4796_v36  ;;  %v1197_v40 = vld [vmem:[#allocation4 + $0x80] sm:$0xff]  ;;  %4515 = vmatprep.subr.bf16.mxu1 %v4798_v35 }
 0x119   : > { %1122 = vst.msk [vmem:[#allocation4 + $0xac] sm:$0xf] %vm536_vm4, %v1083_v62 }
 0x11b   : > { %v1200_v29 = vld [vmem:[#allocation4 + $0x94] sm:$0xff]  ;;  %v1085_v33 = vpop.permute.xlu1 %1084 }
 0x11c   : > { %v894_v28 = vpop.permute.xlu0 %893  ;;  %2685 = vst.msk [vmem:[#allocation4 + $0x98] sm:$0xf] %vm391_vm3, %v2669_v26  ;;  %v4027_v47 = vcombine.high %v1197_v40, %v1200_v29  ;;  %v4026_v63 = vcombine.low %v1197_v40, %v1200_v29 }
 0x11d   : > { %1123 = vst.msk [vmem:[#allocation4 + $0xc0] sm:$0xf] %vm536_vm4, %v1085_v33  ;;  %931 = vst.msk [vmem:[#allocation4 + $0xd0] sm:$0xf] %vm536_vm4, %v894_v28 }
 0x11e   : > { %1898 = vmatprep.mubr.bf16.mxu1 %v4027_v47 }
 0x11f   : > { %v896_v59 = vpop.permute.xlu1 %895  ;;  %1899 = vmatmul.mubr.bf16.gmra.mrb[12].mxu1 %v4026_v63  ;;  %4676 = vmatmul.mubr.msk.bf16.gmra.mrb[44].mxu0 %vm225_vm0, %v5663_v5 }
 0x120   : > { %v1087_v49 = vpop.permute.xlu0 %1086  ;;  %932 = vst.msk [vmem:[#allocation4 + $0xe4] sm:$0xf] %vm536_vm4, %v896_v59  ;;  %v1203_v58 = vld [vmem:[#allocation4 + $0xa8] sm:$0xff] }
 0x121   : > { %1124 = vst.msk [vmem:[#allocation4 + $0xd4] sm:$0xf] %vm536_vm4, %v1087_v49 }
 0x123   : > { %v1089_v37 = vpop.permute.xlu1 %1088 }
 0x124   : > { %v1206_v48 = vld [vmem:[#allocation4 + $0xbc] sm:$0xff]  ;;  %v898_v34 = vpop.permute.xlu0 %897  ;;  %1125 = vst.msk [vmem:[#allocation4 + $0xe8] sm:$0xf] %vm536_vm4, %v1089_v37 }
 0x125   : > { %v4787_v43 = vld [vmem:[#allocation4 + $0xac] ss:$20 sps:$4 sm:$0xff]   ;;  %v4031_v44 = vcombine.low %v1203_v58, %v1206_v48  ;;  %933 = vst.msk [vmem:[#allocation4 + $0xf8] sm:$0xf] %vm536_vm4, %v898_v34 }
 0x126   : > { %1906 = vmatprep.mubr.bf16.mxu1 %v4787_v43 }
 0x127   : > { %v900_v42 = vpop.permute.xlu1 %899  ;;  %1907 = vmatmul.mubr.bf16.gmra.mrb[16].mxu1 %v4031_v44 }
 0x128   : > { %v1091_v45 = vpop.permute.xlu0 %1090  ;;  %934 = vst.msk [vmem:[#allocation4 + $0x10c] sm:$0xf] %vm536_vm4, %v900_v42  ;;  %v1209_v5 = vld [vmem:[#allocation4 + $0xd0] sm:$0xff] }
 0x129   : > { %1126 = vst.msk [vmem:[#allocation4 + $0xfc] sm:$0xf] %vm536_vm4, %v1091_v45 }
 0x12b   : > { %v1093_v3 = vpop.permute.xlu1 %1092  ;;  %v1212_v51 = vld [vmem:[#allocation4 + $0xe4] sm:$0xff] }
 0x12c   : > { %v4791_v27 = vld [vmem:[#allocation4 + $0xd4] ss:$20 sps:$4 sm:$0xff]   ;;  %v902_v1 = vpop.permute.xlu0 %901  ;;  %1127 = vst.msk [vmem:[#allocation4 + $0x110] sm:$0xf] %vm536_vm4, %v1093_v3  ;;  %v4036_v41 = vcombine.low %v1209_v5, %v1212_v51 }
 0x12d   : > { %935 = vst.msk [vmem:[#allocation4 + $0x120] sm:$0xf] %vm536_vm4, %v902_v1  ;;  %1914 = vmatprep.mubr.bf16.mxu1 %v4791_v27 }
 0x12f   : > { %v904_v50 = vpop.permute.xlu1 %903  ;;  %1915 = vmatmul.mubr.bf16.gmra.mrb[20].mxu1 %v4036_v41  ;;  %v4795_v54 = vld [vmem:[#allocation4 + $0xf8] ss:$20 sps:$4 sm:$0xff]  }
 0x130   : > { %v1095_v30 = vpop.permute.xlu0 %1094  ;;  %936 = vst.msk [vmem:[#allocation4 + $0x134] sm:$0xf] %vm536_vm4, %v904_v50 }
 0x131   : > { %1128 = vst.msk [vmem:[#allocation4 + $0x124] sm:$0xf] %vm536_vm4, %v1095_v30 }
 0x133   : > { %v1097_v60 = vpop.permute.xlu1 %1096  ;;  %v4793_v57 = vld [vmem:[#allocation4 + $0xfc] ss:$20 sps:$4 sm:$0xff]  }
 0x134   : > { %1129 = vst.msk [vmem:[#allocation4 + $0x138] sm:$0xf] %vm536_vm4, %v1097_v60  ;;  %1922 = vmatprep.mubr.bf16.mxu1 %v4793_v57 }
 0x137   : > { %1923 = vmatmul.mubr.bf16.gmra.mrb[24].mxu1 %v4795_v54 }
 0x138   : > { %v1221_v61 = vld [vmem:[#allocation4 + $0x120] sm:$0xff] }
 0x13b   : > { %v1224_v38 = vld [vmem:[#allocation4 + $0x134] sm:$0xff] }
 0x13c   : > { %2693 = vst.msk [vmem:[#allocation4 + $0x138] sm:$0xf] %vm391_vm3, %v2677_v39  ;;  %v4047_v55 = vcombine.high %v1221_v61, %v1224_v38  ;;  %v4046_v52 = vcombine.low %v1221_v61, %v1224_v38 }
 0x13e   : > { %1930 = vmatprep.mubr.bf16.mxu1 %v4047_v55 }
 0x13f   : > { %1931 = vmatmul.mubr.bf16.gmra.mrb[28].mxu1 %v4046_v52 }
 0x19a   : > { %v4391_v2 = vpop.f32.mrb[0].mxu0 }
 0x19b   : > { %v4392_v25 = vpop.f32.mrb[1].mxu0 }
 0x19c   : > { %v4393_v6 = vadd.f32 %v4392_v25, %v4391_v2  ;;  %v4394_v46 = vpop.f32.mrb[2].mxu0  ;;  %v4799_v2 = vld [vmem:[%s6437_s3] sm:$0xff]  }
 0x19d   : > { %v4395_v10 = vpop.f32.mrb[3].mxu0  ;;  %4516 = vmatpush3.bf16.msra.mxu1 %v4799_v2 }
 0x19e   : > { %v4396_v32 = vadd.f32 %v4395_v10, %v4394_v46  ;;  %v5789_v46 = vld [vmem:[%s6436_s2] ss:$0 sm:$0xff] }
 0x1a2   : > { %v4397_v36 = vpop.f32.mrb[4].mxu0 }
 0x1a3   : > { %v4398_v13 = vpop.f32.mrb[5].mxu0 }
 0x1a4   : > { %v5752_v31 = vadd.f32 %v4398_v13, %v4397_v36  ;;  %v4400_v62 = vpop.f32.mrb[6].mxu0 }
 0x1a5   : > { %v4401_v26 = vpop.f32.mrb[7].mxu0 }
 0x1a6   : > { %v5754_v40 = vadd.f32 %v4401_v26, %v4400_v62  ;;  %v1780_v62 = vadd.f32 %v4393_v6, %v5789_v46 }
 0x1aa   : > { %v4403_v29 = vpop.f32.mrb[8].mxu0 }
 0x1ab   : > { %v4404_v33 = vpop.f32.mrb[9].mxu0 }
 0x1ac   : > { %v5756_v28 = vadd.f32 %v4404_v33, %v4403_v29  ;;  %v4406_v47 = vpop.f32.mrb[10].mxu0 }
 0x1ad   : > { %v4407_v63 = vpop.f32.mrb[11].mxu0 }
 0x1ae   : > { %v5758_v59 = vadd.f32 %v4407_v63, %v4406_v47 }
 0x1b2   : > { %v4409_v49 = vpop.f32.mrb[12].mxu0 }
 0x1b3   : > { %v4410_v58 = vpop.f32.mrb[13].mxu0 }
 0x1b4   : > { %v5760_v37 = vadd.f32 %v4410_v58, %v4409_v49  ;;  %v4412_v48 = vpop.f32.mrb[14].mxu0  ;;  %v1783_v49 = vadd.f32 %v4396_v32, %v5789_v46 }
 0x1b5   : > { %v4413_v43 = vpop.f32.mrb[15].mxu0 }
 0x1b6   : > { %v5762_v34 = vadd.f32 %v4413_v43, %v4412_v48 }
 0x1ba   : > { %v4415_v44 = vpop.f32.mrb[16].mxu0 }
 0x1bb   : > { %v4416_v42 = vpop.f32.mrb[17].mxu0 }
 0x1bc   : > { %v5764_v45 = vadd.f32 %v4416_v42, %v4415_v44  ;;  %v4418_v5 = vpop.f32.mrb[18].mxu0  ;;  %v4800_v44 = vld [vmem:[%s6437_s3 + $0x48] sm:$0xff]  }
 0x1bd   : > { %v4419_v3 = vpop.f32.mrb[19].mxu0  ;;  %v4801_v42 = vld [vmem:[%s6437_s3 + $0x8] sm:$0xff]   ;;  %4517 = vmatprep.subr.bf16.mxu1 %v4800_v44  ;;  %v1796_v44 = vadd.f32 %v5756_v28, %v5789_v46  ;;  %v1799_v28 = vadd.f32 %v5758_v59, %v5789_v46  ;;  %v4804_v59 = vld [vmem:[%s6437_s3 + $0x58] sm:$0xff]  }
 0x1be   : > { %v5766_v51 = vadd.f32 %v4419_v3, %v4418_v5  ;;  %v2069_v5 = vld [vmem:[#allocation3] sm:$0xff]  ;;  %4518 = vmatpush3.bf16.msra.mxu1 %v4801_v42 }
 0x1bf   : > { %v2085_v6 = vpack.c.bf16 %v2069_v5, %v2069_v5 }
 0x1c1   : > { %2101 = vst.msk [vmem:[#allocation4] sm:$0xf] %vm391_vm3, %v2085_v6 }
 0x1c2   : > { %v4421_v27 = vpop.f32.mrb[20].mxu0 }
 0x1c3   : > { %v4422_v1 = vpop.f32.mrb[21].mxu0 }
 0x1c4   : > { %v5768_v41 = vadd.f32 %v4422_v1, %v4421_v27  ;;  %v4424_v50 = vpop.f32.mrb[22].mxu0  ;;  %v2198_v1 = vpop.permute.xlu0 %2197 }
 0x1c5   : > { %v4425_v30 = vpop.f32.mrb[23].mxu0  ;;  %2245 = vst.msk [vmem:[#allocation4] sm:$0xf] %vm536_vm4, %v2198_v1 }
 0x1c6   : > { %v5770_v60 = vadd.f32 %v4425_v30, %v4424_v50 }
 0x1ca   : > { %v4427_v57 = vpop.f32.mrb[24].mxu0 }
 0x1cb   : > { %v4428_v54 = vpop.f32.mrb[25].mxu0 }
 0x1cc   : > { %v5772_v53 = vadd.f32 %v4428_v54, %v4427_v57  ;;  %v4430_v39 = vpop.f32.mrb[26].mxu0  ;;  %v2077_v57 = vld [vmem:[#allocation3 + $0xa0] sm:$0xff] }
 0x1cd   : > { %v4431_v61 = vpop.f32.mrb[27].mxu0 }
 0x1ce   : > { %v5774_v38 = vadd.f32 %v4431_v61, %v4430_v39  ;;  %v2093_v61 = vpack.c.bf16 %v2077_v57, %v2077_v57 }
 0x1d0   : > { %2109 = vst.msk [vmem:[#allocation4 + $0xa0] sm:$0xf] %vm391_vm3, %v2093_v61 }
 0x1d2   : > { %v4433_v55 = vpop.f32.mrb[28].mxu0 }
 0x1d3   : > { %v4434_v52 = vpop.f32.mrb[29].mxu0 }
 0x1d4   : > { %v5776_v4 = vadd.f32 %v4434_v52, %v4433_v55  ;;  %v4436_v56 = vpop.f32.mrb[30].mxu0  ;;  %v1788_v55 = vadd.f32 %v5752_v31, %v5789_v46  ;;  %v2214_v31 = vpop.permute.xlu0 %2213 }
 0x1d5   : > { %v4437_v0 = vpop.f32.mrb[31].mxu0  ;;  %2253 = vst.msk [vmem:[#allocation4 + $0xa0] sm:$0xf] %vm536_vm4, %v2214_v31  ;;  %v4805_v31 = vld [vmem:[%s6437_s3 + $0x18] sm:$0xff]  }
 0x1d6   : > { %v5784_v25 = vadd.f32 %v4437_v0, %v4436_v56 }
 0x1d9   : > { %v4455_v10 = vpop.f32.mrb[0].mxu1 }
 0x1da   : > { %v4456_v36 = vpop.f32.mrb[1].mxu1  ;;  %v4665_v13 = vpop.f32.mrb[32].mxu0 }
 0x1db   : > { %v4457_v26 = vadd.f32 %v4456_v36, %v4455_v10  ;;  %v4458_v29 = vpop.f32.mrb[2].mxu1  ;;  %v1973_v33 = vpop.f32.mrb[33].mxu0  ;;  %v1791_v36 = vadd.f32 %v5754_v40, %v5789_v46 }
 0x1dc   : > { %v4459_v47 = vpop.f32.mrb[3].mxu1  ;;  %v4666_v63 = vpop.f32.mrb[34].mxu0 }
 0x1dd   : > { %v4460_v58 = vadd.f32 %v4459_v47, %v4458_v29  ;;  %v1877_v48 = vadd.f32 %v4457_v26, %v1780_v62  ;;  %v1976_v43 = vpop.f32.mrb[35].mxu0  ;;  %v4803_v47 = vld [vmem:[%s6437_s3 + $0x10] sm:$0xff]  }
 0x1df   : > { %v1974_v3 = vadd.f32 %v1973_v33, %v1877_v48  ;;  %v1880_v27 = vadd.f32 %v4460_v58, %v1783_v49  ;;  %v4802_v33 = vld [vmem:[%s6437_s3 + $0x50] sm:$0xff]  }
 0x1e0   : > { %4519 = vmatprep.subr.bf16.mxu1 %v4802_v33  ;;  %v4806_v33 = vld [vmem:[%s6437_s3 + $0xc0] sm:$0xff]  }
 0x1e1   : > { %v2036_v32 = vmax.f32 %v1974_v3, 0.0  ;;  %v1977_v50 = vadd.f32 %v1976_v43, %v1880_v27  ;;  %v4461_v30 = vpop.f32.mrb[4].mxu1  ;;  %4520 = vmatpush3.bf16.msra.mxu1 %v4803_v47  ;;  %4579 = vmatprep.subr.bf16.mxu0 %v4806_v33 }
 0x1e2   : > { %v4462_v54 = vpop.f32.mrb[5].mxu1  ;;  %v5801_v39 = vpop.f32.mrb[36].mxu0  ;;  %4521 = vmatprep.subr.bf16.mxu1 %v4804_v59 }
 0x1e3   : > { %2053 = vst.msk [vmem:[#allocation3 + $0x11] sm:$0xff] %vm225_vm0, %v2036_v32  ;;  %v2037_v52 = vmax.f32 %v1977_v50, 0.0  ;;  %v4463_v56 = vadd.f32 %v4462_v54, %v4461_v30  ;;  %v4464_v0 = vpop.f32.mrb[6].mxu1  ;;  %v1989_v35 = vpop.f32.mrb[37].mxu0 }
 0x1e4   : > { %v4465_v2 = vpop.f32.mrb[7].mxu1  ;;  %v5806_v10 = vpop.f32.mrb[38].mxu0 }
 0x1e5   : > { %2054 = vst.msk [vmem:[#allocation3 + $0x21] sm:$0xff] %vm225_vm0, %v2037_v52  ;;  %v1885_v62 = vadd.f32 %v4463_v56, %v1788_v55  ;;  %v4466_v26 = vadd.f32 %v4465_v2, %v4464_v0  ;;  %v1992_v29 = vpop.f32.mrb[39].mxu0  ;;  %4522 = vmatpush3.bf16.msra.mxu1 %v4805_v31 }
 0x1e7   : > { %v1982_v49 = vadd.f32 %v4665_v13, %v1885_v62  ;;  %v1888_v58 = vadd.f32 %v4466_v26, %v1791_v36 }
 0x1e9   : > { %v2038_v40 = vmax.f32 %v1982_v49, 0.0  ;;  %v1985_v48 = vadd.f32 %v4666_v63, %v1888_v58  ;;  %v4467_v43 = vpop.f32.mrb[8].mxu1  ;;  %v4807_v49 = vld [vmem:[%s6437_s3 + $0x80] sm:$0xff]  }
 0x1ea   : > { %v4468_v42 = vpop.f32.mrb[9].mxu1  ;;  %v5821_v5 = vpop.f32.mrb[40].mxu0  ;;  %v2309_v6 = vld [vmem:[#allocation3 + $0x10] sm:$0xff]  ;;  %4580 = vmatpush3.bf16.msra.mxu0 %v4807_v49 }
 0x1eb   : > { %v2118_v3 = vld [vmem:[#allocation3 + $0x11] sm:$0xff]  ;;  %2055 = vst.msk [vmem:[#allocation3 + $0x31] sm:$0xff] %vm225_vm0, %v2038_v40  ;;  %v2039_v1 = vmax.f32 %v1985_v48, 0.0  ;;  %v4469_v32 = vadd.f32 %v4468_v42, %v4467_v43  ;;  %v4470_v13 = vpop.f32.mrb[10].mxu1  ;;  %v5824_v50 = vpack.c.bf16 %v2309_v6, %v2309_v6  ;;  %v5828_v63 = vpop.f32.mrb[41].mxu0 }
 0x1ec   : > { %v2501_v27 = vld [vmem:[#allocation3 + $0x12] sm:$0xff]  ;;  %v5826_v30 = vpack.c.bf16 %v2118_v3, %v2118_v3  ;;  %v2838_v57 = vld [vmem:[#allocation3 + $0x22] sm:$0xff]  ;;  %v4471_v54 = vpop.f32.mrb[11].mxu1  ;;  %v5832_v61 = vpop.f32.mrb[42].mxu0 }
 0x1ed   : > { %v5834_v55 = vpack.c.bf16 %v2501_v27, %v2501_v27  ;;  %v2310_v52 = vld [vmem:[#allocation3 + $0x20] sm:$0xff]  ;;  %v5836_v0 = vpack.c.bf16 %v2838_v57, %v2838_v57  ;;  %2056 = vst.msk [vmem:[#allocation3 + $0x41] sm:$0xff] %vm225_vm0, %v2039_v1  ;;  %v4472_v2 = vadd.f32 %v4471_v54, %v4470_v13  ;;  %v1893_v36 = vadd.f32 %v4469_v32, %v1796_v44  ;;  %v5839_v62 = vpop.f32.mrb[43].mxu0 }
 0x1ee   : > { %v2119_v56 = vld [vmem:[#allocation3 + $0x21] sm:$0xff]  ;;  %v5841_v26 = vpack.c.bf16 %v2310_v52, %v2310_v52  ;;  %2102 = vst.msk [vmem:[#allocation4 + $0x14] sm:$0xf] %vm391_vm3, %v5824_v50  ;;  %2485 = vst.msk [vmem:[#allocation4 + $0x8] sm:$0xf] %vm391_vm3, %v5826_v30 }
 0x1ef   : > { %v5856_v47 = vpack.c.bf16 %v2119_v56, %v2119_v56  ;;  %2294 = vst.msk [vmem:[#allocation4 + $0x18] sm:$0xf] %vm391_vm3, %v5834_v55  ;;  %2870 = vst.msk [vmem:[#allocation4 + $0x10] sm:$0xf] %vm391_vm3, %v5836_v0  ;;  %v1990_v58 = vadd.f32 %v1989_v35, %v1893_v36  ;;  %v1896_v40 = vadd.f32 %v4472_v2, %v1799_v28  ;;  %v4808_v35 = vld [vmem:[%s6437_s3 + $0xc8] sm:$0xff]  }
 0x1f0   : > { %2295 = vst.msk [vmem:[#allocation4 + $0x2c] sm:$0xf] %vm391_vm3, %v5836_v0  ;;  %2103 = vst.msk [vmem:[#allocation4 + $0x28] sm:$0xf] %vm391_vm3, %v5841_v26  ;;  %4581 = vmatprep.subr.bf16.mxu0 %v4808_v35  ;;  %v1804_v56 = vadd.f32 %v5760_v37, %v5789_v46 }
 0x1f1   : > { %2678 = vst.msk [vmem:[#allocation4 + $0xc] sm:$0xf] %vm391_vm3, %v5841_v26  ;;  %2486 = vst.msk [vmem:[#allocation4 + $0x1c] sm:$0xf] %vm391_vm3, %v5856_v47  ;;  %v2040_v48 = vmax.f32 %v1990_v58, 0.0  ;;  %v1993_v43 = vadd.f32 %v1992_v29, %v1896_v40  ;;  %v4809_v29 = vld [vmem:[%s6437_s3 + $0x88] sm:$0xff]  }
 0x1f2   : > { %v4473_v44 = vpop.f32.mrb[12].mxu1  ;;  %v2311_v42 = vld [vmem:[#allocation3 + $0x30] sm:$0xff]  ;;  %v5876_v27 = vpop.f32.mrb[44].mxu0  ;;  %4582 = vmatpush3.bf16.msra.mxu0 %v4809_v29 }
 0x1f3   : > { %v2120_v6 = vld [vmem:[#allocation3 + $0x31] sm:$0xff]  ;;  %2057 = vst.msk [vmem:[#allocation3 + $0x51] sm:$0xff] %vm225_vm0, %v2040_v48  ;;  %v2041_v1 = vmax.f32 %v1993_v43, 0.0  ;;  %v4474_v32 = vpop.f32.mrb[13].mxu1  ;;  %v4329_v13 = vpack.c.bf16 %v2311_v42, %v2311_v42  ;;  %v5879_v54 = vpop.f32.mrb[45].mxu0  ;;  %v4811_v42 = vld [vmem:[%s6437_s3 + $0x20] sm:$0xff]  }
 0x1f4   : > { %v2503_v3 = vld [vmem:[#allocation3 + $0x32] sm:$0xff]  ;;  %v4314_v28 = vpack.c.bf16 %v2120_v6, %v2120_v6  ;;  %v4475_v2 = vadd.f32 %v4474_v32, %v4473_v44  ;;  %v4476_v36 = vpop.f32.mrb[14].mxu1  ;;  %v2312_v59 = vld [vmem:[#allocation3 + $0x40] sm:$0xff]  ;;  %v5886_v49 = vpop.f32.mrb[46].mxu0 }
 0x1f5   : > { %v4345_v57 = vpack.c.bf16 %v2503_v3, %v2503_v3  ;;  %v2839_v52 = vld [vmem:[#allocation3 + $0x32] sm:$0xff]  ;;  %v2121_v31 = vld [vmem:[#allocation3 + $0x41] sm:$0xff]  ;;  %2058 = vst.msk [vmem:[#allocation3 + $0x61] sm:$0xff] %vm225_vm0, %v2041_v1  ;;  %v4477_v40 = vpop.f32.mrb[15].mxu1  ;;  %2393 = vrot.lane.b32.xlu0 %v4329_v13, %s4904_s24  ;;  %v5891_v48 = vpack.c.bf16 %v2312_v59, %v2312_v59  ;;  %v5897_v35 = vpop.f32.mrb[47].mxu0  ;;  %v1807_v3 = vadd.f32 %v5762_v34, %v5789_v46 }
 0x1f6   : > { %v2504_v33 = vld [vmem:[#allocation3 + $0x42] sm:$0xff]  ;;  %v2855_v58 = vpack.c.bf16 %v2839_v52, %v2839_v52  ;;  %2203 = vrot.lane.b32.xlu1 %v4314_v28, %s4904_s24  ;;  %v5893_v43 = vpack.c.bf16 %v2121_v31, %v2121_v31  ;;  %2104 = vst.msk [vmem:[#allocation4 + $0x3c] sm:$0xf] %vm391_vm3, %v4329_v13  ;;  %2487 = vst.msk [vmem:[#allocation4 + $0x30] sm:$0xf] %vm391_vm3, %v4314_v28  ;;  %v1901_v1 = vadd.f32 %v4475_v2, %v1804_v56  ;;  %v4813_v52 = vld [vmem:[%s6437_s3 + $0x90] sm:$0xff]  }
 0x1f7   : > { %v5895_v37 = vpack.c.bf16 %v2504_v33, %v2504_v33  ;;  %2679 = vst.msk [vmem:[#allocation4 + $0x20] sm:$0xf] %vm391_vm3, %v4329_v13  ;;  %2296 = vst.msk [vmem:[#allocation4 + $0x40] sm:$0xf] %vm391_vm3, %v4345_v57  ;;  %v4810_v44 = vld [vmem:[%s6437_s3 + $0x60] sm:$0xff]   ;;  %v4478_v32 = vadd.f32 %v4477_v40, %v4476_v36  ;;  %v4812_v13 = vld [vmem:[%s6437_s3 + $0xd0] sm:$0xff]  }
 0x1f8   : > { %v2840_v6 = vld [vmem:[#allocation3 + $0x42] sm:$0xff]  ;;  %2871 = vst.msk [vmem:[#allocation4 + $0x24] sm:$0xf] %vm391_vm3, %v2855_v58  ;;  %4523 = vmatprep.subr.bf16.mxu1 %v4810_v44  ;;  %2105 = vst.msk [vmem:[#allocation4 + $0x50] sm:$0xf] %vm391_vm3, %v5891_v48  ;;  %v1998_v34 = vadd.f32 %v5801_v39, %v1901_v1  ;;  %4583 = vmatprep.subr.bf16.mxu0 %v4812_v13  ;;  %v4815_v2 = vld [vmem:[%s6437_s3 + $0xd8] sm:$0xff]   ;;  %v1812_v1 = vadd.f32 %v5764_v45, %v5789_v46 }
 0x1f9   : > { %v2856_v59 = vpack.c.bf16 %v2840_v6, %v2840_v6  ;;  %2488 = vst.msk [vmem:[#allocation4 + $0x44] sm:$0xf] %vm391_vm3, %v5893_v43  ;;  %2680 = vst.msk [vmem:[#allocation4 + $0x34] sm:$0xf] %vm391_vm3, %v5891_v48  ;;  %v1904_v29 = vadd.f32 %v4478_v32, %v1807_v3  ;;  %4524 = vmatpush3.bf16.msra.mxu1 %v4811_v42  ;;  %v4814_v56 = vld [vmem:[%s6437_s3 + $0x68] sm:$0xff]   ;;  %2585 = vrot.lane.b32.xlu0 %v4345_v57, %s4904_s24 }
 0x1fa   : > { %2297 = vst.msk [vmem:[#allocation4 + $0x54] sm:$0xf] %vm391_vm3, %v5895_v37  ;;  %2776 = vrot.lane.b32.xlu1 %v4314_v28, %s4904_s24  ;;  %v2841_v36 = vld [vmem:[#allocation3 + $0x52] sm:$0xff]  ;;  %v2042_v31 = vmax.f32 %v1998_v34, 0.0  ;;  %v4479_v33 = vpop.f32.mrb[16].mxu1  ;;  %4584 = vmatpush3.bf16.msra.mxu0 %v4813_v52  ;;  %v4816_v28 = vld [vmem:[%s6437_s3 + $0x28] sm:$0xff]  }
 0x1fb   : > { %2872 = vst.msk [vmem:[#allocation4 + $0x38] sm:$0xf] %vm391_vm3, %v2856_v59  ;;  %v2001_v39 = vadd.f32 %v5806_v10, %v1904_v29  ;;  %v2122_v58 = vld [vmem:[#allocation3 + $0x51] sm:$0xff]  ;;  %4525 = vmatprep.subr.bf16.mxu1 %v4814_v56  ;;  %v5937_v44 = vpack.c.bf16 %v2841_v36, %v2841_v36  ;;  %v4480_v42 = vpop.f32.mrb[17].mxu1  ;;  %4585 = vmatprep.subr.bf16.mxu0 %v4815_v2 }
 0x1fc   : > { %v2313_v40 = vld [vmem:[#allocation3 + $0x50] sm:$0xff]  ;;  %v5939_v6 = vpack.c.bf16 %v2122_v58, %v2122_v58  ;;  %v4817_v10 = vld [vmem:[%s6437_s3 + $0x98] sm:$0xff]   ;;  %v2842_v32 = vld [vmem:[#allocation3 + $0x62] sm:$0xff]  ;;  %2059 = vst.msk [vmem:[#allocation3 + $0x71] sm:$0xff] %vm225_vm0, %v2042_v31  ;;  %v4481_v52 = vadd.f32 %v4480_v42, %v4479_v33  ;;  %v4482_v59 = vpop.f32.mrb[18].mxu1 }
 0x1fd   : > { %v5941_v3 = vpack.c.bf16 %v2313_v40, %v2313_v40  ;;  %v2266_v57 = vld [vmem:[#allocation3 + $0x52] sm:$0xff]  ;;  %v2043_v13 = vmax.f32 %v2001_v39, 0.0  ;;  %v2123_v34 = vld [vmem:[#allocation3 + $0x61] sm:$0xff]  ;;  %2873 = vst.msk [vmem:[#allocation4 + $0x4c] sm:$0xf] %vm391_vm3, %v5937_v44  ;;  %v5954_v2 = vpack.c.bf16 %v2842_v32, %v2842_v32  ;;  %v4483_v36 = vpop.f32.mrb[19].mxu1  ;;  %2389 = vrot.lane.b32.xlu0 %v5824_v50, %s4904_s24  ;;  %v1815_v50 = vadd.f32 %v5766_v51, %v5789_v46 }
 0x1fe   : > { %v2314_v29 = vld [vmem:[#allocation3 + $0x60] sm:$0xff]  ;;  %v2282_v56 = vpack.c.bf16 %v2266_v57, %v2266_v57  ;;  %2199 = vrot.lane.b32.xlu1 %v5826_v30, %s4904_s24  ;;  %v5960_v45 = vpack.c.bf16 %v2123_v34, %v2123_v34  ;;  %v4818_v39 = vld [vmem:[%s6437_s3 + $0x70] sm:$0xff]   ;;  %2489 = vst.msk [vmem:[#allocation4 + $0x58] sm:$0xf] %vm391_vm3, %v5939_v6  ;;  %v4484_v30 = vadd.f32 %v4483_v36, %v4482_v59  ;;  %v4823_v57 = vld [vmem:[%s6437_s3 + $0xe8] sm:$0xff]  }
 0x1ff   : > { %v5962_v31 = vpack.c.bf16 %v2314_v29, %v2314_v29  ;;  %v4819_v33 = vld [vmem:[%s6437_s3 + $0xe0] sm:$0xff]   ;;  %2106 = vst.msk [vmem:[#allocation4 + $0x64] sm:$0xf] %vm391_vm3, %v5941_v3  ;;  %2681 = vst.msk [vmem:[#allocation4 + $0x48] sm:$0xf] %vm391_vm3, %v5941_v3  ;;  %v1909_v58 = vadd.f32 %v4481_v52, %v1812_v1  ;;  %4526 = vmatpush3.bf16.msra.mxu1 %v4816_v28  ;;  %4586 = vmatpush3.bf16.msra.mxu0 %v4817_v10  ;;  %v4820_v40 = vld [vmem:[%s6437_s3 + $0x30] sm:$0xff]  }
 0x200   : > { %2060 = vst.msk [vmem:[#allocation3 + $0x81] sm:$0xff] %vm225_vm0, %v2043_v13  ;;  %v4821_v42 = vld [vmem:[%s6437_s3 + $0xa0] sm:$0xff]   ;;  %4527 = vmatprep.subr.bf16.mxu1 %v4818_v39  ;;  %4587 = vmatprep.subr.bf16.mxu0 %v4819_v33  ;;  %v1912_v28 = vadd.f32 %v4484_v30, %v1815_v50  ;;  %v4822_v10 = vld [vmem:[%s6437_s3 + $0x78] sm:$0xff]   ;;  %v4825_v52 = vld [vmem:[%s6437_s3 + $0xa8] sm:$0xff]   ;;  %v1823_v50 = vadd.f32 %v5770_v60, %v5789_v46 }
 0x201   : > { %2298 = vst.msk [vmem:[#allocation4 + $0x68] sm:$0xf] %vm391_vm3, %v2282_v56  ;;  %2874 = vst.msk [vmem:[#allocation4 + $0x60] sm:$0xf] %vm391_vm3, %v5954_v2  ;;  %v2006_v51 = vadd.f32 %v5828_v63, %v1909_v58  ;;  %2581 = vrot.lane.b32.xlu0 %v5834_v55, %s4904_s24  ;;  %v4824_v63 = vld [vmem:[%s6437_s3 + $0x38] sm:$0xff]   ;;  %v1820_v55 = vadd.f32 %v5768_v41, %v5789_v46  ;;  %v4829_v60 = vld [vmem:[%s6437_s3 + $0xf0] sm:$0xff]  }
 0x202   : > { %2299 = vst.msk [vmem:[#allocation4 + $0x7c] sm:$0xf] %vm391_vm3, %v5954_v2  ;;  %2107 = vst.msk [vmem:[#allocation4 + $0x78] sm:$0xf] %vm391_vm3, %v5962_v31  ;;  %2395 = vrot.lane.b32.xlu1 %v5891_v48, %s4904_s24  ;;  %v2009_v32 = vadd.f32 %v5839_v62, %v1912_v28  ;;  %v4485_v13 = vpop.f32.mrb[20].mxu1 }
 0x203   : > { %2682 = vst.msk [vmem:[#allocation4 + $0x5c] sm:$0xf] %vm391_vm3, %v5962_v31  ;;  %2490 = vst.msk [vmem:[#allocation4 + $0x6c] sm:$0xf] %vm391_vm3, %v5960_v45  ;;  %v2044_v1 = vmax.f32 %v2006_v51, 0.0  ;;  %4528 = vmatpush3.bf16.msra.mxu1 %v4820_v40  ;;  %4588 = vmatpush3.bf16.msra.mxu0 %v4821_v42  ;;  %v4486_v59 = vpop.f32.mrb[21].mxu1 }
 0x204   : > { %v2124_v34 = vld [vmem:[#allocation3 + $0x71] sm:$0xff]  ;;  %4529 = vmatprep.subr.bf16.mxu1 %v4822_v10  ;;  %4589 = vmatprep.subr.bf16.mxu0 %v4823_v57  ;;  %v2045_v62 = vmax.f32 %v2009_v32, 0.0  ;;  %v4487_v56 = vadd.f32 %v4486_v59, %v4485_v13  ;;  %v4488_v36 = vpop.f32.mrb[22].mxu1 }
 0x205   : > { %v2315_v48 = vld [vmem:[#allocation3 + $0x70] sm:$0xff]  ;;  %2061 = vst.msk [vmem:[#allocation3 + $0xb1] sm:$0xff] %vm225_vm0, %v2044_v1  ;;  %v6017_v39 = vpack.c.bf16 %v2124_v34, %v2124_v34  ;;  %v4489_v41 = vpop.f32.mrb[23].mxu1  ;;  %2205 = vrot.lane.b32.xlu0 %v5893_v43, %s4904_s24 }
 0x206   : > { %v2507_v29 = vld [vmem:[#allocation3 + $0x72] sm:$0xff]  ;;  %v6019_v33 = vpack.c.bf16 %v2315_v48, %v2315_v48  ;;  %2587 = vrot.lane.b32.xlu1 %v5895_v37, %s4904_s24  ;;  %2062 = vst.msk [vmem:[#allocation3 + $0xc1] sm:$0xff] %vm225_vm0, %v2045_v62  ;;  %v1917_v28 = vadd.f32 %v4487_v56, %v1820_v55  ;;  %v4490_v10 = vadd.f32 %v4489_v41, %v4488_v36 }
 0x207   : > { %v2844_v30 = vld [vmem:[#allocation3 + $0x82] sm:$0xff]  ;;  %v6027_v58 = vpack.c.bf16 %v2507_v29, %v2507_v29  ;;  %4530 = vmatpush3.bf16.msra.mxu1 %v4824_v63  ;;  %2491 = vst.msk [vmem:[#allocation4 + $0x80] sm:$0xf] %vm391_vm3, %v6017_v39  ;;  %v2843_v37 = vld [vmem:[#allocation3 + $0x72] sm:$0xff]  ;;  %4590 = vmatpush3.bf16.msra.mxu0 %v4825_v52 }
 0x208   : > { %v2316_v40 = vld [vmem:[#allocation3 + $0x80] sm:$0xff]  ;;  %v6029_v51 = vpack.c.bf16 %v2844_v30, %v2844_v30  ;;  %2108 = vst.msk [vmem:[#allocation4 + $0x8c] sm:$0xf] %vm391_vm3, %v6019_v33  ;;  %2683 = vst.msk [vmem:[#allocation4 + $0x70] sm:$0xf] %vm391_vm3, %v6019_v33  ;;  %v4830_v32 = vld [vmem:[%s6437_s3 + $0xb0] sm:$0xff]   ;;  %v2859_v13 = vpack.c.bf16 %v2843_v37, %v2843_v37  ;;  %v2014_v63 = vadd.f32 %v5821_v5, %v1917_v28  ;;  %4591 = vmatprep.subr.bf16.mxu0 %v4829_v60 }
 0x209   : > { %v2700_v42 = vld [vmem:[#allocation3 + $0x81] sm:$0xff]  ;;  %v6032_v57 = vpack.c.bf16 %v2316_v40, %v2316_v40  ;;  %2300 = vst.msk [vmem:[#allocation4 + $0x90] sm:$0xf] %vm391_vm3, %v6027_v58  ;;  %v1920_v55 = vadd.f32 %v4490_v10, %v1823_v50  ;;  %2778 = vrot.lane.b32.xlu0 %v5893_v43, %s4904_s24  ;;  %v4833_v52 = vld [vmem:[%s6437_s3 + $0xf8] sm:$0xff]   ;;  %v1831_v10 = vadd.f32 %v5774_v38, %v5789_v46 }
 0x20a   : > { %v6043_v1 = vpack.c.bf16 %v2700_v42, %v2700_v42  ;;  %2876 = vst.msk [vmem:[#allocation4 + $0x88] sm:$0xf] %vm391_vm3, %v6029_v51  ;;  %2391 = vrot.lane.b32.xlu1 %v5841_v26, %s4904_s24  ;;  %2875 = vst.msk [vmem:[#allocation4 + $0x74] sm:$0xf] %vm391_vm3, %v2859_v13  ;;  %v2046_v5 = vmax.f32 %v2014_v63, 0.0  ;;  %v4491_v34 = vpop.f32.mrb[24].mxu1  ;;  %v1828_v26 = vadd.f32 %v5772_v53, %v5789_v46 }
 0x20b   : > { %2684 = vst.msk [vmem:[#allocation4 + $0x84] sm:$0xf] %vm391_vm3, %v6032_v57  ;;  %v2017_v59 = vadd.f32 %v5832_v61, %v1920_v55  ;;  %v4834_v43 = vld [vmem:[%s6437_s3 + $0xb8] sm:$0xff]   ;;  %v4492_v48 = vpop.f32.mrb[25].mxu1  ;;  %4592 = vmatpush3.bf16.msra.mxu0 %v4830_v32 }
 0x20c   : > { %2492 = vst.msk [vmem:[#allocation4 + $0x94] sm:$0xf] %vm391_vm3, %v6043_v1  ;;  %v2317_v29 = vld [vmem:[#allocation3 + $0xb0] sm:$0xff]  ;;  %v4493_v50 = vadd.f32 %v4492_v48, %v4491_v34  ;;  %v4494_v30 = vpop.f32.mrb[26].mxu1  ;;  %4593 = vmatprep.subr.bf16.mxu0 %v4833_v52 }
 0x20d   : > { %v2126_v62 = vld [vmem:[#allocation3 + $0xb1] sm:$0xff]  ;;  %2063 = vst.msk [vmem:[#allocation3 + $0xd1] sm:$0xff] %vm225_vm0, %v2046_v5  ;;  %v2047_v36 = vmax.f32 %v2017_v59, 0.0  ;;  %v6072_v41 = vpack.c.bf16 %v2317_v29, %v2317_v29  ;;  %v2846_v40 = vld [vmem:[#allocation3 + $0xc2] sm:$0xff]  ;;  %v4495_v42 = vpop.f32.mrb[27].mxu1  ;;  %2201 = vrot.lane.b32.xlu0 %v5856_v47, %s4904_s24 }
 0x20e   : > { %v2509_v56 = vld [vmem:[#allocation3 + $0xb2] sm:$0xff]  ;;  %v6074_v61 = vpack.c.bf16 %v2126_v62, %v2126_v62  ;;  %2583 = vrot.lane.b32.xlu1 %v5836_v0, %s4904_s24  ;;  %v2318_v53 = vld [vmem:[#allocation3 + $0xc0] sm:$0xff]  ;;  %v6084_v60 = vpack.c.bf16 %v2846_v40, %v2846_v40  ;;  %v4496_v37 = vadd.f32 %v4495_v42, %v4494_v30  ;;  %v1925_v32 = vadd.f32 %v4493_v50, %v1828_v26 }
 0x20f   : > { %v6080_v28 = vpack.c.bf16 %v2509_v56, %v2509_v56  ;;  %2064 = vst.msk [vmem:[#allocation3 + $0xe1] sm:$0xff] %vm225_vm0, %v2047_v36  ;;  %v2271_v13 = vld [vmem:[#allocation3 + $0xc2] sm:$0xff]  ;;  %v6091_v63 = vpack.c.bf16 %v2318_v53, %v2318_v53  ;;  %4594 = vmatpush3.bf16.msra.mxu0 %v4834_v43 }
 0x210   : > { %2110 = vst.msk [vmem:[#allocation4 + $0xb4] sm:$0xf] %vm391_vm3, %v6072_v41  ;;  %2493 = vst.msk [vmem:[#allocation4 + $0xa8] sm:$0xf] %vm391_vm3, %v6074_v61  ;;  %v2462_v0 = vld [vmem:[#allocation3 + $0xc1] sm:$0xff]  ;;  %v2287_v55 = vpack.c.bf16 %v2271_v13, %v2271_v13  ;;  %v2022_v52 = vadd.f32 %v5879_v54, %v1925_v32  ;;  %v1928_v5 = vadd.f32 %v4496_v37, %v1831_v10 }
 0x211   : > { %2302 = vst.msk [vmem:[#allocation4 + $0xb8] sm:$0xf] %vm391_vm3, %v6080_v28  ;;  %v2478_v38 = vpack.c.bf16 %v2462_v0, %v2462_v0  ;;  %2878 = vst.msk [vmem:[#allocation4 + $0xb0] sm:$0xf] %vm391_vm3, %v6084_v60  ;;  %2774 = vrot.lane.b32.xlu0 %v5856_v47, %s4904_s24  ;;  %v1836_v47 = vadd.f32 %v5776_v4, %v5789_v46  ;;  %v1839_v32 = vadd.f32 %v5784_v25, %v5789_v46 }
 0x212   : > { %2211 = vrot.lane.b32.xlu1 %v6017_v39, %s4904_s24  ;;  %2303 = vst.msk [vmem:[#allocation4 + $0xcc] sm:$0xf] %vm391_vm3, %v2287_v55  ;;  %2111 = vst.msk [vmem:[#allocation4 + $0xc8] sm:$0xf] %vm391_vm3, %v6091_v63  ;;  %v2048_v59 = vmax.f32 %v2022_v52, 0.0  ;;  %v2025_v54 = vadd.f32 %v5897_v35, %v1928_v5  ;;  %v4497_v34 = vpop.f32.mrb[28].mxu1 }
 0x213   : > { %2686 = vst.msk [vmem:[#allocation4 + $0xac] sm:$0xf] %vm391_vm3, %v6091_v63  ;;  %2494 = vst.msk [vmem:[#allocation4 + $0xbc] sm:$0xf] %vm391_vm3, %v2478_v38  ;;  %v4498_v26 = vpop.f32.mrb[29].mxu1  ;;  %v6119_v35 = vld [vmem:[%s6437_s3 + $0x100] sm:$0xff]  }
 0x214   : > { %v2847_v43 = vld [vmem:[#allocation3 + $0xd2] sm:$0xff]  ;;  %2065 = vst.msk [vmem:[#allocation3 + $0xf1] sm:$0xff] %vm225_vm0, %v2048_v59  ;;  %v2049_v62 = vmax.f32 %v2025_v54, 0.0  ;;  %v4499_v56 = vadd.f32 %v4498_v26, %v4497_v34  ;;  %v4500_v36 = vpop.f32.mrb[30].mxu1  ;;  %4679 = vmatprep.subr.bf16.mxu1 %v6119_v35 }
 0x215   : > { %v2319_v48 = vld [vmem:[#allocation3 + $0xd0] sm:$0xff]  ;;  %v6111_v29 = vpack.c.bf16 %v2847_v43, %v2847_v43  ;;  %v4501_v42 = vpop.f32.mrb[31].mxu1  ;;  %2401 = vrot.lane.b32.xlu0 %v6019_v33, %s4904_s24 }
 0x216   : > { %v6114_v50 = vpack.c.bf16 %v2319_v48, %v2319_v48  ;;  %v2272_v30 = vld [vmem:[#allocation3 + $0xd2] sm:$0xff]  ;;  %v2848_v4 = vld [vmem:[#allocation3 + $0xe2] sm:$0xff]  ;;  %2784 = vrot.lane.b32.xlu1 %v6017_v39, %s4904_s24  ;;  %2066 = vst.msk [vmem:[#allocation3 + $0x101] sm:$0xff] %vm225_vm0, %v2049_v62  ;;  %v1933_v0 = vadd.f32 %v4499_v56, %v1836_v47  ;;  %v4502_v55 = vadd.f32 %v4501_v42, %v4500_v36 }
 0x217   : > { %v2463_v40 = vld [vmem:[#allocation3 + $0xd1] sm:$0xff]  ;;  %v2320_v53 = vld [vmem:[#allocation3 + $0xe0] sm:$0xff]  ;;  %v2288_v10 = vpack.c.bf16 %v2272_v30, %v2272_v30  ;;  %2879 = vst.msk [vmem:[#allocation4 + $0xc4] sm:$0xf] %vm391_vm3, %v6111_v29  ;;  %v6129_v13 = vpack.c.bf16 %v2848_v4, %v2848_v4 }
 0x218   : > { %v2479_v37 = vpack.c.bf16 %v2463_v40, %v2463_v40  ;;  %2112 = vst.msk [vmem:[#allocation4 + $0xdc] sm:$0xf] %vm391_vm3, %v6114_v50  ;;  %v2273_v39 = vld [vmem:[#allocation3 + $0xe2] sm:$0xff]  ;;  %v2655_v38 = vld [vmem:[#allocation3 + $0xd0] sm:$0xff]  ;;  %v6135_v52 = vpack.c.bf16 %v2320_v53, %v2320_v53  ;;  %v2030_v54 = vadd.f32 %v5876_v27, %v1933_v0  ;;  %v1936_v34 = vadd.f32 %v4502_v55, %v1839_v32 }
 0x219   : > { %v2656_v33 = vld [vmem:[#allocation3 + $0xe0] sm:$0xff]  ;;  %2304 = vst.msk [vmem:[#allocation4 + $0xe0] sm:$0xf] %vm391_vm3, %v2288_v10  ;;  %v2289_v25 = vpack.c.bf16 %v2273_v39, %v2273_v39  ;;  %v2671_v5 = vpack.c.bf16 %v2655_v38, %v2655_v38  ;;  %2880 = vst.msk [vmem:[#allocation4 + $0xd8] sm:$0xf] %vm391_vm3, %v6129_v13  ;;  %2593 = vrot.lane.b32.xlu0 %v6027_v58, %s4904_s24 }
 0x21a   : > { %2495 = vst.msk [vmem:[#allocation4 + $0xd0] sm:$0xf] %vm391_vm3, %v2479_v37  ;;  %v2672_v46 = vpack.c.bf16 %v2656_v33, %v2656_v33  ;;  %v2464_v59 = vld [vmem:[#allocation3 + $0xe1] sm:$0xff]  ;;  %2207 = vrot.lane.b32.xlu1 %v5939_v6, %s4904_s24  ;;  %2113 = vst.msk [vmem:[#allocation4 + $0xf0] sm:$0xf] %vm391_vm3, %v6135_v52  ;;  %v2050_v43 = vmax.f32 %v2030_v54, 0.0  ;;  %v2033_v27 = vadd.f32 %v5886_v49, %v1936_v34 }
 0x21b   : > { %v2480_v47 = vpack.c.bf16 %v2464_v59, %v2464_v59  ;;  %2305 = vst.msk [vmem:[#allocation4 + $0xf4] sm:$0xf] %vm391_vm3, %v2289_v25  ;;  %2687 = vst.msk [vmem:[#allocation4 + $0xc0] sm:$0xf] %vm391_vm3, %v2671_v5  ;;  %v2849_v26 = vld [vmem:[#allocation3 + $0xf2] sm:$0xff] }
 0x21c   : > { %2688 = vst.msk [vmem:[#allocation4 + $0xd4] sm:$0xf] %vm391_vm3, %v2672_v46  ;;  %v2321_v48 = vld [vmem:[#allocation3 + $0xf0] sm:$0xff]  ;;  %v6153_v58 = vpack.c.bf16 %v2849_v26, %v2849_v26  ;;  %v2051_v62 = vmax.f32 %v2033_v27, 0.0 }
 0x21d   : > { %2496 = vst.msk [vmem:[#allocation4 + $0xe4] sm:$0xf] %vm391_vm3, %v2480_v47  ;;  %v6156_v56 = vpack.c.bf16 %v2321_v48, %v2321_v48  ;;  %v2274_v36 = vld [vmem:[#allocation3 + $0xf2] sm:$0xff]  ;;  %v2850_v4 = vld [vmem:[#allocation3 + $0x102] sm:$0xff]  ;;  %2397 = vrot.lane.b32.xlu0 %v5941_v3, %s4904_s24 }
 0x21e   : > { %2067 = vst.msk [vmem:[#allocation3 + $0x111] sm:$0xff] %vm225_vm0, %v2050_v43  ;;  %v2465_v30 = vld [vmem:[#allocation3 + $0xf1] sm:$0xff]  ;;  %2780 = vrot.lane.b32.xlu1 %v5939_v6, %s4904_s24  ;;  %v2322_v49 = vld [vmem:[#allocation3 + $0x100] sm:$0xff]  ;;  %v2290_v42 = vpack.c.bf16 %v2274_v36, %v2274_v36  ;;  %v6164_v37 = vpack.c.bf16 %v2850_v4, %v2850_v4  ;;  %2068 = vst.msk [vmem:[#allocation3 + $0x121] sm:$0xff] %vm225_vm0, %v2051_v62 }
 0x21f   : > { %v2657_v40 = vld [vmem:[#allocation3 + $0xf0] sm:$0xff]  ;;  %v2481_v53 = vpack.c.bf16 %v2465_v30, %v2465_v30  ;;  %2881 = vst.msk [vmem:[#allocation4 + $0xec] sm:$0xf] %vm391_vm3, %v6153_v58  ;;  %v6167_v32 = vpack.c.bf16 %v2322_v49, %v2322_v49  ;;  %v2275_v0 = vld [vmem:[#allocation3 + $0x102] sm:$0xff]  ;;  %2114 = vst.msk [vmem:[#allocation4 + $0x104] sm:$0xf] %vm391_vm3, %v6156_v56 }
 0x220   : > { %v2673_v10 = vpack.c.bf16 %v2657_v40, %v2657_v40  ;;  %v2658_v3 = vld [vmem:[#allocation3 + $0x100] sm:$0xff]  ;;  %v2291_v6 = vpack.c.bf16 %v2275_v0, %v2275_v0  ;;  %2306 = vst.msk [vmem:[#allocation4 + $0x108] sm:$0xf] %vm391_vm3, %v2290_v42  ;;  %2882 = vst.msk [vmem:[#allocation4 + $0x100] sm:$0xf] %vm391_vm3, %v6164_v37  ;;  %v2128_v36 = vld [vmem:[#allocation3 + $0xd1] sm:$0xff] }
 0x221   : > { %v2466_v55 = vld [vmem:[#allocation3 + $0x101] sm:$0xff]  ;;  %2497 = vst.msk [vmem:[#allocation4 + $0xf8] sm:$0xf] %vm391_vm3, %v2481_v53  ;;  %v2674_v39 = vpack.c.bf16 %v2658_v3, %v2658_v3  ;;  %2115 = vst.msk [vmem:[#allocation4 + $0x118] sm:$0xf] %vm391_vm3, %v6167_v32  ;;  %2589 = vrot.lane.b32.xlu0 %v5937_v44, %s4904_s24  ;;  %v4322_v30 = vpack.c.bf16 %v2128_v36, %v2128_v36  ;;  %v2130_v42 = vld [vmem:[#allocation3 + $0xf1] sm:$0xff] }
 0x222   : > { %2689 = vst.msk [vmem:[#allocation4 + $0xe8] sm:$0xf] %vm391_vm3, %v2673_v10  ;;  %v2482_v33 = vpack.c.bf16 %v2466_v55, %v2466_v55  ;;  %2403 = vrot.lane.b32.xlu1 %v6032_v57, %s4904_s24  ;;  %2307 = vst.msk [vmem:[#allocation4 + $0x11c] sm:$0xf] %vm391_vm3, %v2291_v6  ;;  %v2129_v40 = vld [vmem:[#allocation3 + $0xe1] sm:$0xff]  ;;  %v2701_v10 = vld [vmem:[#allocation3 + $0x91] sm:$0xff] }
 0x223   : > { %2690 = vst.msk [vmem:[#allocation4 + $0xfc] sm:$0xf] %vm391_vm3, %v2674_v39  ;;  %v2127_v4 = vld [vmem:[#allocation3 + $0xc1] sm:$0xff] }
 0x224   : > { %2498 = vst.msk [vmem:[#allocation4 + $0x10c] sm:$0xf] %vm391_vm3, %v2482_v33  ;;  %v2131_v53 = vld [vmem:[#allocation3 + $0x101] sm:$0xff] }
 0x225   : > { %v2851_v38 = vld [vmem:[#allocation3 + $0x112] sm:$0xff]  ;;  %v2852_v47 = vld [vmem:[#allocation3 + $0x122] sm:$0xff]  ;;  %2209 = vrot.lane.b32.xlu0 %v5960_v45, %s4904_s24 }
 0x226   : > { %v2323_v25 = vld [vmem:[#allocation3 + $0x110] sm:$0xff]  ;;  %v6185_v46 = vpack.c.bf16 %v2851_v38, %v2851_v38  ;;  %2399 = vrot.lane.b32.xlu1 %v5962_v31, %s4904_s24  ;;  %v6193_v27 = vpack.c.bf16 %v2852_v47, %v2852_v47  ;;  %v2660_v26 = vld [vmem:[#allocation3 + $0x120] sm:$0xff]  ;;  %v4847_v47 = vld [vmem:[%s6437_s3 + $0x108] sm:$0xff]  }
 0x227   : > { %v4341_v5 = vpack.c.bf16 %v2323_v25, %v2323_v25  ;;  %v2276_v59 = vld [vmem:[#allocation3 + $0x112] sm:$0xff]  ;;  %v2468_v48 = vld [vmem:[#allocation3 + $0x121] sm:$0xff]  ;;  %v2676_v62 = vpack.c.bf16 %v2660_v26, %v2660_v26 }
 0x228   : > { %v2467_v54 = vld [vmem:[#allocation3 + $0x111] sm:$0xff]  ;;  %v2292_v44 = vpack.c.bf16 %v2276_v59, %v2276_v59  ;;  %2883 = vst.msk [vmem:[#allocation4 + $0x114] sm:$0xf] %vm391_vm3, %v6185_v46  ;;  %v2484_v31 = vpack.c.bf16 %v2468_v48, %v2468_v48  ;;  %2884 = vst.msk [vmem:[#allocation4 + $0x128] sm:$0xf] %vm391_vm3, %v6193_v27 }
 0x229   : > { %v2659_v34 = vld [vmem:[#allocation3 + $0x110] sm:$0xff]  ;;  %v2483_v57 = vpack.c.bf16 %v2467_v54, %v2467_v54  ;;  %2116 = vst.msk [vmem:[#allocation4 + $0x12c] sm:$0xf] %vm391_vm3, %v4341_v5  ;;  %2782 = vrot.lane.b32.xlu0 %v5960_v45, %s4904_s24  ;;  %2692 = vst.msk [vmem:[#allocation4 + $0x124] sm:$0xf] %vm391_vm3, %v2676_v62  ;;  %v4323_v45 = vpack.c.bf16 %v2129_v40, %v2129_v40  ;;  %v4855_v40 = vld [vmem:[%s6437_s3 + $0x118] sm:$0xff]  }
 0x22a   : > { %v2675_v43 = vpack.c.bf16 %v2659_v34, %v2659_v34  ;;  %2308 = vst.msk [vmem:[#allocation4 + $0x130] sm:$0xf] %vm391_vm3, %v2292_v44  ;;  %2591 = vrot.lane.b32.xlu1 %v5954_v2, %s4904_s24  ;;  %2500 = vst.msk [vmem:[#allocation4 + $0x134] sm:$0xf] %vm391_vm3, %v2484_v31  ;;  %v4321_v2 = vpack.c.bf16 %v2127_v4, %v2127_v4  ;;  %v2132_v49 = vld [vmem:[#allocation3 + $0x111] sm:$0xff] }
 0x22b   : > { %2499 = vst.msk [vmem:[#allocation4 + $0x120] sm:$0xf] %vm391_vm3, %v2483_v57 }
 0x22c   : > { %2691 = vst.msk [vmem:[#allocation4 + $0x110] sm:$0xf] %vm391_vm3, %v2675_v43 }
 0x22d   : > { %2409 = vrot.lane.b32.xlu0 %v6114_v50, %s4904_s24  ;;  %v4326_v50 = vpack.c.bf16 %v2132_v49, %v2132_v49 }
 0x22e   : > { %2219 = vrot.lane.b32.xlu1 %v4322_v30, %s4904_s24 }
 0x231   : > { %2405 = vrot.lane.b32.xlu0 %v6072_v41, %s4904_s24  ;;  %v4324_v41 = vpack.c.bf16 %v2130_v42, %v2130_v42 }
 0x232   : > { %2215 = vrot.lane.b32.xlu1 %v6074_v61, %s4904_s24  ;;  %v2324_v61 = vld [vmem:[#allocation3 + $0x120] sm:$0xff] }
 0x235   : > { %2221 = vrot.lane.b32.xlu0 %v4323_v45, %s4904_s24 }
 0x236   : > { %2411 = vrot.lane.b32.xlu1 %v6135_v52, %s4904_s24  ;;  %v4342_v52 = vpack.c.bf16 %v2324_v61, %v2324_v61 }
 0x239   : > { %2217 = vrot.lane.b32.xlu0 %v4321_v2, %s4904_s24 }
 0x23a   : > { %2407 = vrot.lane.b32.xlu1 %v6091_v63, %s4904_s24  ;;  %v4325_v63 = vpack.c.bf16 %v2131_v53, %v2131_v53 }
 0x23d   : > { %2417 = vrot.lane.b32.xlu0 %v4341_v5, %s4904_s24 }
 0x23e   : > { %2227 = vrot.lane.b32.xlu1 %v4326_v50, %s4904_s24 }
 0x241   : > { %2413 = vrot.lane.b32.xlu0 %v6156_v56, %s4904_s24  ;;  %v4366_v56 = vpack.c.bf16 %v2701_v10, %v2701_v10 }
 0x242   : > { %2223 = vrot.lane.b32.xlu1 %v4324_v41, %s4904_s24 }
 0x245   : > { %2786 = vrot.lane.b32.xlu0 %v6043_v1, %s4904_s24 }
 0x246   : > { %2419 = vrot.lane.b32.xlu1 %v4342_v52, %s4904_s24 }
 0x249   : > { %2225 = vrot.lane.b32.xlu0 %v4325_v63, %s4904_s24 }
 0x24a   : > { %2415 = vrot.lane.b32.xlu1 %v6167_v32, %s4904_s24 }
 0x24d   : > { %2597 = vrot.lane.b32.xlu0 %v6080_v28, %s4904_s24 }
 0x24e   : > { %2595 = vrot.lane.b32.xlu1 %v6029_v51, %s4904_s24  ;;  %v2708_v51 = vld [vmem:[#allocation3 + $0x121] sm:$0xff] }
 0x251   : > { %2790 = vrot.lane.b32.xlu0 %v4321_v2, %s4904_s24 }
 0x252   : > { %2788 = vrot.lane.b32.xlu1 %v4366_v56, %s4904_s24 }
 0x255   : > { %2601 = vrot.lane.b32.xlu0 %v6111_v29, %s4904_s24  ;;  %v2709_v29 = vld [vmem:[#allocation3 + $0x131] sm:$0xff] }
 0x256   : > { %2599 = vrot.lane.b32.xlu1 %v6084_v60, %s4904_s24  ;;  %v4373_v60 = vpack.c.bf16 %v2708_v51, %v2708_v51  ;;  %v4374_v32 = vpack.c.bf16 %v2709_v29, %v2709_v29 }
 0x259   : > { %2794 = vrot.lane.b32.xlu0 %v4323_v45, %s4904_s24 }
 0x25a   : > { %2792 = vrot.lane.b32.xlu1 %v4322_v30, %s4904_s24 }
 0x25d   : > { %2605 = vrot.lane.b32.xlu0 %v6153_v58, %s4904_s24 }
 0x25e   : > { %2603 = vrot.lane.b32.xlu1 %v6129_v13, %s4904_s24 }
 0x261   : > { %2798 = vrot.lane.b32.xlu0 %v4325_v63, %s4904_s24 }
 0x262   : > { %2796 = vrot.lane.b32.xlu1 %v4324_v41, %s4904_s24 }
 0x265   : > { %2609 = vrot.lane.b32.xlu0 %v6185_v46, %s4904_s24 }
 0x266   : > { %2800 = vrot.lane.b32.xlu1 %v4326_v50, %s4904_s24 }
 0x267   : > { %v2394_v1 = vpop.permute.xlu0 %2393 }
 0x268   : > { %v2204_v28 = vpop.permute.xlu1 %2203  ;;  %2439 = vst.msk [vmem:[#allocation4 + $0x2c] sm:$0xf] %vm536_vm4, %v2394_v1 }
 0x269   : > { %2248 = vst.msk [vmem:[#allocation4 + $0x3c] sm:$0xf] %vm536_vm4, %v2204_v28  ;;  %2802 = vrot.lane.b32.xlu0 %v4373_v60, %s4904_s24 }
 0x26a   : > { %2607 = vrot.lane.b32.xlu1 %v6164_v37, %s4904_s24 }
 0x26b   : > { %v2586_v13 = vpop.permute.xlu0 %2585 }
 0x26c   : > { %v2777_v58 = vpop.permute.xlu1 %2776  ;;  %2631 = vst.msk [vmem:[#allocation4 + $0x30] sm:$0xf] %vm536_vm4, %v2586_v13 }
 0x26d   : > { %2823 = vst.msk [vmem:[#allocation4 + $0x20] sm:$0xf] %vm536_vm4, %v2777_v58 }
 0x26e   : > { %2611 = vrot.lane.b32.xlu1 %v6193_v27, %s4904_s24  ;;  %v4850_v27 = vld [vmem:[%s6437_s3 + $0x110] sm:$0xff]  }
 0x26f   : > { %v2390_v0 = vpop.permute.xlu0 %2389 }
 0x270   : > { %v2200_v3 = vpop.permute.xlu1 %2199  ;;  %2437 = vst.msk [vmem:[#allocation4 + $0x4] sm:$0xf] %vm536_vm4, %v2390_v0 }
 0x271   : > { %2246 = vst.msk [vmem:[#allocation4 + $0x14] sm:$0xf] %vm536_vm4, %v2200_v3 }
 0x272   : > { %2804 = vrot.lane.b32.xlu1 %v4374_v32, %s4904_s24 }
 0x273   : > { %v2582_v37 = vpop.permute.xlu0 %2581 }
 0x274   : > { %v2396_v55 = vpop.permute.xlu1 %2395  ;;  %2629 = vst.msk [vmem:[#allocation4 + $0x8] sm:$0xf] %vm536_vm4, %v2582_v37 }
 0x275   : > { %2440 = vst.msk [vmem:[#allocation4 + $0x40] sm:$0xf] %vm536_vm4, %v2396_v55 }
 0x277   : > { %v2206_v6 = vpop.permute.xlu0 %2205 }
 0x278   : > { %v2588_v39 = vpop.permute.xlu1 %2587  ;;  %2249 = vst.msk [vmem:[#allocation4 + $0x50] sm:$0xf] %vm536_vm4, %v2206_v6  ;;  %v4826_v54 = vld [vmem:[#allocation4] ss:$20 sps:$4 sm:$0xff]  }
 0x279   : > { %2632 = vst.msk [vmem:[#allocation4 + $0x44] sm:$0xf] %vm536_vm4, %v2588_v39 }
 0x27b   : > { %v2779_v33 = vpop.permute.xlu0 %2778 }
 0x27c   : > { %v2392_v38 = vpop.permute.xlu1 %2391  ;;  %2824 = vst.msk [vmem:[#allocation4 + $0x34] sm:$0xf] %vm536_vm4, %v2779_v33  ;;  %v4831_v43 = vld [vmem:[#allocation4 + $0x2c] ss:$20 sps:$4 sm:$0xff]  }
 0x27d   : > { %2438 = vst.msk [vmem:[#allocation4 + $0x18] sm:$0xf] %vm536_vm4, %v2392_v38  ;;  %v2895_v48 = vld [vmem:[#allocation4 + $0x3c] sm:$0xff] }
 0x27f   : > { %v2202_v25 = vpop.permute.xlu0 %2201 }
 0x280   : > { %v2584_v46 = vpop.permute.xlu1 %2583  ;;  %2247 = vst.msk [vmem:[#allocation4 + $0x28] sm:$0xf] %vm536_vm4, %v2202_v25 }
 0x281   : > { %2630 = vst.msk [vmem:[#allocation4 + $0x1c] sm:$0xf] %vm536_vm4, %v2584_v46 }
 0x283   : > { %v2775_v5 = vpop.permute.xlu0 %2774  ;;  %v2893_v41 = vld [vmem:[#allocation4 + $0x30] sm:$0xff] }
 0x284   : > { %v2212_v59 = vpop.permute.xlu1 %2211  ;;  %v4828_v34 = vld [vmem:[#allocation4 + $0x4] ss:$20 sps:$4 sm:$0xff]   ;;  %2822 = vst.msk [vmem:[#allocation4 + $0xc] sm:$0xf] %vm536_vm4, %v2775_v5 }
 0x285   : > { %2252 = vst.msk [vmem:[#allocation4 + $0x8c] sm:$0xf] %vm536_vm4, %v2212_v59  ;;  %3478 = vmatprep.mubr.bf16.mxu1 %v4828_v34 }
 0x286   : > { %3479 = vmatmul.mubr.bf16.vlgmr.msra.gmra.mrb[32].mxu1 %v4826_v54 }
 0x287   : > { %v2402_v44 = vpop.permute.xlu0 %2401  ;;  %4680 = vmatpush3.bf16.msra.mxu1 %v6119_v35  ;;  %v2892_v26 = vld [vmem:[#allocation4 + $0x28] sm:$0xff]  ;;  %3486 = vmatprep.mubr.bf16.mxu1 %v4831_v43 }
 0x288   : > { %v2785_v57 = vpop.permute.xlu1 %2784  ;;  %2443 = vst.msk [vmem:[#allocation4 + $0x7c] sm:$0xf] %vm536_vm4, %v2402_v44  ;;  %4681 = vmatprep.subr.bf16.mxu1 %v4847_v47  ;;  %v4835_v36 = vld [vmem:[#allocation4 + $0x8] ss:$20 sps:$4 sm:$0xff]   ;;  %v4162_v35 = vcombine.low %v2892_v26, %v2895_v48 }
 0x289   : > { %2827 = vst.msk [vmem:[#allocation4 + $0x70] sm:$0xf] %vm536_vm4, %v2785_v57 }
 0x28b   : > { %v2594_v62 = vpop.permute.xlu0 %2593  ;;  %v4837_v30 = vld [vmem:[#allocation4 + $0xc] ss:$20 sps:$4 sm:$0xff]   ;;  %4682 = vmatpush3.bf16.msra.mxu1 %v4847_v47 }
 0x28c   : > { %v2208_v31 = vpop.permute.xlu1 %2207  ;;  %2635 = vst.msk [vmem:[#allocation4 + $0x80] sm:$0xf] %vm536_vm4, %v2594_v62  ;;  %4683 = vmatprep.subr.bf16.mxu1 %v4850_v27  ;;  %3575 = vmatprep.mubr.bf16.mxu0 %v4837_v30 }
 0x28d   : > { %2250 = vst.msk [vmem:[#allocation4 + $0x64] sm:$0xf] %vm536_vm4, %v2208_v31  ;;  %3576 = vmatmul.mubr.bf16.vlgmr.msra.gmra.mrb[48].mxu0 %v4835_v36 }
 0x28e   : > { %3487 = vmatmul.mubr.bf16.gmra.mrb[36].mxu1 %v4162_v35 }
 0x28f   : > { %v2398_v45 = vpop.permute.xlu0 %2397  ;;  %4684 = vmatpush3.bf16.msra.mxu1 %v4850_v27 }
 0x290   : > { %v2781_v4 = vpop.permute.xlu1 %2780  ;;  %2441 = vst.msk [vmem:[#allocation4 + $0x54] sm:$0xf] %vm536_vm4, %v2398_v45  ;;  %4685 = vmatprep.subr.bf16.mxu1 %v4855_v40 }
 0x291   : > { %2825 = vst.msk [vmem:[#allocation4 + $0x48] sm:$0xf] %vm536_vm4, %v2781_v4 }
 0x293   : > { %v2590_v2 = vpop.permute.xlu0 %2589  ;;  %4686 = vmatpush3.bf16.msra.mxu1 %v4855_v40 }
 0x294   : > { %v2404_v49 = vpop.permute.xlu1 %2403  ;;  %2633 = vst.msk [vmem:[#allocation4 + $0x58] sm:$0xf] %vm536_vm4, %v2590_v2 }
 0x295   : > { %2444 = vst.msk [vmem:[#allocation4 + $0x90] sm:$0xf] %vm536_vm4, %v2404_v49 }
 0x297   : > { %v2210_v50 = vpop.permute.xlu0 %2209  ;;  %v2898_v1 = vld [vmem:[#allocation4 + $0x50] sm:$0xff] }
 0x298   : > { %v2400_v42 = vpop.permute.xlu1 %2399  ;;  %v2896_v61 = vld [vmem:[#allocation4 + $0x44] sm:$0xff]  ;;  %2251 = vst.msk [vmem:[#allocation4 + $0x78] sm:$0xf] %vm536_vm4, %v2210_v50 }
 0x299   : > { %v4839_v52 = vld [vmem:[#allocation4 + $0x34] ss:$20 sps:$4 sm:$0xff]   ;;  %2442 = vst.msk [vmem:[#allocation4 + $0x68] sm:$0xf] %vm536_vm4, %v2400_v42  ;;  %v4164_v53 = vcombine.low %v2893_v41, %v2896_v61 }
 0x29a   : > { %3583 = vmatprep.mubr.bf16.mxu0 %v4839_v52 }
 0x29b   : > { %3584 = vmatmul.mubr.bf16.gmra.mrb[52].mxu0 %v4164_v53  ;;  %v2783_v63 = vpop.permute.xlu0 %2782 }
 0x29c   : > { %v2592_v10 = vpop.permute.xlu1 %2591  ;;  %2826 = vst.msk [vmem:[#allocation4 + $0x5c] sm:$0xf] %vm536_vm4, %v2783_v63  ;;  %v4843_v13 = vld [vmem:[#allocation4 + $0x7c] ss:$20 sps:$4 sm:$0xff]  }
 0x29d   : > { %2634 = vst.msk [vmem:[#allocation4 + $0x6c] sm:$0xf] %vm536_vm4, %v2592_v10  ;;  %v2907_v39 = vld [vmem:[#allocation4 + $0x8c] sm:$0xff] }
 0x29f   : > { %v2410_v56 = vpop.permute.xlu0 %2409  ;;  %v2904_v6 = vld [vmem:[#allocation4 + $0x78] sm:$0xff] }
 0x2a0   : > { %v2220_v51 = vpop.permute.xlu1 %2219  ;;  %v2901_v28 = vld [vmem:[#allocation4 + $0x64] sm:$0xff]  ;;  %2447 = vst.msk [vmem:[#allocation4 + $0xcc] sm:$0xf] %vm536_vm4, %v2410_v56  ;;  %v4172_v25 = vcombine.low %v2904_v6, %v2907_v39 }
 0x2a1   : > { %v4841_v60 = vld [vmem:[#allocation4 + $0x54] ss:$20 sps:$4 sm:$0xff]   ;;  %2256 = vst.msk [vmem:[#allocation4 + $0xdc] sm:$0xf] %vm536_vm4, %v2220_v51  ;;  %v4167_v29 = vcombine.low %v2898_v1, %v2901_v28 }
 0x2a2   : > { %3494 = vmatprep.mubr.bf16.mxu1 %v4841_v60 }
 0x2a3   : > { %3495 = vmatmul.mubr.bf16.gmra.mrb[40].mxu1 %v4167_v29  ;;  %v2406_v58 = vpop.permute.xlu0 %2405  ;;  %v2899_v0 = vld [vmem:[#allocation4 + $0x58] sm:$0xff] }
 0x2a4   : > { %v2216_v32 = vpop.permute.xlu1 %2215  ;;  %3502 = vmatprep.mubr.bf16.mxu1 %v4843_v13  ;;  %v2902_v3 = vld [vmem:[#allocation4 + $0x6c] sm:$0xff]  ;;  %2445 = vst.msk [vmem:[#allocation4 + $0xa4] sm:$0xf] %vm536_vm4, %v2406_v58 }
 0x2a5   : > { %v4845_v37 = vld [vmem:[#allocation4 + $0x5c] ss:$20 sps:$4 sm:$0xff]   ;;  %2254 = vst.msk [vmem:[#allocation4 + $0xb4] sm:$0xf] %vm536_vm4, %v2216_v32  ;;  %v4169_v55 = vcombine.low %v2899_v0, %v2902_v3 }
 0x2a6   : > { %3591 = vmatprep.mubr.bf16.mxu0 %v4845_v37  ;;  %v4860_v32 = vld [vmem:[#allocation4 + $0x10] ss:$20 sps:$4 sm:$0xff]  }
 0x2a7   : > { %3592 = vmatmul.mubr.bf16.gmra.mrb[56].mxu0 %v4169_v55  ;;  %v2222_v33 = vpop.permute.xlu0 %2221 }
 0x2a8   : > { %v2412_v38 = vpop.permute.xlu1 %2411  ;;  %2257 = vst.msk [vmem:[#allocation4 + $0xf0] sm:$0xf] %vm536_vm4, %v2222_v33 }
 0x2a9   : > { %2448 = vst.msk [vmem:[#allocation4 + $0xe0] sm:$0xf] %vm536_vm4, %v2412_v38 }
 0x2ab   : > { %3503 = vmatmul.mubr.bf16.gmra.mrb[44].mxu1 %v4172_v25  ;;  %v2218_v46 = vpop.permute.xlu0 %2217  ;;  %v2910_v44 = vld [vmem:[#allocation4 + $0xa0] sm:$0xff]  ;;  %v4863_v25 = vld [vmem:[#allocation4 + $0x38] ss:$20 sps:$4 sm:$0xff]  }
 0x2ac   : > { %v2408_v5 = vpop.permute.xlu1 %2407  ;;  %2255 = vst.msk [vmem:[#allocation4 + $0xc8] sm:$0xf] %vm536_vm4, %v2218_v46  ;;  %v4864_v46 = vld [vmem:[#allocation4 + $0x60] ss:$20 sps:$4 sm:$0xff]  }
 0x2ad   : > { %2446 = vst.msk [vmem:[#allocation4 + $0xb8] sm:$0xf] %vm536_vm4, %v2408_v5 }
 0x2af   : > { %v2418_v59 = vpop.permute.xlu0 %2417 }
 0x2b0   : > { %v2228_v54 = vpop.permute.xlu1 %2227  ;;  %2451 = vst.msk [vmem:[#allocation4 + $0x11c] sm:$0xf] %vm536_vm4, %v2418_v59  ;;  %v4851_v26 = vld [vmem:[#allocation4 + $0xcc] ss:$20 sps:$4 sm:$0xff]  }
 0x2b1   : > { %2260 = vst.msk [vmem:[#allocation4 + $0x12c] sm:$0xf] %vm536_vm4, %v2228_v54  ;;  %v2919_v36 = vld [vmem:[#allocation4 + $0xdc] sm:$0xff] }
 0x2b3   : > { %v2414_v34 = vpop.permute.xlu0 %2413  ;;  %v2916_v31 = vld [vmem:[#allocation4 + $0xc8] sm:$0xff] }
 0x2b4   : > { %v2224_v47 = vpop.permute.xlu1 %2223  ;;  %v2913_v57 = vld [vmem:[#allocation4 + $0xb4] sm:$0xff]  ;;  %2449 = vst.msk [vmem:[#allocation4 + $0xf4] sm:$0xf] %vm536_vm4, %v2414_v34  ;;  %v4182_v40 = vcombine.low %v2916_v31, %v2919_v36 }
 0x2b5   : > { %v4848_v43 = vld [vmem:[#allocation4 + $0xa4] ss:$20 sps:$4 sm:$0xff]   ;;  %2258 = vst.msk [vmem:[#allocation4 + $0x104] sm:$0xf] %vm536_vm4, %v2224_v47  ;;  %v4177_v27 = vcombine.low %v2910_v44, %v2913_v57  ;;  %v4868_v57 = vld [vmem:[#allocation4 + $0x88] ss:$20 sps:$4 sm:$0xff]  }
 0x2b6   : > { %3510 = vmatprep.mubr.bf16.mxu1 %v4848_v43  ;;  %v4869_v43 = vld [vmem:[#allocation4 + $0xb0] ss:$20 sps:$4 sm:$0xff]   ;;  %v4873_v31 = vld [vmem:[#allocation4 + $0xd8] ss:$20 sps:$4 sm:$0xff]   ;;  %v4874_v36 = vld [vmem:[#allocation4 + $0x100] ss:$20 sps:$4 sm:$0xff]  }
 0x2b7   : > { %3511 = vmatmul.mubr.bf16.gmra.mrb[48].mxu1 %v4177_v27  ;;  %v2787_v48 = vpop.permute.xlu0 %2786 }
 0x2b8   : > { %v2420_v62 = vpop.permute.xlu1 %2419  ;;  %3518 = vmatprep.mubr.bf16.mxu1 %v4851_v26  ;;  %2828 = vst.msk [vmem:[#allocation4 + $0x84] sm:$0xf] %vm536_vm4, %v2787_v48 }
 0x2b9   : > { %2452 = vst.msk [vmem:[#allocation4 + $0x130] sm:$0xf] %vm536_vm4, %v2420_v62 }
 0x2bb   : > { %v2226_v30 = vpop.permute.xlu0 %2225  ;;  %v2922_v50 = vld [vmem:[#allocation4 + $0xf0] sm:$0xff] }
 0x2bc   : > { %v2416_v35 = vpop.permute.xlu1 %2415  ;;  %2259 = vst.msk [vmem:[#allocation4 + $0x118] sm:$0xf] %vm536_vm4, %v2226_v30 }
 0x2bd   : > { %2450 = vst.msk [vmem:[#allocation4 + $0x108] sm:$0xf] %vm536_vm4, %v2416_v35 }
 0x2bf   : > { %3519 = vmatmul.mubr.bf16.gmra.mrb[52].mxu1 %v4182_v40  ;;  %v2598_v45 = vpop.permute.xlu0 %2597  ;;  %v2905_v28 = vld [vmem:[#allocation4 + $0x80] sm:$0xff]  ;;  %v4878_v40 = vld [vmem:[#allocation4 + $0x128] ss:$20 sps:$4 sm:$0xff]  }
 0x2c0   : > { %v2596_v4 = vpop.permute.xlu1 %2595  ;;  %2637 = vst.msk [vmem:[#allocation4 + $0xa8] sm:$0xf] %vm536_vm4, %v2598_v45  ;;  %v4856_v52 = vld [vmem:[#allocation4 + $0x11c] ss:$20 sps:$4 sm:$0xff]  }
 0x2c1   : > { %2636 = vst.msk [vmem:[#allocation4 + $0x94] sm:$0xf] %vm536_vm4, %v2596_v4  ;;  %v2931_v56 = vld [vmem:[#allocation4 + $0x12c] sm:$0xff] }
 0x2c3   : > { %v2791_v2 = vpop.permute.xlu0 %2790  ;;  %v2928_v10 = vld [vmem:[#allocation4 + $0x118] sm:$0xff] }
 0x2c4   : > { %v2789_v49 = vpop.permute.xlu1 %2788  ;;  %v2925_v42 = vld [vmem:[#allocation4 + $0x104] sm:$0xff]  ;;  %2830 = vst.msk [vmem:[#allocation4 + $0xac] sm:$0xf] %vm536_vm4, %v2791_v2  ;;  %v4192_v58 = vcombine.low %v2928_v10, %v2931_v56 }
 0x2c5   : > { %v4853_v41 = vld [vmem:[#allocation4 + $0xf4] ss:$20 sps:$4 sm:$0xff]   ;;  %2829 = vst.msk [vmem:[#allocation4 + $0x98] sm:$0xf] %vm536_vm4, %v2789_v49  ;;  %v4187_v61 = vcombine.low %v2922_v50, %v2925_v42 }
 0x2c6   : > { %3526 = vmatprep.mubr.bf16.mxu1 %v4853_v41 }
 0x2c7   : > { %3527 = vmatmul.mubr.bf16.gmra.mrb[56].mxu1 %v4187_v61  ;;  %v2602_v53 = vpop.permute.xlu0 %2601 }
 0x2c8   : > { %v2600_v63 = vpop.permute.xlu1 %2599  ;;  %3534 = vmatprep.mubr.bf16.mxu1 %v4856_v52  ;;  %2639 = vst.msk [vmem:[#allocation4 + $0xd0] sm:$0xf] %vm536_vm4, %v2602_v53 }
 0x2c9   : > { %2638 = vst.msk [vmem:[#allocation4 + $0xbc] sm:$0xf] %vm536_vm4, %v2600_v63 }
 0x2cb   : > { %v2795_v51 = vpop.permute.xlu0 %2794  ;;  %v2911_v37 = vld [vmem:[#allocation4 + $0xa8] sm:$0xff] }
 0x2cc   : > { %v2793_v1 = vpop.permute.xlu1 %2792  ;;  %v2908_v60 = vld [vmem:[#allocation4 + $0x94] sm:$0xff]  ;;  %2832 = vst.msk [vmem:[#allocation4 + $0xd4] sm:$0xf] %vm536_vm4, %v2795_v51 }
 0x2cd   : > { %v4858_v29 = vld [vmem:[#allocation4 + $0x84] ss:$20 sps:$4 sm:$0xff]   ;;  %2831 = vst.msk [vmem:[#allocation4 + $0xc0] sm:$0xf] %vm536_vm4, %v2793_v1  ;;  %v4174_v13 = vcombine.low %v2905_v28, %v2908_v60 }
 0x2ce   : > { %3599 = vmatprep.mubr.bf16.mxu0 %v4858_v29 }
 0x2cf   : > { %3600 = vmatmul.mubr.bf16.gmra.mrb[60].mxu0 %v4174_v13  ;;  %3535 = vmatmul.mubr.bf16.gmra.mrb[60].mxu1 %v4192_v58  ;;  %v2606_v0 = vpop.permute.xlu0 %2605 }
 0x2d0   : > { %v2604_v3 = vpop.permute.xlu1 %2603  ;;  %4687 = vmatprep.mubr.msk.bf16.mxu1 %vm225_vm0, %v4860_v32  ;;  %2641 = vst.msk [vmem:[#allocation4 + $0xf8] sm:$0xf] %vm536_vm4, %v2606_v0 }
 0x2d1   : > { %2640 = vst.msk [vmem:[#allocation4 + $0xe4] sm:$0xf] %vm536_vm4, %v2604_v3 }
 0x2d3   : > { %v2799_v55 = vpop.permute.xlu0 %2798 }
 0x2d4   : > { %v2797_v6 = vpop.permute.xlu1 %2796  ;;  %v2914_v39 = vld [vmem:[#allocation4 + $0xbc] sm:$0xff]  ;;  %2834 = vst.msk [vmem:[#allocation4 + $0xfc] sm:$0xf] %vm536_vm4, %v2799_v55 }
 0x2d5   : > { %v4861_v33 = vld [vmem:[#allocation4 + $0xac] ss:$20 sps:$4 sm:$0xff]   ;;  %2833 = vst.msk [vmem:[#allocation4 + $0xe8] sm:$0xf] %vm536_vm4, %v2797_v6  ;;  %v4179_v38 = vcombine.low %v2911_v37, %v2914_v39 }
 0x2d6   : > { %3607 = vmatprep.mubr.bf16.mxu0 %v4861_v33 }
 0x2d7   : > { %3608 = vmatmul.mubr.bf16.gmra.mrb[64].mxu0 %v4179_v38  ;;  %4688 = vmatmul.mubr.msk.bf16.vlgmr.msra.gmra.mrb[64].mxu1 %vm225_vm0, %v4863_v25  ;;  %v2610_v5 = vpop.permute.xlu0 %2609 }
 0x2d8   : > { %v2801_v59 = vpop.permute.xlu1 %2800  ;;  %4691 = vmatprep.mubr.msk.bf16.mxu1 %vm225_vm0, %v4864_v46  ;;  %2643 = vst.msk [vmem:[#allocation4 + $0x120] sm:$0xf] %vm536_vm4, %v2610_v5  ;;  %v4867_v44 = vld [vmem:[#allocation4 + $0xd0] ss:$20 sps:$4 sm:$0xff]  }
 0x2d9   : > { %2835 = vst.msk [vmem:[#allocation4 + $0x110] sm:$0xf] %vm536_vm4, %v2801_v59 }
 0x2db   : > { %v2803_v54 = vpop.permute.xlu0 %2802 }
 0x2dc   : > { %v2608_v34 = vpop.permute.xlu1 %2607  ;;  %v4865_v47 = vld [vmem:[#allocation4 + $0xd4] ss:$20 sps:$4 sm:$0xff]   ;;  %2836 = vst.msk [vmem:[#allocation4 + $0x124] sm:$0xf] %vm536_vm4, %v2803_v54 }
 0x2dd   : > { %2642 = vst.msk [vmem:[#allocation4 + $0x10c] sm:$0xf] %vm536_vm4, %v2608_v34  ;;  %3615 = vmatprep.mubr.bf16.mxu0 %v4865_v47 }
 0x2df   : > { %3616 = vmatmul.mubr.bf16.gmra.mrb[68].mxu0 %v4867_v44  ;;  %4692 = vmatmul.mubr.msk.bf16.gmra.mrb[68].mxu1 %vm225_vm0, %v4868_v57 }
 0x2e0   : > { %v2612_v27 = vpop.permute.xlu1 %2611  ;;  %4695 = vmatprep.mubr.msk.bf16.mxu1 %vm225_vm0, %v4869_v43  ;;  %v4870_v48 = vld [vmem:[#allocation4 + $0xfc] ss:$20 sps:$4 sm:$0xff]  }
 0x2e1   : > { %2644 = vst.msk [vmem:[#allocation4 + $0x134] sm:$0xf] %vm536_vm4, %v2612_v27  ;;  %3623 = vmatprep.mubr.bf16.mxu0 %v4870_v48 }
 0x2e4   : > { %v2805_v26 = vpop.permute.xlu1 %2804  ;;  %v4872_v62 = vld [vmem:[#allocation4 + $0xf8] ss:$20 sps:$4 sm:$0xff]  }
 0x2e5   : > { %2837 = vst.msk [vmem:[#allocation4 + $0x138] sm:$0xf] %vm536_vm4, %v2805_v26 }
 0x2e7   : > { %3624 = vmatmul.mubr.bf16.gmra.mrb[72].mxu0 %v4872_v62  ;;  %4696 = vmatmul.mubr.msk.bf16.gmra.mrb[72].mxu1 %vm225_vm0, %v4873_v31 }
 0x2e8   : > { %4699 = vmatprep.mubr.msk.bf16.mxu1 %vm225_vm0, %v4874_v36  ;;  %v4877_v35 = vld [vmem:[#allocation4 + $0x120] ss:$20 sps:$4 sm:$0xff]  }
 0x2ec   : > { %v4875_v30 = vld [vmem:[#allocation4 + $0x124] ss:$20 sps:$4 sm:$0xff]  }
 0x2ed   : > { %3631 = vmatprep.mubr.bf16.mxu0 %v4875_v30 }
 0x2ef   : > { %3632 = vmatmul.mubr.bf16.gmra.mrb[76].mxu0 %v4877_v35  ;;  %4700 = vmatmul.mubr.msk.bf16.gmra.mrb[76].mxu1 %vm225_vm0, %v4878_v40 }
 0x359   : > { %v4531_v45 = vpop.f32.mrb[32].mxu1 }
 0x35a   : > { %v4532_v4 = vpop.f32.mrb[33].mxu1 }
 0x35b   : > { %v4533_v2 = vadd.f32 %v4532_v4, %v4531_v45  ;;  %v4534_v49 = vpop.f32.mrb[34].mxu1 }
 0x35c   : > { %v4535_v50 = vpop.f32.mrb[35].mxu1 }
 0x35d   : > { %v4536_v42 = vadd.f32 %v4535_v50, %v4534_v49 }
 0x360   : > { %v4595_v61 = vpop.f32.mrb[48].mxu0 }
 0x361   : > { %v4537_v41 = vpop.f32.mrb[36].mxu1  ;;  %v4596_v53 = vpop.f32.mrb[49].mxu0 }
 0x362   : > { %v4538_v52 = vpop.f32.mrb[37].mxu1  ;;  %v4597_v10 = vadd.f32 %v4596_v53, %v4595_v61  ;;  %v4598_v51 = vpop.f32.mrb[50].mxu0 }
 0x363   : > { %v4539_v63 = vadd.f32 %v4538_v52, %v4537_v41  ;;  %v4540_v56 = vpop.f32.mrb[38].mxu1  ;;  %v4599_v28 = vpop.f32.mrb[51].mxu0 }
 0x364   : > { %v4541_v1 = vpop.f32.mrb[39].mxu1  ;;  %v4600_v29 = vadd.f32 %v4599_v28, %v4598_v51  ;;  %v6338_v13 = vadd.f32 %v4597_v10, %v4533_v2 }
 0x365   : > { %v4542_v60 = vadd.f32 %v4541_v1, %v4540_v56 }
 0x366   : > { %v6340_v58 = vadd.f32 %v4600_v29, %v4536_v42 }
 0x36e   : > { %v4601_v32 = vpop.f32.mrb[52].mxu0 }
 0x36f   : > { %v4602_v0 = vpop.f32.mrb[53].mxu0 }
 0x370   : > { %v4603_v3 = vadd.f32 %v4602_v0, %v4601_v32  ;;  %v4604_v37 = vpop.f32.mrb[54].mxu0 }
 0x371   : > { %v4605_v55 = vpop.f32.mrb[55].mxu0 }
 0x372   : > { %v4606_v6 = vadd.f32 %v4605_v55, %v4604_v37  ;;  %v3586_v39 = vadd.f32 %v4603_v3, %v4539_v63 }
 0x374   : > { %v3589_v33 = vadd.f32 %v4606_v6, %v4542_v60 }
 0x376   : > { %v4543_v38 = vpop.f32.mrb[40].mxu1 }
 0x377   : > { %v4544_v25 = vpop.f32.mrb[41].mxu1 }
 0x378   : > { %v4545_v46 = vadd.f32 %v4544_v25, %v4543_v38  ;;  %v4546_v5 = vpop.f32.mrb[42].mxu1 }
 0x379   : > { %v4547_v59 = vpop.f32.mrb[43].mxu1 }
 0x37a   : > { %v4548_v54 = vadd.f32 %v4547_v59, %v4546_v5  ;;  %v4607_v34 = vpop.f32.mrb[56].mxu0 }
 0x37b   : > { %v4608_v47 = vpop.f32.mrb[57].mxu0 }
 0x37c   : > { %v4609_v44 = vadd.f32 %v4608_v47, %v4607_v34  ;;  %v4610_v57 = vpop.f32.mrb[58].mxu0 }
 0x37d   : > { %v4611_v43 = vpop.f32.mrb[59].mxu0 }
 0x37e   : > { %v4612_v27 = vadd.f32 %v4611_v43, %v4610_v57  ;;  %v4549_v26 = vpop.f32.mrb[44].mxu1  ;;  %v6342_v48 = vadd.f32 %v4609_v44, %v4545_v46 }
 0x37f   : > { %v4550_v62 = vpop.f32.mrb[45].mxu1 }
 0x380   : > { %v4551_v31 = vadd.f32 %v4550_v62, %v4549_v26  ;;  %v4552_v36 = vpop.f32.mrb[46].mxu1  ;;  %v6344_v30 = vadd.f32 %v4612_v27, %v4548_v54 }
 0x381   : > { %v4553_v35 = vpop.f32.mrb[47].mxu1 }
 0x382   : > { %v4554_v40 = vadd.f32 %v4553_v35, %v4552_v36 }
 0x38a   : > { %v4555_v45 = vpop.f32.mrb[48].mxu1 }
 0x38b   : > { %v4556_v4 = vpop.f32.mrb[49].mxu1 }
 0x38c   : > { %v4557_v2 = vadd.f32 %v4556_v4, %v4555_v45  ;;  %v4558_v49 = vpop.f32.mrb[50].mxu1 }
 0x38d   : > { %v4559_v50 = vpop.f32.mrb[51].mxu1 }
 0x38e   : > { %v4560_v42 = vadd.f32 %v4559_v50, %v4558_v49 }
 0x392   : > { %v4561_v41 = vpop.f32.mrb[52].mxu1 }
 0x393   : > { %v4562_v61 = vpop.f32.mrb[53].mxu1 }
 0x394   : > { %v4563_v52 = vadd.f32 %v4562_v61, %v4561_v41  ;;  %v4564_v53 = vpop.f32.mrb[54].mxu1  ;;  %v6358_v41 = vld [vmem:[%s6438_s4] ss:$0 sm:$0xff] }
 0x395   : > { %v4565_v63 = vpop.f32.mrb[55].mxu1 }
 0x396   : > { %v4566_v10 = vadd.f32 %v4565_v63, %v4564_v53 }
 0x39a   : > { %v4567_v56 = vpop.f32.mrb[56].mxu1 }
 0x39b   : > { %v4568_v51 = vpop.f32.mrb[57].mxu1 }
 0x39c   : > { %v6346_v1 = vadd.f32 %v4568_v51, %v4567_v56  ;;  %v4570_v28 = vpop.f32.mrb[58].mxu1 }
 0x39d   : > { %v4571_v60 = vpop.f32.mrb[59].mxu1 }
 0x39e   : > { %v6348_v29 = vadd.f32 %v4571_v60, %v4570_v28 }
 0x3a2   : > { %v4573_v32 = vpop.f32.mrb[60].mxu1  ;;  %v4613_v0 = vpop.f32.mrb[60].mxu0 }
 0x3a3   : > { %v4574_v3 = vpop.f32.mrb[61].mxu1  ;;  %v4614_v37 = vpop.f32.mrb[61].mxu0 }
 0x3a4   : > { %v6350_v55 = vadd.f32 %v4574_v3, %v4573_v32  ;;  %v4615_v6 = vadd.f32 %v4614_v37, %v4613_v0  ;;  %v4576_v38 = vpop.f32.mrb[62].mxu1  ;;  %v4616_v25 = vpop.f32.mrb[62].mxu0 }
 0x3a5   : > { %v4577_v46 = vpop.f32.mrb[63].mxu1  ;;  %v4617_v5 = vpop.f32.mrb[63].mxu0 }
 0x3a6   : > { %v6352_v59 = vadd.f32 %v4577_v46, %v4576_v38  ;;  %v4618_v54 = vadd.f32 %v4617_v5, %v4616_v25  ;;  %v3602_v34 = vadd.f32 %v4615_v6, %v4551_v31 }
 0x3a8   : > { %v3605_v47 = vadd.f32 %v4618_v54, %v4554_v40 }
 0x3aa   : > { %v4619_v44 = vpop.f32.mrb[64].mxu0  ;;  %v4689_v57 = vpop.f32.mrb[64].mxu1 }
 0x3ab   : > { %v3683_v43 = vadd.f32 %v4689_v57, %v3586_v39  ;;  %v4620_v27 = vpop.f32.mrb[65].mxu0  ;;  %v3674_v26 = vpop.f32.mrb[65].mxu1 }
 0x3ac   : > { %v4621_v62 = vadd.f32 %v4620_v27, %v4619_v44  ;;  %v3675_v36 = vadd.f32 %v3674_v26, %v6338_v13  ;;  %v4622_v35 = vpop.f32.mrb[66].mxu0  ;;  %v4690_v45 = vpop.f32.mrb[66].mxu1 }
 0x3ad   : > { %v3686_v4 = vadd.f32 %v4690_v45, %v3589_v33  ;;  %v4623_v49 = vpop.f32.mrb[67].mxu0  ;;  %v3677_v50 = vpop.f32.mrb[67].mxu1  ;;  %v3739_v32 = vadd.f32 %v3683_v43, %v5197_v9 }
 0x3ae   : > { %v3737_v31 = vadd.f32 %v3675_v36, %v5191_v7  ;;  %v4624_v40 = vadd.f32 %v4623_v49, %v4622_v35  ;;  %v3678_v39 = vadd.f32 %v3677_v50, %v6340_v58  ;;  %v3610_v61 = vadd.f32 %v4621_v62, %v4557_v2 }
 0x3af   : > { %v3740_v46 = vadd.f32 %v3686_v4, %v5206_v11  ;;  %v3762_v5 = vadd.f32 %v6358_v41, %v3739_v32 }
 0x3b0   : > { %v3738_v53 = vadd.f32 %v3678_v39, %v5194_v8  ;;  %v3760_v13 = vadd.f32 %v6358_v41, %v3737_v31  ;;  %v3613_v63 = vadd.f32 %v4624_v40, %v4560_v42 }
 0x3b2   : > { %v4625_v56 = vpop.f32.mrb[68].mxu0  ;;  %v4693_v33 = vpop.f32.mrb[68].mxu1  ;;  %3776 = vxpose.xlu0.b32.start [1/16] (narrow) %v3760_v13, 64  ;;  %v3761_v58 = vadd.f32 %v6358_v41, %v3738_v53 }
 0x3b3   : > { %v3699_v51 = vadd.f32 %v4693_v33, %v3602_v34  ;;  %v4626_v28 = vpop.f32.mrb[69].mxu0  ;;  %v3690_v60 = vpop.f32.mrb[69].mxu1 }
 0x3b4   : > { %v4627_v0 = vadd.f32 %v4626_v28, %v4625_v56  ;;  %v3691_v7 = vadd.f32 %v3690_v60, %v6342_v48  ;;  %v4628_v3 = vpop.f32.mrb[70].mxu0  ;;  %v4694_v37 = vpop.f32.mrb[70].mxu1 }
 0x3b5   : > { %v3702_v2 = vadd.f32 %v4694_v37, %v3605_v47  ;;  %v4629_v8 = vpop.f32.mrb[71].mxu0  ;;  %v3693_v6 = vpop.f32.mrb[71].mxu1 }
 0x3b6   : > { %v4630_v38 = vadd.f32 %v4629_v8, %v4628_v3  ;;  %v3694_v42 = vadd.f32 %v3693_v6, %v6344_v30  ;;  %3777 = vxpose.xlu0.b32.cont [2/16] (narrow) %v3761_v58, 64  ;;  %v3618_v25 = vadd.f32 %v4627_v0, %v4563_v52  ;;  %v3741_v47 = vadd.f32 %v3691_v7, %v5209_v12 }
 0x3b7   : > { %v3763_v30 = vadd.f32 %v6358_v41, %v3740_v46 }
 0x3b8   : > { %v3621_v9 = vadd.f32 %v4630_v38, %v4566_v10  ;;  %v3742_v4 = vadd.f32 %v3694_v42, %v5216_v14  ;;  %v3764_v49 = vadd.f32 %v6358_v41, %v3741_v47 }
 0x3ba   : > { %v4631_v54 = vpop.f32.mrb[72].mxu0  ;;  %v4697_v34 = vpop.f32.mrb[72].mxu1  ;;  %3778 = vxpose.xlu0.b32.cont [3/16] (narrow) %v3762_v5, 64  ;;  %v3765_v33 = vadd.f32 %v6358_v41, %v3742_v4 }
 0x3bb   : > { %v3715_v48 = vadd.f32 %v4697_v34, %v3618_v25  ;;  %v4632_v44 = vpop.f32.mrb[73].mxu0  ;;  %v3706_v57 = vpop.f32.mrb[73].mxu1 }
 0x3bc   : > { %v4633_v43 = vadd.f32 %v4632_v44, %v4631_v54  ;;  %v3707_v27 = vadd.f32 %v3706_v57, %v3610_v61  ;;  %v4634_v26 = vpop.f32.mrb[74].mxu0  ;;  %v4698_v62 = vpop.f32.mrb[74].mxu1  ;;  %v3743_v61 = vadd.f32 %v3699_v51, %v5219_v15 }
 0x3bd   : > { %v3718_v52 = vadd.f32 %v4698_v62, %v3621_v9  ;;  %v4635_v36 = vpop.f32.mrb[75].mxu0  ;;  %v3709_v11 = vpop.f32.mrb[75].mxu1  ;;  %v3747_v8 = vadd.f32 %v3715_v48, %v5242_v19 }
 0x3be   : > { %v4636_v35 = vadd.f32 %v4635_v36, %v4634_v26  ;;  %v3710_v45 = vadd.f32 %v3709_v11, %v3613_v63  ;;  %3779 = vxpose.xlu0.b32.cont [4/16] (narrow) %v3763_v30, 64  ;;  %v3626_v10 = vadd.f32 %v4633_v43, %v6346_v1  ;;  %v3766_v15 = vadd.f32 %v6358_v41, %v3743_v61 }
 0x3bf   : > { %v3745_v3 = vadd.f32 %v3707_v27, %v5231_v17 }
 0x3c0   : > { %v3629_v12 = vadd.f32 %v4636_v35, %v6348_v29  ;;  %v3744_v29 = vadd.f32 %v3702_v2, %v5222_v16  ;;  %v3746_v58 = vadd.f32 %v3710_v45, %v5234_v18  ;;  %v3770_v2 = vadd.f32 %v6358_v41, %v3747_v8 }
 0x3c2   : > { %v4637_v50 = vpop.f32.mrb[76].mxu0  ;;  %v4701_v31 = vpop.f32.mrb[76].mxu1  ;;  %3780 = vxpose.xlu0.b32.cont [5/16] (narrow) %v3764_v49, 64  ;;  %v3767_v37 = vadd.f32 %v6358_v41, %v3744_v29  ;;  %v3769_v16 = vadd.f32 %v6358_v41, %v3746_v58 }
 0x3c3   : > { %v4638_v40 = vpop.f32.mrb[77].mxu0  ;;  %v3722_v39 = vpop.f32.mrb[77].mxu1 }
 0x3c4   : > { %v4639_v53 = vadd.f32 %v4638_v40, %v4637_v50  ;;  %v3723_v13 = vadd.f32 %v3722_v39, %v3626_v10  ;;  %v4640_v56 = vpop.f32.mrb[78].mxu0  ;;  %v4702_v63 = vpop.f32.mrb[78].mxu1 }
 0x3c5   : > { %v4641_v1 = vpop.f32.mrb[79].mxu0  ;;  %v3725_v28 = vpop.f32.mrb[79].mxu1 }
 0x3c6   : > { %v3634_v14 = vadd.f32 %v4639_v53, %v6350_v55  ;;  %v4642_v60 = vadd.f32 %v4641_v1, %v4640_v56  ;;  %v3726_v32 = vadd.f32 %v3725_v28, %v3629_v12  ;;  %3781 = vxpose.xlu0.b32.cont [6/16] (narrow) %v3765_v33, 64  ;;  %v3768_v55 = vadd.f32 %v6358_v41, %v3745_v3 }
 0x3c7   : > { %v3749_v17 = vadd.f32 %v3723_v13, %v5248_v21 }
 0x3c8   : > { %v3731_v0 = vadd.f32 %v4701_v31, %v3634_v14  ;;  %v3637_v7 = vadd.f32 %v4642_v60, %v6352_v59  ;;  %v3748_v59 = vadd.f32 %v3718_v52, %v5245_v20  ;;  %v3750_v18 = vadd.f32 %v3726_v32, %v5257_v22 }
 0x3c9   : > { %v3772_v38 = vadd.f32 %v6358_v41, %v3749_v17 }
 0x3ca   : > { %v3734_v51 = vadd.f32 %v4702_v63, %v3637_v7  ;;  %3782 = vxpose.xlu0.b32.cont [7/16] (narrow) %v3766_v15, 64  ;;  %v3771_v6 = vadd.f32 %v6358_v41, %v3748_v59  ;;  %v3773_v19 = vadd.f32 %v6358_v41, %v3750_v18  ;;  %v3751_v42 = vadd.f32 %v3731_v0, %v5260_v23 }
 0x3cc   : > { %v3774_v20 = vadd.f32 %v6358_v41, %v3751_v42  ;;  %v3752_v25 = vadd.f32 %v3734_v51, %v5263_v24 }
 0x3ce   : > { %3783 = vxpose.xlu0.b32.cont [8/16] (narrow) %v3767_v37, 64  ;;  %v3775_v21 = vadd.f32 %v6358_v41, %v3752_v25 }
 0x3d2   : > { %3784 = vxpose.xlu0.b32.cont [9/16] (narrow) %v3768_v55, 64 }
 0x3d6   : > { %3785 = vxpose.xlu0.b32.cont [10/16] (narrow) %v3769_v16, 64 }
 0x3da   : > { %3786 = vxpose.xlu0.b32.cont [11/16] (narrow) %v3770_v2, 64 }
 0x3de   : > { %3787 = vxpose.xlu0.b32.cont [12/16] (narrow) %v3771_v6, 64 }
 0x3e2   : > { %3788 = vxpose.xlu0.b32.cont [13/16] (narrow) %v3772_v38, 64 }
 0x3e6   : > { %3789 = vxpose.xlu0.b32.cont [14/16] (narrow) %v3773_v19, 64 }
 0x3ea   : > { %3790 = vxpose.xlu0.b32.cont [15/16] (narrow) %v3774_v20, 64 }
 0x3ee   : > { %3791 = vxpose.xlu0.b32.end [16/16] (narrow) %v3775_v21, 64 }
 0x432   : > { %v3792_v46 = vpop.trf.xlu0 }
 0x433   : > { %3808 = vst [vmem:[%s6400_s13] sm:$0xff] %v3792_v46 }
 0x436   : > { %v3793_v22 = vpop.trf.xlu0 }
 0x437   : > { %3809 = vst [vmem:[%s6400_s13 + $0x8] sm:$0xff] %v3793_v22 }
 0x43a   : > { %v3794_v23 = vpop.trf.xlu0  ;;  %v3866_v34 = vld [vmem:[%s6400_s13] sm:$0xff] (%p4960_p4) }
 0x43b   : > { %3810 = vst [vmem:[%s6400_s13 + $0x10] sm:$0xff] %v3794_v23  ;;  %3867 = vst [vmem:[%s3824_s16] sm:$0xff] (%p4960_p4), %v3866_v34 }
 0x43e   : > { %v3795_v24 = vpop.trf.xlu0  ;;  %v3868_v48 = vld [vmem:[%s6400_s13 + $0x8] sm:$0xff] (%p4960_p4) }
 0x43f   : > { %3811 = vst [vmem:[%s6400_s13 + $0x18] sm:$0xff] %v3795_v24  ;;  %3869 = vst [vmem:[%s3824_s16 + $0x10] sm:$0xff] (%p4960_p4), %v3868_v48 }
 0x442   : > { %v3796_v41 = vpop.trf.xlu0  ;;  %v3870_v44 = vld [vmem:[%s6400_s13 + $0x10] sm:$0xff] (%p4960_p4) }
 0x443   : > { %3812 = vst [vmem:[%s6400_s13 + $0x20] sm:$0xff] %v3796_v41  ;;  %3871 = vst [vmem:[%s3824_s16 + $0x20] sm:$0xff] (%p4960_p4), %v3870_v44 }
 0x446   : > { %v3797_v5 = vpop.trf.xlu0  ;;  %v3872_v57 = vld [vmem:[%s6400_s13 + $0x18] sm:$0xff] (%p4960_p4) }
 0x447   : > { %3813 = vst [vmem:[%s6400_s13 + $0x28] sm:$0xff] %v3797_v5  ;;  %3873 = vst [vmem:[%s3824_s16 + $0x30] sm:$0xff] (%p4960_p4), %v3872_v57 }
 0x449   : > { %3822 = sbr.rel (!%p4960_p4) target bundleno = 1112 (0x458), region = 44 }
 0x44a   : > { %v3798_v9 = vpop.trf.xlu0  ;;  %v3874_v47 = vld [vmem:[%s6400_s13 + $0x20] sm:$0xff] (%p4960_p4) }
 0x44b   : > { %3814 = vst [vmem:[%s6400_s13 + $0x30] sm:$0xff] %v3798_v9  ;;  %3875 = vst [vmem:[%s3824_s16 + $0x40] sm:$0xff] (%p4960_p4), %v3874_v47 }
 0x44e   : > { %v3799_v54 = vpop.trf.xlu0  ;;  %v3876_v43 = vld [vmem:[%s6400_s13 + $0x28] sm:$0xff] (%p4960_p4) }
 0x44f   : > { %3815 = vst [vmem:[%s6400_s13 + $0x38] sm:$0xff] %v3799_v54  ;;  %3877 = vst [vmem:[%s3824_s16 + $0x50] sm:$0xff] (%p4960_p4), %v3876_v43 }
 0x452   : > { %v3878_v27 = vld [vmem:[%s6400_s13 + $0x30] sm:$0xff] }
 0x453   : > { %3879 = vst [vmem:[%s3824_s16 + $0x60] sm:$0xff] %v3878_v27 }
 0x456   : > { %v3880_v26 = vld [vmem:[%s6400_s13 + $0x38] sm:$0xff] }
 0x457   : > { %3881 = vst [vmem:[%s3824_s16 + $0x70] sm:$0xff] %v3880_v26 }
 0x458 PF: > { %p12_p8 = scmp.ge.s32.totalorder %s4950_s22, 4   ;;  %s6442_s18 = smov %s4897_s19 }
 0x459   : > { %s6443_s19 = smov %s4958_s25  ;;  %s6444_s20 = smov %s4950_s22 }
 0x45a   :  { %14 = sbr.rel (!%p12_p8) target bundleno = 2 (0x2), region = 114 }

</bundles_post_ra>
